<compile_context>
chip_gen: v6e
topology: v6e:2x2x1
jax: 0.10.0
libtpu: 0.0.40
codegen_flags: <defaults>
</compile_context>

<pallas_src>
import math
import functools

import jax
import jax.numpy as jnp
from jax import lax
from jax.experimental import pallas as pl
from jax.experimental.pallas import tpu as pltpu

KSPATIAL = 7                      # spatial attention conv kernel size
PADS = (KSPATIAL - 1) // 2        # = 3


def channel_att_kernel_calc(num_channels, gamma=2, b=1):
    t = int(abs((math.log(num_channels, 2) + b) / gamma))
    return t if t % 2 else t + 1


# ----------------------------------------------------------------------------
# Fused kernel: one grid step == Bblk batch images.
#   inputs : x     (Bblk, H, W*C)   bf16, lane-dense (channel fastest)
#            band  (C, C)           1-D channel conv as band matrix
#            wbd   (W*C, W*C2)      1x1 combine conv as block-diagonal matmul
#            bct   (1, W*C2)        combine bias tiled along lanes
#            bws   (7*2W, W*C2)     7x7 spatial conv as one fused band matmul,
#                                   BN scale folded, columns expanded to C2 lanes
#            shift (1,) SMEM        folded BN shift
#   output : (Bblk, H, W*C2)  lane-dense f32
# ----------------------------------------------------------------------------
def _attention_kernel(Bblk, H, W, C, C2,
                      x_ref, band_ref, wbd_ref, bct_ref, bws_ref, shift_ref,
                      o_ref):
    x = x_ref[...].astype(jnp.float32)                       # (Bblk, H, W*C)

    # ---- channel attention: global max / avg pooling per channel ----
    colmax = jnp.max(x, axis=1)                               # (Bblk, W*C)
    colsum = jnp.sum(x, axis=1)                               # (Bblk, W*C)
    mx = jnp.max(colmax.reshape(Bblk, W, C), axis=1)          # (Bblk, C)
    av = jnp.sum(colsum.reshape(Bblk, W, C), axis=1) * (1.0 / (H * W))

    # conv1d over channels is linear & bias-free -> one merged band matmul
    att = jnp.dot(mx + av, band_ref[...], preferred_element_type=jnp.float32)
    gate_c = jax.nn.sigmoid(att)                              # (Bblk, C)

    # tile the per-channel gate along lanes (index w*C + c -> gate_c[b, c]) and
    # apply it to the activations: one VPU multiply, then ONE shared matmul.
    gate_wc = jnp.broadcast_to(gate_c[:, None, :], (Bblk, W, C)).reshape(Bblk, W * C)
    xg = (x * gate_wc[:, None, :]).reshape(Bblk * H, W * C)

    # ---- "combine" 1x1 conv as a block-diagonal matmul, lane-dense output ----
    comb = jnp.dot(xg, wbd_ref[...], preferred_element_type=jnp.float32)
    comb = comb + bct_ref[...]                                # (Bblk*H, W*C2)

    # ---- spatial attention ----
    comb3 = comb.reshape(Bblk * H, W, C2)                     # small lane split for pooling
    cmax = jnp.max(comb3, axis=-1).reshape(Bblk, H, W)
    cmean = (jnp.sum(comb3, axis=-1) * (1.0 / C2)).reshape(Bblk, H, W)
    cp = jnp.concatenate([cmax, cmean], axis=-1)              # (Bblk, H, 2W)

    zeros = jnp.zeros((Bblk, PADS, 2 * W), jnp.float32)
    padded = jnp.concatenate([zeros, cp, zeros], axis=1)      # (Bblk, H+6, 2W)

    # single fused K = 7*2W matmul (instead of 7 tiny dots); BN scale is already
    # folded into bws and the output is already expanded to W*C2 lanes.
    op = jnp.concatenate([padded[:, kh:kh + H, :] for kh in range(KSPATIAL)],
                         axis=-1).reshape(Bblk * H, KSPATIAL * 2 * W)
    conv = jnp.dot(op, bws_ref[...], preferred_element_type=jnp.float32)

    gate_s = jax.nn.sigmoid(conv + shift_ref[0])              # (Bblk*H, W*C2)
    o_ref[...] = (comb * gate_s).reshape(Bblk, H, W * C2)     # lane-dense store


# ----------------------------------------------------------------------------
# Wrapper: NCHW in / NCHW out, parameter preprocessing in plain JAX.
# ----------------------------------------------------------------------------
def _choose_block_batch(B, H, W, C, C2, min_steps=4, budget_bytes=24 << 20):
    """Largest divisor of B whose grid still has >= min_steps iterations (so a
    v7x megacore gets >= 2 pipelined steps per TensorCore) and whose
    double-buffered per-step footprint stays within a v7x-safe VMEM budget."""
    def step_bytes(bb):
        return 2 * (bb * H * W * C * 2 + bb * H * W * C2 * 4)   # bf16 in, f32 out
    divisors = [d for d in range(1, B + 1) if B % d == 0]
    feasible = [d for d in divisors if step_bytes(d) <= budget_bytes] or [1]
    with_steps = [d for d in feasible if B // d >= min_steps]
    return max(with_steps) if with_steps else max(feasible)


def attention_block_forward(x_nchw, params, min_grid_steps=4):
    B, C, H, W = x_nchw.shape
    C2 = C // 2
    k = params["adaptive_k"]
    p = (k - 1) // 2

    # lane-dense bf16 input stream (halves HBM traffic; accumulation stays f32)
    x = jnp.transpose(x_nchw, (0, 2, 3, 1)).reshape(B, H, W * C).astype(jnp.bfloat16)

    # 1-D channel conv (padding p, no bias) as a (C, C) band matrix
    w1 = params["conv1d_w"].astype(jnp.float32)
    ci = jnp.arange(C)[:, None]
    co = jnp.arange(C)[None, :]
    idx = ci - co + p
    band = jnp.where((idx >= 0) & (idx < k),
                     w1[jnp.clip(idx, 0, k - 1)], 0.0).astype(jnp.float32)

    # combine 1x1 conv (C -> C2) as a block-diagonal (W*C, W*C2) weight
    wc = jnp.transpose(params["combine_w"][:, :, 0, 0], (1, 0)).astype(jnp.float32)  # (C, C2)
    eyeW = jnp.eye(W, dtype=jnp.float32)
    wbd = (eyeW[:, None, :, None] * wc[None, :, None, :]).reshape(W * C, W * C2)
    bct = jnp.tile(params["combine_b"].reshape(1, C2).astype(jnp.float32), (1, W))   # (1, W*C2)

    # BN (eval mode) folded into scale/shift
    scale = params["bn_gamma"] / jnp.sqrt(params["bn_var"] + 1e-5)
    shift = (params["bn_beta"] - params["bn_mean"] * scale).astype(jnp.float32)      # (1,)

    # 7x7 spatial conv as ONE (7*2W, W*C2) band weight: rows are kh-major with the
    # max-map rows [0,W) and mean-map rows [W,2W) inside each kh block; BN scale
    # folded in and output columns repeated C2 times (lane-dense gate).
    Ks = params["spatial_w"].astype(jnp.float32)[0]                                  # (2, 7, 7)
    wi = jnp.arange(W)[:, None]
    wo = jnp.arange(W)[None, :]
    kw_idx = wi - wo + PADS
    valid = (kw_idx >= 0) & (kw_idx < KSPATIAL)
    kw_c = jnp.clip(kw_idx, 0, KSPATIAL - 1)
    bmax = jnp.where(valid[None], Ks[0][:, kw_c], 0.0)       # (7, W, W)
    bmean = jnp.where(valid[None], Ks[1][:, kw_c], 0.0)      # (7, W, W)
    bw = jnp.concatenate([bmax, bmean], axis=1).reshape(KSPATIAL * 2 * W, W)
    bws = jnp.repeat(bw * scale[0], C2, axis=1).astype(jnp.float32)                  # (7*2W, W*C2)

    Bblk = _choose_block_batch(B, H, W, C, C2, min_steps=min_grid_steps)
    grid = (B // Bblk,)
    kernel = functools.partial(_attention_kernel, Bblk, H, W, C, C2)

    cost = pl.CostEstimate(
        flops=int(2 * B * H * (W * C) * (W * C2)
                  + 2 * B * H * (KSPATIAL * 2 * W) * (W * C2)
                  + 2 * B * C * C),
        transcendentals=int(B * C + B * H * W * C2),
        bytes_accessed=int(x.size * 2 + B * H * W * C2 * 4
                           + (band.size + wbd.size + bct.size + bws.size) * 4),
    )

    out_ld = pl.pallas_call(
        kernel,
        out_shape=jax.ShapeDtypeStruct((B, H, W * C2), jnp.float32),
        grid_spec=pltpu.PrefetchScalarGridSpec(
            num_scalar_prefetch=0,
            grid=grid,
            in_specs=[
                pl.BlockSpec((Bblk, H, W * C), lambda g: (g, 0, 0)),
                pl.BlockSpec((C, C), lambda g: (0, 0)),
                pl.BlockSpec((W * C, W * C2), lambda g: (0, 0)),
                pl.BlockSpec((1, W * C2), lambda g: (0, 0)),
                pl.BlockSpec((KSPATIAL * 2 * W, W * C2), lambda g: (0, 0)),
                pl.BlockSpec(memory_space=pltpu.MemorySpace.SMEM),
            ],
            out_specs=pl.BlockSpec((Bblk, H, W * C2), lambda g: (g, 0, 0)),
        ),
        compiler_params=pltpu.CompilerParams(
            dimension_semantics=("parallel",)),
        cost_estimate=cost,
    )(x, band, wbd, bct, bws, shift)

    out_nhwc = out_ld.reshape(B, H, W, C2)
    return jnp.transpose(out_nhwc, (0, 3, 1, 2))                  # NCHW


# ----------------------------------------------------------------------------
# Pure-JAX reference (eval-mode BN) for correctness check.
# ----------------------------------------------------------------------------
def ref_forward(x, params):
    B, C, H, W = x.shape
    k = params["adaptive_k"]
    p = (k - 1) // 2
    w1 = params["conv1d_w"]

    mxp = jnp.max(x, axis=(2, 3))        # (B, C)
    avp = jnp.mean(x, axis=(2, 3))       # (B, C)

    def conv1d_c(v):
        vp = jnp.pad(v, ((0, 0), (p, p)))
        out = jnp.zeros_like(v)
        for j in range(k):
            out = out + w1[j] * vp[:, j:j + C]
        return out

    att = conv1d_c(mxp) + conv1d_c(avp)
    gate = jax.nn.sigmoid(att)[:, :, None, None]
    xg = x * gate

    comb = jnp.einsum("bchw,dc->bdhw", xg, params["combine_w"][:, :, 0, 0]) \
        + params["combine_b"][None, :, None, None]

    cp = jnp.concatenate([jnp.max(comb, axis=1, keepdims=True),
                          jnp.mean(comb, axis=1, keepdims=True)], axis=1)
    sconv = lax.conv_general_dilated(
        cp, params["spatial_w"], window_strides=(1, 1),
        padding=((PADS, PADS), (PADS, PADS)),
        dimension_numbers=("NCHW", "OIHW", "NCHW"))

    scale = params["bn_gamma"] / jnp.sqrt(params["bn_var"] + 1e-5)
    shift = params["bn_beta"] - params["bn_mean"] * scale
    bn_out = sconv * scale[None, :, None, None] + shift[None, :, None, None]
    gate2 = jax.nn.sigmoid(bn_out)
    return comb * gate2


if __name__ == "__main__":
    B, C, H, W = 8, 16, 16, 16
    k = channel_att_kernel_calc(C)        # -> 3 for C=16

    key = jax.random.PRNGKey(0)
    k0, k1, k2, k3, k4 = jax.random.split(key, 5)

    params = dict(
        adaptive_k=k,
        conv1d_w=jax.random.normal(k0, (k,), jnp.float32) * 0.5,
        combine_w=jax.random.normal(k1, (C // 2, C, 1, 1), jnp.float32) * 0.3,
        combine_b=jax.random.normal(k2, (C // 2,), jnp.float32) * 0.1,
        spatial_w=jax.random.normal(k3, (1, 2, KSPATIAL, KSPATIAL), jnp.float32) * 0.1,
        bn_gamma=jnp.full((1,), 1.2, jnp.float32),
        bn_beta=jnp.full((1,), 0.05, jnp.float32),
        bn_mean=jnp.zeros((1,), jnp.float32),
        bn_var=jnp.ones((1,), jnp.float32),
    )

    x = jax.random.normal(k4, (B, C, H, W), jnp.float32)

    out = jax.block_until_ready(attention_block_forward(x, params))
    ref = jax.block_until_ready(ref_forward(x, params))

    assert out.shape == (B, C // 2, H, W), out.shape
    err = float(jnp.max(jnp.abs(out - ref)))
    # tolerance accounts for the bf16 x stream (weights / accumulation stay f32)
    assert jnp.allclose(out, ref, atol=2e-2, rtol=2e-2), err

    print("KERNEL_OK")
</pallas_src>

<mosaic_0001>
module attributes {stable_mosaic.version = 11 : i64} {
  func.func @_attention_kernel(%arg0: i32, %arg1: memref<2x16x256xbf16, #tpu.memory_space<vmem>>, %arg2: memref<16x16xf32, #tpu.memory_space<vmem>>, %arg3: memref<256x128xf32, #tpu.memory_space<vmem>>, %arg4: memref<1x128xf32, #tpu.memory_space<vmem>>, %arg5: memref<224x128xf32, #tpu.memory_space<vmem>>, %arg6: memref<1xf32, #tpu.memory_space<smem>>, %arg7: memref<2x16x128xf32, #tpu.memory_space<vmem>>) attributes {dimension_semantics = [#tpu.dimension_semantics<parallel>], iteration_bounds = array<i64: 4>, scalar_prefetch = 0 : i64, scratch_operands = 0 : i64, tpu.core_type = #tpu.core_type<tc>, window_params = [{transform_indices = @transform_0, window_bounds = array<i64: 2, 16, 256>}, {pipeline_mode = #tpu.pipeline_mode<synchronous>, transform_indices = @transform_1, window_bounds = array<i64: 16, 16>}, {pipeline_mode = #tpu.pipeline_mode<synchronous>, transform_indices = @transform_2, window_bounds = array<i64: 256, 128>}, {pipeline_mode = #tpu.pipeline_mode<synchronous>, transform_indices = @transform_3, window_bounds = array<i64: 1, 128>}, {pipeline_mode = #tpu.pipeline_mode<synchronous>, transform_indices = @transform_4, window_bounds = array<i64: 224, 128>}, {transform_indices = @transform_5, window_bounds = array<i64: 1>}, {transform_indices = @transform_6, window_bounds = array<i64: 2, 16, 128>}]} {
    %c0 = arith.constant 0 : index
    %c0_0 = arith.constant 0 : index
    %c0_1 = arith.constant 0 : index
    %0 = vector.load %arg1[%c0, %c0_0, %c0_1] : memref<2x16x256xbf16, #tpu.memory_space<vmem>>, vector<2x16x256xbf16>
    %1 = arith.extf %0 : vector<2x16x256xbf16> to vector<2x16x256xf32>
    %cst = arith.constant dense<0xFF800000> : vector<2x256xf32>
    %2 = vector.multi_reduction <maximumf>, %1, %cst [1] : vector<2x16x256xf32> to vector<2x256xf32>
    %cst_2 = arith.constant dense<0.000000e+00> : vector<2x256xf32>
    %3 = vector.multi_reduction <add>, %1, %cst_2 [1] : vector<2x16x256xf32> to vector<2x256xf32>
    %4 = vector.shape_cast %2 : vector<2x256xf32> to vector<2x16x16xf32>
    %cst_3 = arith.constant dense<0xFF800000> : vector<2x16xf32>
    %5 = vector.multi_reduction <maximumf>, %4, %cst_3 [1] : vector<2x16x16xf32> to vector<2x16xf32>
    %6 = vector.shape_cast %3 : vector<2x256xf32> to vector<2x16x16xf32>
    %cst_4 = arith.constant dense<0.000000e+00> : vector<2x16xf32>
    %7 = vector.multi_reduction <add>, %6, %cst_4 [1] : vector<2x16x16xf32> to vector<2x16xf32>
    %cst_5 = arith.constant 3.906250e-03 : f32
    %8 = vector.broadcast %cst_5 : f32 to vector<2x16xf32>
    %9 = arith.mulf %7, %8 : vector<2x16xf32>
    %10 = arith.addf %5, %9 : vector<2x16xf32>
    %c0_6 = arith.constant 0 : index
    %c0_7 = arith.constant 0 : index
    %11 = vector.load %arg2[%c0_6, %c0_7] : memref<16x16xf32, #tpu.memory_space<vmem>>, vector<16x16xf32>
    %cst_8 = arith.constant dense<0.000000e+00> : vector<2x16xf32>
    %12 = tpu.matmul %10, %11, %cst_8 {dimension_numbers = #tpu.dot_dimension_numbers<[1], [0], [0], [1], [0, 0, 1, 1], [], []>} : vector<2x16xf32>, vector<16x16xf32>, vector<2x16xf32> -> vector<2x16xf32>
    %13 = arith.negf %12 : vector<2x16xf32>
    %14 = math.exp %13 : vector<2x16xf32>
    %cst_9 = arith.constant 1.000000e+00 : f32
    %15 = vector.broadcast %cst_9 : f32 to vector<2x16xf32>
    %16 = arith.addf %15, %14 : vector<2x16xf32>
    %17 = arith.divf %15, %16 : vector<2x16xf32>
    %18 = vector.shape_cast %17 : vector<2x16xf32> to vector<2x1x16xf32>
    %19 = vector.shape_cast %18 : vector<2x1x16xf32> to vector<2x1x16xf32>
    %20 = vector.broadcast %19 : vector<2x1x16xf32> to vector<2x16x16xf32>
    %21 = vector.shape_cast %20 : vector<2x16x16xf32> to vector<2x256xf32>
    %22 = vector.shape_cast %21 : vector<2x256xf32> to vector<2x1x256xf32>
    %23 = vector.broadcast %22 : vector<2x1x256xf32> to vector<2x16x256xf32>
    %24 = arith.mulf %1, %23 : vector<2x16x256xf32>
    %25 = vector.shape_cast %24 : vector<2x16x256xf32> to vector<32x256xf32>
    %c0_10 = arith.constant 0 : index
    %c0_11 = arith.constant 0 : index
    %26 = vector.load %arg3[%c0_10, %c0_11] : memref<256x128xf32, #tpu.memory_space<vmem>>, vector<256x128xf32>
    %cst_12 = arith.constant dense<0.000000e+00> : vector<32x128xf32>
    %27 = tpu.matmul %25, %26, %cst_12 {dimension_numbers = #tpu.dot_dimension_numbers<[1], [0], [0], [1], [0, 0, 1, 1], [], []>} : vector<32x256xf32>, vector<256x128xf32>, vector<32x128xf32> -> vector<32x128xf32>
    %c0_13 = arith.constant 0 : index
    %c0_14 = arith.constant 0 : index
    %28 = vector.load %arg4[%c0_13, %c0_14] : memref<1x128xf32, #tpu.memory_space<vmem>>, vector<1x128xf32>
    %29 = vector.broadcast %28 : vector<1x128xf32> to vector<32x128xf32>
    %30 = arith.addf %27, %29 : vector<32x128xf32>
    %31 = vector.shape_cast %30 : vector<32x128xf32> to vector<32x16x8xf32>
    %cst_15 = arith.constant dense<0xFF800000> : vector<32x16xf32>
    %32 = vector.multi_reduction <maximumf>, %31, %cst_15 [2] : vector<32x16x8xf32> to vector<32x16xf32>
    %33 = vector.shape_cast %32 : vector<32x16xf32> to vector<2x16x16xf32>
    %cst_16 = arith.constant dense<0.000000e+00> : vector<32x16xf32>
    %34 = vector.multi_reduction <add>, %31, %cst_16 [2] : vector<32x16x8xf32> to vector<32x16xf32>
    %cst_17 = arith.constant 1.250000e-01 : f32
    %35 = vector.broadcast %cst_17 : f32 to vector<32x16xf32>
    %36 = arith.mulf %34, %35 : vector<32x16xf32>
    %37 = vector.shape_cast %36 : vector<32x16xf32> to vector<2x16x16xf32>
    %38 = tpu.concatenate %33, %37 in 2 : vector<2x16x16xf32>, vector<2x16x16xf32> -> vector<2x16x32xf32>
    %cst_18 = arith.constant 0.000000e+00 : f32
    %39 = vector.broadcast %cst_18 : f32 to vector<2x3x32xf32>
    %40 = tpu.concatenate %39, %38, %39 in 1 : vector<2x3x32xf32>, vector<2x16x32xf32>, vector<2x3x32xf32> -> vector<2x22x32xf32>
    %41 = vector.extract_strided_slice %40 {offsets = [0, 0, 0], sizes = [2, 16, 32], strides = [1, 1, 1]} : vector<2x22x32xf32> to vector<2x16x32xf32>
    %42 = vector.extract_strided_slice %40 {offsets = [0, 1, 0], sizes = [2, 16, 32], strides = [1, 1, 1]} : vector<2x22x32xf32> to vector<2x16x32xf32>
    %43 = vector.extract_strided_slice %40 {offsets = [0, 2, 0], sizes = [2, 16, 32], strides = [1, 1, 1]} : vector<2x22x32xf32> to vector<2x16x32xf32>
    %44 = vector.extract_strided_slice %40 {offsets = [0, 3, 0], sizes = [2, 16, 32], strides = [1, 1, 1]} : vector<2x22x32xf32> to vector<2x16x32xf32>
    %45 = vector.extract_strided_slice %40 {offsets = [0, 4, 0], sizes = [2, 16, 32], strides = [1, 1, 1]} : vector<2x22x32xf32> to vector<2x16x32xf32>
    %46 = vector.extract_strided_slice %40 {offsets = [0, 5, 0], sizes = [2, 16, 32], strides = [1, 1, 1]} : vector<2x22x32xf32> to vector<2x16x32xf32>
    %47 = vector.extract_strided_slice %40 {offsets = [0, 6, 0], sizes = [2, 16, 32], strides = [1, 1, 1]} : vector<2x22x32xf32> to vector<2x16x32xf32>
    %48 = tpu.concatenate %41, %42, %43, %44, %45, %46, %47 in 2 : vector<2x16x32xf32>, vector<2x16x32xf32>, vector<2x16x32xf32>, vector<2x16x32xf32>, vector<2x16x32xf32>, vector<2x16x32xf32>, vector<2x16x32xf32> -> vector<2x16x224xf32>
    %49 = vector.shape_cast %48 : vector<2x16x224xf32> to vector<32x224xf32>
    %c0_19 = arith.constant 0 : index
    %c0_20 = arith.constant 0 : index
    %50 = vector.load %arg5[%c0_19, %c0_20] : memref<224x128xf32, #tpu.memory_space<vmem>>, vector<224x128xf32>
    %cst_21 = arith.constant dense<0.000000e+00> : vector<32x128xf32>
    %51 = tpu.matmul %49, %50, %cst_21 {dimension_numbers = #tpu.dot_dimension_numbers<[1], [0], [0], [1], [0, 0, 1, 1], [], []>} : vector<32x224xf32>, vector<224x128xf32>, vector<32x128xf32> -> vector<32x128xf32>
    %c0_22 = arith.constant 0 : index
    %52 = memref.load %arg6[%c0_22] : memref<1xf32, #tpu.memory_space<smem>>
    %53 = vector.broadcast %52 : f32 to vector<32x128xf32>
    %54 = arith.addf %51, %53 : vector<32x128xf32>
    %55 = arith.negf %54 : vector<32x128xf32>
    %56 = math.exp %55 : vector<32x128xf32>
    %cst_23 = arith.constant 1.000000e+00 : f32
    %57 = vector.broadcast %cst_23 : f32 to vector<32x128xf32>
    %58 = arith.addf %57, %56 : vector<32x128xf32>
    %59 = arith.divf %57, %58 : vector<32x128xf32>
    %60 = arith.mulf %30, %59 : vector<32x128xf32>
    %61 = vector.shape_cast %60 : vector<32x128xf32> to vector<2x16x128xf32>
    %c0_24 = arith.constant 0 : index
    %c0_25 = arith.constant 0 : index
    %c0_26 = arith.constant 0 : index
    %62 = vector.load %arg7[%c0_24, %c0_25, %c0_26] : memref<2x16x128xf32, #tpu.memory_space<vmem>>, vector<2x16x128xf32>
    tpu.vector_store %arg7[%c0_24, %c0_25, %c0_26], %61 {strides = array<i32>} : memref<2x16x128xf32, #tpu.memory_space<vmem>>, vector<2x16x128xf32>,
    return
  }
  func.func @transform_0(%arg0: i32) -> (i32, i32, i32) {
    %c0_i32 = arith.constant 0 : i32
    %c0_i32_0 = arith.constant 0 : i32
    %c0_i32_1 = arith.constant 0 : i32
    return %arg0, %c0_i32, %c0_i32_0 : i32, i32, i32
  }
  func.func @transform_1(%arg0: i32) -> (i32, i32) {
    %c0_i32 = arith.constant 0 : i32
    %c0_i32_0 = arith.constant 0 : i32
    %c0_i32_1 = arith.constant 0 : i32
    return %c0_i32, %c0_i32_0 : i32, i32
  }
  func.func @transform_2(%arg0: i32) -> (i32, i32) {
    %c0_i32 = arith.constant 0 : i32
    %c0_i32_0 = arith.constant 0 : i32
    %c0_i32_1 = arith.constant 0 : i32
    return %c0_i32, %c0_i32_0 : i32, i32
  }
  func.func @transform_3(%arg0: i32) -> (i32, i32) {
    %c0_i32 = arith.constant 0 : i32
    %c0_i32_0 = arith.constant 0 : i32
    %c0_i32_1 = arith.constant 0 : i32
    return %c0_i32, %c0_i32_0 : i32, i32
  }
  func.func @transform_4(%arg0: i32) -> (i32, i32) {
    %c0_i32 = arith.constant 0 : i32
    %c0_i32_0 = arith.constant 0 : i32
    %c0_i32_1 = arith.constant 0 : i32
    return %c0_i32, %c0_i32_0 : i32, i32
  }
  func.func @transform_5(%arg0: i32) -> i32 {
    %c0_i32 = arith.constant 0 : i32
    %c0_i32_0 = arith.constant 0 : i32
    return %c0_i32 : i32
  }
  func.func @transform_6(%arg0: i32) -> (i32, i32, i32) {
    %c0_i32 = arith.constant 0 : i32
    %c0_i32_0 = arith.constant 0 : i32
    %c0_i32_1 = arith.constant 0 : i32
    return %arg0, %c0_i32, %c0_i32_0 : i32, i32, i32
  }
}

</mosaic_0001>

<bundles_post_ra>
// kernel: tpu_custom_call.1
= control target key start
LH: loop header
LB: loop body
LE: loop exit
PB: predicated region body
PF: predicated region fallthrough
CT: control target
= control target key end

     0   :  { %s6585_s0 = inlined_call_operand.hbm [shape: bf16[8,16,256], index: 0, kind: input, shape index: {}]   ;;  %s6586_s1 = inlined_call_operand.hbm [shape: f32[16,16], index: 1, kind: input, shape index: {}]   ;;  %s6587_s2 = inlined_call_operand.hbm [shape: f32[256,128], index: 2, kind: input, shape index: {}]   ;;  %s6588_s3 = inlined_call_operand.vmem [shape: f32[1,128], index: 3, kind: input, shape index: {}]   ;;  %s6589_s4 = inlined_call_operand.hbm [shape: f32[224,128], index: 4, kind: input, shape index: {}]   ;;  %s6590_s5 = inlined_call_operand.<no memory space> [shape: f32[1], index: 5, kind: input, shape index: {}]   ;;  %s6591_s6 = inlined_call_operand.hbm [shape: f32[8,16,128], index: 6, kind: output, shape index: {}]  }
   0x1   :  { %11 = sst [smem:[#allocation2]] %s6590_s5 }
   0x2   :  { %12 = vsyncpa [#allocation4], 0 }
   0x3   :  { %14 = vsyncpa [#allocation4 + $0x1], 0 }
   0x4   :  { %15 = vsyncpa [#allocation7], 0 }
   0x5   :  { %16 = vsyncpa [#allocation10], 0 }
   0x6   :  { %17 = vsyncpa [#allocation5], 0 }
   0x7   :  { %19 = vsyncpa [#allocation5 + $0x1], 0  ;;  %s4782_s23 = smov 0   ;;  %s4784_s24 = smov 0  }
   0x8   :  { %s4786_s25 = smov 0   ;;  %s4788_s26 = smov 0  }
   0x9 LB: > { %s4803_s5 = sadd.s32 4294967295, %s4714_s26   ;;  %s4230_s27 = sadd.s32 4294967294, %s4714_s26   ;;  %s4714_s26 = sphi %s4788_s26, %s6629_s26   ;;  %s4710_s25 = sphi %s4786_s25, %s6628_s25   ;;  %s4706_s24 = sphi %s4784_s24, %s6627_s24   ;;  %s4702_s23 = sphi %s4782_s23, %s6626_s23  }
   0xa   : > { %p45_p0 = scmp.ne.s32.totalorder %s4706_s24, %s4702_s23  ;;  %p6592_p1 = scmp.eq.s32.totalorder %s4803_s5, 0 }
   0xb   : > { %p174_p2 = scmp.eq.s32.totalorder %s4803_s5, 3  ;;  %p180_p3 = scmp.eq.s32.totalorder %s4230_s27, 3 }
   0xc   : > { %p4812_p4 = por %p6592_p1, %p45_p0  ;;  %p4231_p5 = scmp.ge.s32.totalorder %s4714_s26, 1 }
   0xd   : > { %p4817_p6 = por %p180_p3, %p45_p0  ;;  %p187_p7 = scmp.lt.s32.totalorder %s4714_s26, 5 }
   0xe   : > { %s6600_s28 = scalar_select %p4812_p4, 1, 0 }
   0xf   : > { %s6601_s29 = scalar_select %p4817_p6, 1, 0 }
  0x10   : > { %p4822_p8 = pnand %p4231_p5, %p187_p7  ;;  %s4716_s7 = smov [#allocation6]  }
  0x11   : > { %s199_s8 = sshll.u32 %s4716_s7, 4  ;;  %s4717_s10 = smov [#allocation8]   ;;  %s200_s8 = int_to_ptr.vmem [resolvable:$true] %s199_s8 }
  0x12   : > { %s6602_s30 = scalar_select %p4822_p8, 1, 0 }
  0x13   : > { %p4337_p9 = pneg %p4822_p8  ;;  %s212_s11 = sshll.u32 %s4717_s10, 4  ;;  %s213_s11 = int_to_ptr.vmem [resolvable:$true] %s212_s11 }
  0x14   : > { %s4718_s12 = smov [#allocation9]   ;;  %s4547_s14 = scalar_lea.vmem %s200_s8, 256 }
  0x15   : > { %p4830_p10 = pnand %p4337_p9, %p6592_p1  ;;  %s228_s13 = sshll.u32 %s4718_s12, 4  ;;  %s229_s13 = int_to_ptr.vmem [resolvable:$true] %s228_s13 }
  0x16   : > { %p4548_p12 = scmp.ne.s32.totalorder %s200_s8, %s4547_s14  ;;  %p4555_p3 = scmp.lt.s32.totalorder %s200_s8, %s200_s8 }
  0x17   : > { %p4538_p11 = pneg %p4830_p10  ;;  %p4556_p5 = scmp.lt.s32.totalorder %s4547_s14, %s4547_s14 }
  0x19   : > { %p4550_p13 = pnand %p4548_p12, %p4538_p11  ;;  %p4557_p7 = por %p4556_p5, %p4555_p3 }
  0x1b   : > { %p4551_p0 = pneg %p4550_p13 }
  0x1d   : > { %p4558_p9 = pnand %p4557_p7, %p4551_p0 }
  0x1f   : > { %4561 = shalt.err (!%p4558_p9)
}
  0x20   : > { %s6593_s15 = smov 128   ;;  %s4720_s16 = smov 8  }
  0x21   : > { %4340 = dma.hbm_to_vmem [thread:$0]  (!%p4830_p10), %s6586_s1, 256, %s200_s8, [#allocation7], %s6593_s15, %s6593_s15, %s4720_s16  }
  0x22   : > { %s4573_s19 = scalar_lea.vmem %s213_s11, 4096  ;;  %p4581_p0 = scmp.lt.s32.totalorder %s213_s11, %s213_s11 }
  0x23   : > { %p4574_p12 = scmp.ne.s32.totalorder %s213_s11, %s4573_s19  ;;  %p4582_p5 = scmp.lt.s32.totalorder %s4573_s19, %s4573_s19 }
  0x25   : > { %p4576_p13 = pnand %p4574_p12, %p4538_p11  ;;  %p4583_p7 = por %p4582_p5, %p4581_p0 }
  0x27   : > { %p4577_p3 = pneg %p4576_p13 }
  0x29   : > { %p4584_p9 = pnand %p4583_p7, %p4577_p3 }
  0x2b   : > { %4587 = shalt.err (!%p4584_p9)
}
  0x2c   : > { %4343 = dma.hbm_to_vmem [thread:$0]  (!%p4830_p10), %s6587_s2, 4096, %s213_s11, [#allocation7], %s6593_s15, %s6593_s15, %s4720_s16  }
  0x2d   : > { %s4599_s22 = scalar_lea.vmem %s229_s13, 3584  ;;  %p4607_p0 = scmp.lt.s32.totalorder %s229_s13, %s229_s13 }
  0x2e   : > { %p4600_p1 = scmp.ne.s32.totalorder %s229_s13, %s4599_s22  ;;  %p4608_p3 = scmp.lt.s32.totalorder %s4599_s22, %s4599_s22 }
  0x30   : > { %p4602_p12 = pnand %p4600_p1, %p4538_p11  ;;  %p4609_p5 = por %p4608_p3, %p4607_p0 }
  0x32   : > { %p4603_p13 = pneg %p4602_p12 }
  0x34   : > { %p4610_p7 = pnand %p4609_p5, %p4603_p13 }
  0x36   : > { %4613 = shalt.err (!%p4610_p7)
}
  0x37   : > { %4346 = dma.hbm_to_vmem [thread:$0]  (!%p4830_p10), %s6589_s4, 3584, %s229_s13, [#allocation10], %s6593_s15, %s6593_s15, %s4720_s16  }
  0x38   : > { %s4870_s8 = sadd.s32 1, %s4714_s26   ;;  %s32_s10 = sadd.s32 1, %s4710_s25 }
  0x39   : > { %s29_s9 = ssub.s32 %s4714_s26, %s4870_s8  ;;  %p39_p11 = scmp.ne.s32.totalorder %s4710_s25, %s4706_s24 }
  0x3a   : > { %p30_p1 = scmp.eq.s32.totalorder %s29_s9, 0  ;;  %p40_p9 = scmp.eq.s32.totalorder %s4714_s26, 0 }
  0x3b   : > { %p4358_p12 = scmp.lt.s32.totalorder %s4714_s26, 4  ;;  %p4884_p0 = por %p174_p2, %p39_p11 }
  0x3c   : > { %s4880_s11 = scalar_select %p30_p1, %s4710_s25, %s32_s10  }
  0x3d   : > { %p41_p13 = por %p40_p9, %p39_p11  ;;  %s245_s14 = sand.u32 1, %s4710_s25  }
  0x3e   : > { %s6604_s12 = scalar_select %p4884_p0, 1, 0 }
  0x3f   : > { %s4264_s17 = sshll.u32 %s4714_s26, 9  ;;  %s4236_s13 = sshll.u32 %s245_s14, 5 }
  0x40   : > { %s4893_s20 = scalar_lea.hbm %s6585_s0, %s4264_s17  ;;  %s249_s21 = scalar_lea.vmem [#allocation3], %s4236_s13 }
  0x41   : > { %s257_s22 = sshll.u32 %s249_s21, 4  ;;  %p4895_p10 = pnand %p4358_p12, %p41_p13  ;;  %s4899_s22 = int_to_ptr.vmem [resolvable:$true] %s257_s22 }
  0x42   : > { %s4901_s7 = scalar_lea.sflag [#allocation4], %s245_s14  ;;  %s4614_s9 = scalar_lea.hbm %s4893_s20, 512 }
  0x43   : > { %p4615_p2 = scmp.ne.s32.totalorder %s4893_s20, %s4614_s9  ;;  %p4616_p3 = pneg %p4895_p10 }
  0x44   : > { %s4619_s13 = scalar_lea.hbm %s6585_s0, 2048  ;;  %p4620_p1 = scmp.lt.s32.totalorder %s4893_s20, %s6585_s0 }
  0x45   : > { %p4617_p5 = pnand %p4616_p3, %p4615_p2  ;;  %p4621_p11 = scmp.lt.s32.totalorder %s4619_s13, %s4614_s9 }
  0x47   : > { %p4618_p7 = pneg %p4617_p5  ;;  %p4622_p9 = por %p4621_p11, %p4620_p1 }
  0x49   : > { %p4623_p12 = pnand %p4622_p9, %p4618_p7 }
  0x4b   : > { %4626 = shalt.err (!%p4623_p12)
}
  0x4c   : > { %s4627_s14 = scalar_lea.vmem %s4899_s22, 512  ;;  %s4721_s21 = smov [#allocation3]  }
  0x4d   : > { %p4628_p13 = scmp.ne.s32.totalorder %s4899_s22, %s4627_s14  ;;  %s4632_s15 = sshll.u32 %s4721_s21, 4  ;;  %s4633_s15 = int_to_ptr.vmem [resolvable:$false] %s4632_s15 }
  0x4e   : > { %s4634_s10 = scalar_lea.vmem %s4633_s15, 1024  ;;  %p4635_p5 = scmp.lt.s32.totalorder %s4899_s22, %s4633_s15 }
  0x4f   : > { %p4630_p6 = pnand %p4628_p13, %p4616_p3  ;;  %p4636_p0 = scmp.lt.s32.totalorder %s4634_s10, %s4627_s14 }
  0x51   : > { %p4631_p2 = pneg %p4630_p6  ;;  %p4637_p4 = por %p4636_p0, %p4635_p5 }
  0x53   : > { %p4638_p8 = pnand %p4637_p4, %p4631_p2 }
  0x55   : > { %4641 = shalt.err (!%p4638_p8)
}
  0x56   : > { %s6606_s9 = smov 128   ;;  %p6607_p6 = scmp.ne.s32.totalorder %s6602_s30, 0 }
  0x57   : > { %4350 = dma.hbm_to_vmem [thread:$0]  (!%p4895_p10), %s4893_s20, 512, %s4899_s22, %s4901_s7, %s6606_s9, %s6606_s9, %s4720_s16  }
  0x58   : > { %269 = sbr.rel (%p6607_p6) target bundleno = 1877 (0x755), region = 44  ;;  %s4928_s17 = sand.u32 (!%p6607_p6), 1, %s4706_s24  }
  0x59   : > { %s6597_s15 = sshll.u32 (!%p6607_p6), %s4928_s17, 5  ;;  %s272_s13 = scalar_lea.sflag (!%p6607_p6), [#allocation4], %s4928_s17 }
  0x5a   : > { %s275_s27 = scalar_lea.vmem (!%p6607_p6), [#allocation3], %s6597_s15  ;;  %p6608_p4 = scmp.ne.s32.totalorder (!%p6607_p6), %s6600_s28, 0 }
  0x5d   : > { %4685 = dma.done.wait (%p6608_p4), %s272_s13, 512  }
  0x5e   : > { %4687 = vsyncadd (%p6608_p4), %s272_s13, 4294966784  ;;  %p6609_p8 = scmp.eq.s32.totalorder %s4803_s5, 0 }
  0x60   : > { %4689 = dma.done.wait (%p6609_p8), [#allocation7], 4352   ;;  %p6610_p0 = pmov %p6609_p8 }
  0x62   : > { %4691 = vsyncadd (%p6610_p0), [#allocation7], 4294962944  ;;  %p6611_p10 = pmov %p6610_p0 }
  0x63   : > { %p6612_p3 = pmov %p6610_p0 }
  0x64   : > { %4693 = dma.done.wait (%p6611_p10), [#allocation10], 3584  }
  0x65   : > { %4695 = vsyncadd (%p6612_p3), [#allocation10], 4294963712  ;;  %v320_v0 = vld [vmem:[%s275_s27 + $0x10] sm:$0xff]  ;;  %v321_v1 = vld [vmem:[%s275_s27 + $0x18] sm:$0xff]  ;;  %s4722_s28 = smov 80   ;;  %s4723_s30 = smov 112  }
  0x66   : > { %v4946_v2 = vunpack.c.l.bf16 %v320_v0  ;;  %v4948_v3 = vunpack.c.l.bf16 %v321_v1  ;;  %v4950_v4 = vunpack.c.h.bf16 %v320_v0  ;;  %v4952_v5 = vunpack.c.h.bf16 %v321_v1  ;;  %v318_v19 = vld [vmem:[%s275_s27] sm:$0xff]  ;;  %v319_v20 = vld [vmem:[%s275_s27 + $0x8] sm:$0xff]  ;;  %s4724_s16 = smov 64   ;;  %s4725_s20 = smov 96  }
  0x67   : > { %v4964_v24 = vunpack.c.l.bf16 %v318_v19  ;;  %v4966_v25 = vunpack.c.l.bf16 %v319_v20  ;;  %s4726_s22 = smov 32   ;;  %s4727_s7 = smov 48   ;;  %v4976_v37 = vunpack.c.h.bf16 %v318_v19  ;;  %v4978_v38 = vunpack.c.h.bf16 %v319_v20  ;;  %v844_v20 = vld [vmem:[#allocation6] sm:$0xff] }
  0x68   : > { %v372_v6 = vadd.f32 %v4948_v3, %v4946_v2  ;;  %v379_v7 = vadd.f32 %v4952_v5, %v4950_v4  ;;  %v344_v16 = vmax.f32 %v4946_v2, %v4948_v3  ;;  %v351_v17 = vmax.f32 %v4950_v4, %v4952_v5  ;;  %s4728_s18 = smov 16   ;;  %s4734_s21 = smov 120  }
  0x69   : > { %v358_v29 = vadd.f32 %v4966_v25, %v4964_v24  ;;  %v365_v42 = vadd.f32 %v4978_v38, %v4976_v37  ;;  %vm447_vm0 = vcmask 1041409   ;;  %v330_v55 = vmax.f32 %v4964_v24, %v4966_v25  ;;  %s4735_s10 = smov 104   ;;  %s4736_s9 = smov 88  }
  0x6a   : > { %v373_v8 = vrot.slane %v372_v6, 4  ;;  %v380_v9 = vrot.slane %v379_v7, 4  ;;  %v345_v22 = vrot.slane %v344_v16, 4  ;;  %v352_v23 = vrot.slane %v351_v17, 4  ;;  %s4737_s13 = smov 72   ;;  %s4738_s27 = smov 56  }
  0x6b   : > { %v359_v33 = vrot.slane %v358_v29, 4  ;;  %v366_v46 = vrot.slane %v365_v42, 4  ;;  %v337_v56 = vmax.f32 %v4976_v37, %v4978_v38  ;;  %v331_v58 = vrot.slane %v330_v55, 4  ;;  %s4739_s19 = smov 40   ;;  %s4740_s14 = smov 24  }
  0x6c   : > { %v374_v10 = vadd.f32 %v373_v8, %v372_v6  ;;  %v381_v12 = vadd.f32 %v380_v9, %v379_v7  ;;  %v346_v27 = vmax.f32 %v344_v16, %v345_v22  ;;  %v353_v28 = vmax.f32 %v351_v17, %v352_v23  ;;  %s4741_s15 = smov 8   ;;  %p6624_p1 = scmp.ne.s32.totalorder %s6604_s12, 0 }
  0x6d   : > { %v360_v36 = vadd.f32 %v359_v33, %v358_v29  ;;  %v367_v49 = vadd.f32 %v366_v46, %v365_v42  ;;  %v338_v59 = vrot.slane %v337_v56, 4  ;;  %v332_v62 = vmax.f32 %v330_v55, %v331_v58 }
  0x6e   : > { %v375_v11 = vrot.slane %v374_v10, 2  ;;  %v382_v15 = vrot.slane %v381_v12, 2  ;;  %v347_v31 = vrot.slane %v346_v27, 2  ;;  %v354_v32 = vrot.slane %v353_v28, 2 }
  0x6f   : > { %v361_v41 = vrot.slane %v360_v36, 2  ;;  %v368_v51 = vrot.slane %v367_v49, 2  ;;  %v339_v63 = vmax.f32 %v337_v56, %v338_v59  ;;  %v333_v1 = vrot.slane %v332_v62, 2 }
  0x70   : > { %v376_v13 = vadd.f32 %v375_v11, %v374_v10  ;;  %v383_v21 = vadd.f32 %v382_v15, %v381_v12  ;;  %v348_v34 = vmax.f32 %v346_v27, %v347_v31  ;;  %v355_v35 = vmax.f32 %v353_v28, %v354_v32 }
  0x71   : > { %v362_v45 = vadd.f32 %v361_v41, %v360_v36  ;;  %v369_v54 = vadd.f32 %v368_v51, %v367_v49  ;;  %v340_v6 = vrot.slane %v339_v63, 2  ;;  %v334_v7 = vmax.f32 %v332_v62, %v333_v1 }
  0x72   : > { %v377_v14 = vrot.slane %v376_v13, 1  ;;  %v384_v26 = vrot.slane %v383_v21, 1  ;;  %v349_v39 = vrot.slane %v348_v34, 1  ;;  %v356_v40 = vrot.slane %v355_v35, 1 }
  0x73   : > { %v363_v48 = vrot.slane %v362_v45, 1  ;;  %v370_v57 = vrot.slane %v369_v54, 1  ;;  %v341_v8 = vmax.f32 %v339_v63, %v340_v6  ;;  %v335_v9 = vrot.slane %v334_v7, 1 }
  0x74   : > { %v378_v18 = vadd.f32 %v377_v14, %v376_v13  ;;  %v385_v30 = vadd.f32 %v384_v26, %v383_v21  ;;  %v350_v43 = vmax.f32 %v348_v34, %v349_v39  ;;  %v357_v44 = vmax.f32 %v355_v35, %v356_v40 }
  0x75   : > { %v364_v50 = vadd.f32 %v363_v48, %v362_v45  ;;  %v371_v60 = vadd.f32 %v370_v57, %v369_v54  ;;  %v342_v10 = vrot.slane %v341_v8, 1  ;;  %v336_v11 = vmax.f32 %v334_v7, %v335_v9 }
  0x76   : > { %626 = vrot.lane.b32.xlu1 %v378_v18, %s4722_s28  ;;  %618 = vrot.lane.b32.xlu0 %v378_v18, %s4723_s30  ;;  %v4426_v47 = vpack.i.bf16 %v357_v44, %v350_v43  ;;  %v674_v52 = vrot.slane %v378_v18, 7  ;;  %v690_v61 = vrot.slane %v385_v30, 7  ;;  %v446_v13 = vrot.slane %v350_v43, 7 }
  0x77   : > { %v343_v12 = vmax.f32 %v341_v8, %v342_v10  ;;  %v463_v14 = vrot.slane %v357_v44, 7  ;;  %v4729_v19 = vmov 0.0   ;;  %vm4730_vm1 = vmmov 0  }
  0x78   : > { %v4991_v53 = vsel %vm447_vm0, %v674_v52, %v364_v50  ;;  %v5004_v0 = vsel %vm447_vm0, %v690_v61, %v371_v60  ;;  %v5020_v16 = vsel %vm447_vm0, %v446_v13, %v336_v11  ;;  %4314 = vmatprep.subr.mxu1 %v4729_v19  ;;  %4318 = vmatprep.mubr.msk.f32.mxu1 %vm4730_vm1, %v4729_v19  ;;  %v4731_v49 = vmov 1983009808  }
  0x79   : > { %v5017_v15 = vsel %vm447_vm0, %v463_v14, %v343_v12  ;;  %v4456_v17 = vpack.i.bf16 %v343_v12, %v336_v11  ;;  %3996 = vmatprep.subr.mxu0 %v4729_v19  ;;  %v499_v51 = vlaneseq  ;;  %v4732_v52 = vmov 1934713408  }
  0x7a   : > { %630 = vrot.lane.b32.xlu1 %v378_v18, %s4724_s16  ;;  %622 = vrot.lane.b32.xlu0 %v378_v18, %s4725_s20  ;;  %v529_v54 = vunpack.c.l.s4 %v4732_v52  ;;  %vm595_vm2 = vcmask 130048   ;;  %vm1116_vm3 = vcmask 261120   ;;  %vm1119_vm4 = vcmask 392192  }
  0x7b   : > { %v5067_v58 = vshrl.u32 %v499_v51, 7  ;;  %vm1122_vm5 = vcmask 523264   ;;  %vm1125_vm6 = vcmask 654336   ;;  %vm6598_vm7 = vcmask 785408  }
  0x7c   : > { %v530_v59 = vunpack.c.0.s8 %v529_v54  ;;  %vm1131_vm8 = vcmask 916480   ;;  %vm2546_vm9 = vcmask 64512   ;;  %vm3463_vm10 = vcmask 261312  }
  0x7d   : > { %vm3352_vm11 = vcmask 1042434   ;;  %vm3070_vm12 = vcmask 130112   ;;  %vm3354_vm13 = vcmask 1043459   ;;  %vm3356_vm14 = vcmask 1044484  }
  0x7e   : > { %638 = vrot.lane.b32.xlu1 %v378_v18, %s4726_s22  ;;  %634 = vrot.lane.b32.xlu0 %v378_v18, %s4727_s7  ;;  %v5073_v8 = vsub.s32 %v530_v59, %v5067_v58  ;;  %vm3358_vm15 = vcmask 1045509   ;;  %vm3360_vm1 = vcmask 1046534  }
  0x82   : > { %648 = vrot.lane.b32.xlu1 %v385_v30, %s4723_s30  ;;  %642 = vrot.lane.b32.xlu0 %v378_v18, %s4728_s18  ;;  %v845_v18 = vld [vmem:[#allocation6 + $0x8] sm:$0xff] }
  0x83   : > { %4315 = vmatpush3.msra.mxu1 %v845_v18 }
  0x84   : > { %4316 = vmatprep.subr.mxu1 %v4729_v19 }
  0x85   : > { %4317 = vmatpush3.msra.mxu1 %v844_v20 }
  0x86   : > { %656 = vrot.lane.b32.xlu1 %v385_v30, %s4722_s28  ;;  %652 = vrot.lane.b32.xlu0 %v385_v30, %s4725_s20 }
  0x8a   : > { %664 = vrot.lane.b32.xlu1 %v385_v30, %s4727_s7  ;;  %660 = vrot.lane.b32.xlu0 %v385_v30, %s4724_s16 }
  0x8e   : > { %672 = vrot.lane.b32.xlu1 %v385_v30, %s4728_s18  ;;  %668 = vrot.lane.b32.xlu0 %v385_v30, %s4726_s22 }
  0x92   : > { %4427 = vrot.lane.b32.xlu1 %v4426_v47, %s4725_s20  ;;  %4422 = vrot.lane.b32.xlu0 %v4426_v47, %s4723_s30 }
  0x96   : > { %4437 = vrot.lane.b32.xlu1 %v4426_v47, %s4724_s16  ;;  %4432 = vrot.lane.b32.xlu0 %v4426_v47, %s4722_s28 }
  0x9a   : > { %4447 = vrot.lane.b32.xlu1 %v4426_v47, %s4726_s22  ;;  %4442 = vrot.lane.b32.xlu0 %v4426_v47, %s4727_s7 }
  0x9e   : > { %4452 = vrot.lane.b32.xlu0 %v4426_v47, %s4728_s18  ;;  %616 = vrot.lane.b32.xlu1 %v364_v50, %s4723_s30 }
  0xa2   : > { %620 = vrot.lane.b32.xlu0 %v364_v50, %s4725_s20  ;;  %624 = vrot.lane.b32.xlu1 %v364_v50, %s4722_s28 }
  0xa6   : > { %628 = vrot.lane.b32.xlu0 %v364_v50, %s4724_s16  ;;  %632 = vrot.lane.b32.xlu1 %v364_v50, %s4727_s7 }
  0xaa   : > { %636 = vrot.lane.b32.xlu0 %v364_v50, %s4726_s22  ;;  %640 = vrot.lane.b32.xlu1 %v364_v50, %s4728_s18  ;;  %v497_v50 = vunpack.c.l.s4 %v4731_v49 }
  0xac   : > { %v498_v57 = vunpack.c.0.s8 %v497_v50 }
  0xae   : > { %646 = vrot.lane.b32.xlu0 %v371_v60, %s4723_s30  ;;  %650 = vrot.lane.b32.xlu1 %v371_v60, %s4725_s20  ;;  %v5070_v7 = vsub.s32 %v498_v57, %v5067_v58 }
  0xb2   : > { %654 = vrot.lane.b32.xlu0 %v371_v60, %s4722_s28  ;;  %658 = vrot.lane.b32.xlu1 %v371_v60, %s4724_s16 }
  0xb6   : > { %662 = vrot.lane.b32.xlu0 %v371_v60, %s4727_s7  ;;  %666 = vrot.lane.b32.xlu1 %v371_v60, %s4726_s22 }
  0xba   : > { %670 = vrot.lane.b32.xlu0 %v371_v60, %s4728_s18  ;;  %4457 = vrot.lane.b32.xlu1 %v4456_v17, %s4723_s30 }
  0xbe   : > { %4462 = vrot.lane.b32.xlu0 %v4456_v17, %s4725_s20  ;;  %4467 = vrot.lane.b32.xlu1 %v4456_v17, %s4722_s28 }
  0xc2   : > { %4472 = vrot.lane.b32.xlu0 %v4456_v17, %s4724_s16  ;;  %4477 = vrot.lane.b32.xlu1 %v4456_v17, %s4727_s7 }
  0xc6   : > { %4482 = vrot.lane.b32.xlu0 %v4456_v17, %s4726_s22  ;;  %4487 = vrot.lane.b32.xlu1 %v4456_v17, %s4728_s18 }
  0xe8   : > { %v627_v21 = vpop.permute.xlu1 %626  ;;  %v5036_v22 = vpop.permute.xlu0 %618 }
  0xe9   : > { %v680_v1 = vrot.slane %v627_v21, 7  ;;  %v676_v13 = vrot.slane %v5036_v22, 7 }
  0xec   : > { %v631_v23 = vpop.permute.xlu1 %630  ;;  %v623_v26 = vpop.permute.xlu0 %622 }
  0xed   : > { %v682_v6 = vrot.slane %v631_v23, 7  ;;  %v678_v9 = vrot.slane %v623_v26, 7 }
  0xf0   : > { %v639_v27 = vpop.permute.xlu1 %638  ;;  %v635_v28 = vpop.permute.xlu0 %634 }
  0xf1   : > { %v686_v62 = vrot.slane %v639_v27, 7  ;;  %v684_v10 = vrot.slane %v635_v28, 7 }
  0xf4   : > { %v5038_v29 = vpop.permute.xlu1 %648  ;;  %v643_v30 = vpop.permute.xlu0 %642 }
  0xf5   : > { %v688_v63 = vrot.slane %v643_v30, 7  ;;  %v692_v14 = vrot.slane %v5038_v29, 7 }
  0xf8   : > { %v5040_v31 = vpop.permute.xlu1 %656  ;;  %v5042_v32 = vpop.permute.xlu0 %652 }
  0xf9   : > { %v696_v17 = vrot.slane %v5040_v31, 7  ;;  %v694_v30 = vrot.slane %v5042_v32, 7 }
  0xfc   : > { %v5044_v33 = vpop.permute.xlu1 %664  ;;  %v5046_v34 = vpop.permute.xlu0 %660 }
  0xfd   : > { %v700_v22 = vrot.slane %v5044_v33, 7  ;;  %v698_v31 = vrot.slane %v5046_v34, 7 }
 0x100   : > { %v5048_v35 = vpop.permute.xlu1 %672  ;;  %v5050_v36 = vpop.permute.xlu0 %668 }
 0x101   : > { %v702_v54 = vrot.slane %v5050_v36, 7 }
 0x104   : > { %v5052_v39 = vpop.permute.xlu1 %4427  ;;  %v5054_v40 = vpop.permute.xlu0 %4422 }
 0x105   : > { %v4430_v18 = vunpack.i.h.bf16 %v5052_v39  ;;  %v4429_v50 = vunpack.i.l.bf16 %v5052_v39  ;;  %v4425_v52 = vunpack.i.h.bf16 %v5054_v40  ;;  %v4424_v59 = vunpack.i.l.bf16 %v5054_v40 }
 0x107   : > { %v5094_v33 = vrot.slane %v4430_v18, 7 }
 0x108   : > { %v5056_v41 = vpop.permute.xlu1 %4437  ;;  %v5058_v42 = vpop.permute.xlu0 %4432 }
 0x109   : > { %v4440_v34 = vunpack.i.h.bf16 %v5056_v41  ;;  %v4434_v40 = vunpack.i.l.bf16 %v5058_v42 }
 0x10c   : > { %v5060_v43 = vpop.permute.xlu1 %4447  ;;  %v5062_v44 = vpop.permute.xlu0 %4442 }
 0x10d   : > { %v4449_v18 = vunpack.i.l.bf16 %v5060_v43 }
 0x110   : > { %v5064_v45 = vpop.permute.xlu0 %4452  ;;  %v617_v46 = vpop.permute.xlu1 %616 }
 0x114   : > { %v621_v47 = vpop.permute.xlu0 %620  ;;  %v625_v48 = vpop.permute.xlu1 %624 }
 0x115   : > { %v679_v23 = vsel %vm447_vm0, %v678_v9, %v621_v47  ;;  %v681_v27 = vsel %vm447_vm0, %v680_v1, %v625_v48  ;;  %v677_v47 = vsel %vm447_vm0, %v676_v13, %v617_v46  ;;  %v704_v48 = vrot.slane %v5048_v35, 7 }
 0x116   : > { %v4435_v1 = vunpack.i.h.bf16 %v5058_v42  ;;  %v4450_v13 = vunpack.i.h.bf16 %v5060_v43  ;;  %v4445_v42 = vunpack.i.h.bf16 %v5062_v44 }
 0x118   : > { %v629_v55 = vpop.permute.xlu0 %628  ;;  %v633_v56 = vpop.permute.xlu1 %632 }
 0x119   : > { %v683_v26 = vsel %vm447_vm0, %v682_v6, %v629_v55  ;;  %v685_v28 = vsel %vm447_vm0, %v684_v10, %v633_v56  ;;  %v722_v55 = vcombine.low %v4991_v53, %v679_v23  ;;  %v730_v56 = vcombine.low %v677_v47, %v681_v27 }
 0x11a   : > { %v451_v53 = vrot.slane %v4429_v50, 7  ;;  %v4444_v23 = vunpack.i.l.bf16 %v5062_v44  ;;  %v5127_v44 = vrot.slane %v4449_v18, 7 }
 0x11b   : > { %v729_v6 = vrot.slane %v722_v55, %v5070_v7  ;;  %v737_v9 = vrot.slane %v730_v56, %v5070_v7  ;;  %v473_v55 = vrot.slane %v4445_v42, 7 }
 0x11c   : > { %v637_v60 = vpop.permute.xlu0 %636  ;;  %v641_v61 = vpop.permute.xlu1 %640 }
 0x11d   : > { %v687_v11 = vsel %vm447_vm0, %v686_v62, %v637_v60  ;;  %v689_v12 = vsel %vm447_vm0, %v688_v63, %v641_v61  ;;  %v465_v61 = vrot.slane %v4425_v52, 7  ;;  %v4439_v62 = vunpack.i.l.bf16 %v5056_v41 }
 0x11e   : > { %v738_v49 = vcombine.low %v683_v26, %v687_v11  ;;  %v746_v29 = vcombine.low %v685_v28, %v689_v12  ;;  %v5108_v12 = vrot.slane %v4424_v59, 7  ;;  %v5113_v41 = vrot.slane %v4440_v34, 7 }
 0x11f   : > { %v469_v28 = vrot.slane %v4435_v1, 7  ;;  %v5122_v52 = vrot.slane %v4450_v13, 7  ;;  %v4454_v59 = vunpack.i.l.bf16 %v5064_v45 }
 0x120   : > { %v647_v20 = vpop.permute.xlu0 %646  ;;  %v651_v21 = vpop.permute.xlu1 %650  ;;  %v745_v60 = vrot.slane %v738_v49, %v5070_v7  ;;  %v753_v46 = vrot.slane %v746_v29, %v5070_v7 }
 0x121   : > { %v693_v35 = vsel %vm447_vm0, %v692_v14, %v647_v20  ;;  %v695_v36 = vsel %vm447_vm0, %v694_v30, %v651_v21  ;;  %v5117_v21 = vrot.slane %v4439_v62, 7  ;;  %v754_v30 = vcombine.low %v729_v6, %v737_v9 }
 0x122   : > { %v772_v14 = vcombine.low %v5004_v0, %v695_v36  ;;  %v762_v20 = vcombine.low %v745_v60, %v753_v46  ;;  %v453_v0 = vrot.slane %v4434_v40, 7 }
 0x124   : > { %v655_v32 = vpop.permute.xlu0 %654  ;;  %v659_v57 = vpop.permute.xlu1 %658  ;;  %v779_v43 = vrot.slane %v772_v14, %v5070_v7  ;;  %v769_v56 = vrot.slane %v762_v20, %v5073_v8 }
 0x125   : > { %v697_v39 = vsel %vm447_vm0, %v696_v17, %v655_v32  ;;  %v699_v26 = vsel %vm447_vm0, %v698_v31, %v659_v57  ;;  %v5130_v32 = vrot.slane %v4444_v23, 7  ;;  %v4455_v57 = vunpack.i.h.bf16 %v5064_v45 }
 0x126   : > { %v780_v63 = vcombine.low %v693_v35, %v697_v39  ;;  %v761_v39 = vrot.slane %v754_v30, %v5073_v8  ;;  %v461_v30 = vrot.slane %v4454_v59, 7 }
 0x128   : > { %v663_v10 = vpop.permute.xlu0 %662  ;;  %v667_v11 = vpop.permute.xlu1 %666  ;;  %v787_v27 = vrot.slane %v780_v63, %v5070_v7  ;;  %v770_v40 = vcombine.low %v761_v39, %v769_v56  ;;  %v771_v6 = vcombine.high %v761_v39, %v769_v56 }
 0x129   : > { %v703_v17 = vsel %vm447_vm0, %v702_v54, %v667_v11  ;;  %v701_v47 = vsel %vm447_vm0, %v700_v22, %v663_v10 }
 0x12a   : > { %v788_v49 = vcombine.low %v699_v26, %v703_v17  ;;  %v804_v34 = vcombine.low %v779_v43, %v787_v27  ;;  %v477_v26 = vrot.slane %v4455_v57, 7 }
 0x12c   : > { %v671_v29 = vpop.permute.xlu0 %670  ;;  %v4458_v50 = vpop.permute.xlu1 %4457  ;;  %v795_v60 = vrot.slane %v788_v49, %v5070_v7  ;;  %v811_v45 = vrot.slane %v804_v34, %v5073_v8 }
 0x12d   : > { %v705_v54 = vsel %vm447_vm0, %v704_v48, %v671_v29  ;;  %v4460_v48 = vunpack.i.h.bf16 %v4458_v50  ;;  %v4459_v10 = vunpack.i.l.bf16 %v4458_v50 }
 0x12e   : > { %v796_v31 = vcombine.low %v701_v47, %v705_v54 }
 0x12f   : > { %v466_v18 = vsel %vm447_vm0, %v465_v61, %v4460_v48 }
 0x130   : > { %v803_v22 = vrot.slane %v796_v31, %v5070_v7  ;;  %v4463_v46 = vpop.permute.xlu0 %4462  ;;  %v4468_v35 = vpop.permute.xlu1 %4467 }
 0x131   : > { %v4465_v36 = vunpack.i.h.bf16 %v4463_v46  ;;  %v4464_v62 = vunpack.i.l.bf16 %v4463_v46  ;;  %v4470_v63 = vunpack.i.h.bf16 %v4468_v35  ;;  %v4469_v1 = vunpack.i.l.bf16 %v4468_v35 }
 0x132   : > { %v812_v9 = vcombine.low %v795_v60, %v803_v22 }
 0x133   : > { %v468_v11 = vsel %vm447_vm0, %v5094_v33, %v4465_v36  ;;  %v452_v13 = vsel %vm447_vm0, %v451_v53, %v4464_v62  ;;  %v470_v14 = vsel %vm447_vm0, %v469_v28, %v4470_v63  ;;  %v454_v20 = vsel %vm447_vm0, %v453_v0, %v4469_v1 }
 0x134   : > { %v819_v17 = vrot.slane %v812_v9, %v5073_v8  ;;  %v545_v42 = vcombine.low %v5017_v15, %v468_v11  ;;  %v4473_v23 = vpop.permute.xlu0 %4472  ;;  %v4478_v27 = vpop.permute.xlu1 %4477  ;;  %v495_v49 = vcombine.low %v5020_v16, %v452_v13  ;;  %v553_v29 = vcombine.low %v466_v18, %v470_v14 }
 0x135   : > { %v822_v33 = vsel %vm595_vm2, %v770_v40, 0.0  ;;  %v450_v28 = vsel %vm447_vm0, %v5108_v12, %v4459_v10  ;;  %v4475_v61 = vunpack.i.h.bf16 %v4473_v23  ;;  %v4474_v47 = vunpack.i.l.bf16 %v4473_v23 }
 0x136   : > { %v820_v53 = vcombine.low %v811_v45, %v819_v17  ;;  %v821_v50 = vcombine.high %v811_v45, %v819_v17  ;;  %v503_v43 = vcombine.low %v450_v28, %v454_v20  ;;  %v4480_v15 = vunpack.i.h.bf16 %v4478_v27 }
 0x137   : > { %v831_v0 = vsel %vm595_vm2, %v771_v6, 0.0  ;;  %v552_v16 = vrot.slane %v545_v42, %v5070_v7  ;;  %v502_v39 = vrot.slane %v495_v49, %v5070_v7  ;;  %v560_v12 = vrot.slane %v553_v29, %v5070_v7 }
 0x138   : > { %v823_v54 = vsel %vm595_vm2, %v820_v53, 0.0  ;;  %v832_v56 = vsel %vm595_vm2, %v821_v50, 0.0  ;;  %v4483_v31 = vpop.permute.xlu0 %4482  ;;  %v4488_v57 = vpop.permute.xlu1 %4487  ;;  %v4479_v60 = vunpack.i.l.bf16 %v4478_v27  ;;  %v510_v35 = vrot.slane %v503_v43, %v5070_v7 }
 0x139   : > { %v824_v59 = vadd.f32 %v823_v54, %v822_v33  ;;  %v833_v34 = vadd.f32 %v832_v56, %v831_v0  ;;  %v4485_v22 = vunpack.i.h.bf16 %v4483_v31  ;;  %v4484_v48 = vunpack.i.l.bf16 %v4483_v31 }
 0x13a   : > { %v4490_v46 = vunpack.i.h.bf16 %v4488_v57  ;;  %v472_v36 = vsel %vm447_vm0, %v5113_v41, %v4475_v61  ;;  %v456_v62 = vsel %vm447_vm0, %v5117_v21, %v4474_v47  ;;  %v474_v63 = vsel %vm447_vm0, %v473_v55, %v4480_v15 }
 0x13b   : > { %v476_v1 = vsel %vm447_vm0, %v5122_v52, %v4485_v22  ;;  %v460_v40 = vsel %vm447_vm0, %v5127_v44, %v4484_v48  ;;  %v4489_v9 = vunpack.i.l.bf16 %v4488_v57  ;;  %v577_v10 = vcombine.low %v552_v16, %v560_v12 }
 0x13c   : > { %v478_v6 = vsel %vm447_vm0, %v477_v26, %v4490_v46  ;;  %v511_v45 = vcombine.low %v456_v62, %v460_v40  ;;  %v561_v11 = vcombine.low %v472_v36, %v476_v1  ;;  %v825_v14 = vrot.slane %v824_v59, 4 }
 0x13d   : > { %v569_v13 = vcombine.low %v474_v63, %v478_v6  ;;  %v834_v41 = vrot.slane %v833_v34, 4  ;;  %v458_v21 = vsel %vm447_vm0, %v5130_v32, %v4479_v60  ;;  %v462_v55 = vsel %vm447_vm0, %v461_v30, %v4489_v9 }
 0x13e   : > { %v518_v17 = vrot.slane %v511_v45, %v5070_v7  ;;  %v568_v52 = vrot.slane %v561_v11, %v5070_v7  ;;  %v519_v18 = vcombine.low %v458_v21, %v462_v55  ;;  %v527_v42 = vcombine.low %v502_v39, %v510_v35  ;;  %v1181_v21 = vld [vmem:[#allocation8 + $0xf8] sm:$0xff] }
 0x13f   : > { %v576_v44 = vrot.slane %v569_v13, %v5070_v7  ;;  %v826_v27 = vadd.f32 %v825_v14, %v824_v59  ;;  %v835_v26 = vadd.f32 %v834_v41, %v833_v34  ;;  %v584_v49 = vrot.slane %v577_v10, %v5073_v8  ;;  %v1165_v55 = vld [vmem:[#allocation8 + $0x78] sm:$0xff]  ;;  %4270 = vmatprep.subr.mxu1 %v1181_v21  ;;  %v1154_v21 = vld [vmem:[#allocation8 + $0x20] sm:$0xff] }
 0x140   : > { %v526_v20 = vrot.slane %v519_v18, %v5070_v7  ;;  %v534_v30 = vrot.slane %v527_v42, %v5073_v8  ;;  %v1179_v18 = vld [vmem:[#allocation8 + $0xe8] sm:$0xff] }
 0x141   : > { %v585_v23 = vcombine.low %v568_v52, %v576_v44  ;;  %v827_v28 = vrot.slane %v826_v27, 2  ;;  %v836_v43 = vrot.slane %v835_v26, 2  ;;  %v1164_v52 = vld [vmem:[#allocation8 + $0x70] sm:$0xff]  ;;  %v1163_v44 = vld [vmem:[#allocation8 + $0x68] sm:$0xff] }
 0x142   : > { %v535_v29 = vcombine.low %v518_v17, %v526_v20  ;;  %v1180_v17 = vld [vmem:[#allocation8 + $0xf0] sm:$0xff] }
 0x143   : > { %v592_v32 = vrot.slane %v585_v23, %v5073_v8  ;;  %v828_v57 = vadd.f32 %v827_v28, %v826_v27  ;;  %v837_v59 = vadd.f32 %v836_v43, %v835_v26  ;;  %v5186_v28 = vsub.s32 0, %v5067_v58  ;;  %v1162_v43 = vld [vmem:[#allocation8 + $0x60] sm:$0xff] }
 0x144   : > { %v542_v33 = vrot.slane %v535_v29, %v5073_v8 }
 0x145   : > { %v593_v53 = vcombine.low %v584_v49, %v592_v32  ;;  %v594_v50 = vcombine.high %v584_v49, %v592_v32  ;;  %v829_v22 = vrot.slane %v828_v57, 1  ;;  %v838_v48 = vrot.slane %v837_v59, 1 }
 0x146   : > { %v543_v61 = vcombine.low %v534_v30, %v542_v33  ;;  %v544_v47 = vcombine.high %v534_v30, %v542_v33  ;;  %v4733_v49 = vmov 1966171168  }
 0x147   : > { %v597_v15 = vsel %vm595_vm2, %v593_v53, -inf  ;;  %v606_v0 = vsel %vm595_vm2, %v594_v50, -inf  ;;  %v830_v63 = vadd.f32 %v829_v22, %v828_v57  ;;  %v839_v1 = vadd.f32 %v838_v48, %v837_v59  ;;  %v1178_v53 = vld [vmem:[#allocation8 + $0xe0] sm:$0xff]  ;;  %v1159_v57 = vld [vmem:[#allocation8 + $0x48] sm:$0xff] }
 0x148   : > { %v596_v54 = vsel %vm595_vm2, %v543_v61, -inf  ;;  %v605_v56 = vsel %vm595_vm2, %v544_v47, -inf  ;;  %v929_v29 = vunpack.c.l.s4 %v4733_v49  ;;  %v1177_v61 = vld [vmem:[#allocation8 + $0xd8] sm:$0xff]  ;;  %v1158_v48 = vld [vmem:[#allocation8 + $0x40] sm:$0xff] }
 0x149   : > { %v598_v16 = vmax.f32 %v596_v54, %v597_v15  ;;  %v607_v31 = vmax.f32 %v605_v56, %v606_v0  ;;  %v840_v45 = vmul.f32 0.00390625, %v830_v63  ;;  %v841_v11 = vmul.f32 0.00390625, %v839_v1  ;;  %v1161_v47 = vld [vmem:[#allocation8 + $0x58] sm:$0xff]  ;;  %v1176_v54 = vld [vmem:[#allocation8 + $0xd0] sm:$0xff] }
 0x14a   : > { %v930_v32 = vunpack.c.0.s8 %v929_v29  ;;  %v1152_v29 = vld [vmem:[#allocation8 + $0x10] sm:$0xff] }
 0x14b   : > { %v599_v34 = vrot.slane %v598_v16, 4  ;;  %v608_v39 = vrot.slane %v607_v31, 4 }
 0x14c   : > { %v933_v30 = vsub.s32 %v930_v32, %v5067_v58  ;;  %v1167_v32 = vld [vmem:[#allocation8 + $0x88] sm:$0xff] }
 0x14d   : > { %v600_v12 = vmax.f32 %v598_v16, %v599_v34  ;;  %v609_v60 = vmax.f32 %v607_v31, %v608_v39  ;;  %v1160_v16 = vld [vmem:[#allocation8 + $0x50] sm:$0xff]  ;;  %v1175_v31 = vld [vmem:[#allocation8 + $0xc8] sm:$0xff] }
 0x14f   : > { %v601_v46 = vrot.slane %v600_v12, 2  ;;  %v610_v35 = vrot.slane %v609_v60, 2 }
 0x151   : > { %v602_v36 = vmax.f32 %v600_v12, %v601_v46  ;;  %v611_v62 = vmax.f32 %v609_v60, %v610_v35  ;;  %v1174_v12 = vld [vmem:[#allocation8 + $0xc0] sm:$0xff]  ;;  %v1173_v46 = vld [vmem:[#allocation8 + $0xb8] sm:$0xff] }
 0x152   : > { %v1157_v35 = vld [vmem:[#allocation8 + $0x38] sm:$0xff] }
 0x153   : > { %v603_v40 = vrot.slane %v602_v36, 1  ;;  %v612_v6 = vrot.slane %v611_v62, 1 }
 0x155   : > { %v604_v9 = vmax.f32 %v602_v36, %v603_v40  ;;  %v613_v10 = vmax.f32 %v611_v62, %v612_v6  ;;  %v1172_v40 = vld [vmem:[#allocation8 + $0xb0] sm:$0xff] }
 0x156   : > { %v1156_v6 = vld [vmem:[#allocation8 + $0x30] sm:$0xff] }
 0x157   : > { %v842_v13 = vadd.f32 %v840_v45, %v604_v9  ;;  %v843_v14 = vadd.f32 %v841_v11, %v613_v10  ;;  %v1171_v9 = vld [vmem:[#allocation8 + $0xa8] sm:$0xff] }
 0x159   : > { %v848_v41 = vsel %vm447_vm0, %v843_v14, %v842_v13  ;;  %v1155_v14 = vld [vmem:[#allocation8 + $0x28] sm:$0xff] }
 0x15a   : > { %4319 = vmatmul.mubr.msk.f32.vlgmr.msra.gmra.mxu1 %vm595_vm2, %v848_v41  ;;  %v1170_v41 = vld [vmem:[#allocation8 + $0xa0] sm:$0xff] }
 0x15b   : > { %4271 = vmatpush3.msra.mxu1 %v1165_v55 }
 0x15c   : > { %4272 = vmatprep.subr.mxu1 %v1180_v17 }
 0x15d   : > { %4273 = vmatpush3.msra.mxu1 %v1164_v52 }
 0x15e   : > { %4274 = vmatprep.subr.mxu1 %v1179_v18 }
 0x15f   : > { %4275 = vmatpush3.msra.mxu1 %v1163_v44 }
 0x160   : > { %4276 = vmatprep.subr.mxu1 %v1178_v53 }
 0x161   : > { %4277 = vmatpush3.msra.mxu1 %v1162_v43  ;;  %v1166_v43 = vld [vmem:[#allocation8 + $0x80] sm:$0xff] }
 0x162   : > { %4278 = vmatprep.subr.mxu1 %v1177_v61  ;;  %v1150_v61 = vld [vmem:[#allocation8] sm:$0xff] }
 0x163   : > { %4279 = vmatpush3.msra.mxu1 %v1161_v47 }
 0x164   : > { %4280 = vmatprep.subr.mxu1 %v1176_v54 }
 0x165   : > { %4281 = vmatpush3.msra.mxu1 %v1160_v16 }
 0x166   : > { %4282 = vmatprep.subr.mxu1 %v1175_v31 }
 0x167   : > { %4283 = vmatpush3.msra.mxu1 %v1159_v57 }
 0x168   : > { %4284 = vmatprep.subr.mxu1 %v1174_v12 }
 0x169   : > { %4285 = vmatpush3.msra.mxu1 %v1158_v48 }
 0x16a   : > { %4286 = vmatprep.subr.mxu1 %v1173_v46 }
 0x16b   : > { %4287 = vmatpush3.msra.mxu1 %v1157_v35 }
 0x16c   : > { %4288 = vmatprep.subr.mxu1 %v1172_v40 }
 0x16d   : > { %4289 = vmatpush3.msra.mxu1 %v1156_v6 }
 0x16e   : > { %4290 = vmatprep.subr.mxu1 %v1171_v9 }
 0x16f   : > { %4291 = vmatpush3.msra.mxu1 %v1155_v14 }
 0x170   : > { %4292 = vmatprep.subr.mxu1 %v1170_v41 }
 0x171   : > { %4293 = vmatpush3.msra.mxu1 %v1154_v21 }
 0x21a   : > { %v917_v42 = vpop.f32.mrf.mxu1 }
 0x21b   : > { %v4247_v20 = vmul.f32 -1.442695, %v917_v42  ;;  %v1169_v42 = vld [vmem:[#allocation8 + $0x98] sm:$0xff] }
 0x21c   : > { %v4320_v23 = vpop.f32.mrf.mxu1  ;;  %4294 = vmatprep.subr.mxu1 %v1169_v42 }
 0x21d   : > { %4516 = vpow2.f32 %v4247_v20  ;;  %v1153_v20 = vld [vmem:[#allocation8 + $0x18] sm:$0xff]  ;;  %v1168_v23 = vld [vmem:[#allocation8 + $0x90] sm:$0xff] }
 0x21e   : > { %4295 = vmatpush3.msra.mxu1 %v1153_v20 }
 0x21f   : > { %4296 = vmatprep.subr.mxu1 %v1168_v23 }
 0x220   : > { %4297 = vmatpush3.msra.mxu1 %v1152_v29 }
 0x221   : > { %4298 = vmatprep.subr.mxu1 %v1167_v32 }
 0x22a   : > { %v4517_v27 = vpop.eup %4516 }
 0x22b   : > { %v924_v26 = vadd.f32 1.0, %v4517_v27 }
 0x22d   : > { %4518 = vrcp.f32 %v924_v26 }
 0x23a   : > { %v4519_v33 = vpop.eup %4518 }
 0x23b   : > { %v934_v50 = vrot.slane %v4519_v33, %v933_v30 }
 0x23d   : > { %v942_v15 = vrot.slane %v934_v50, %v933_v30  ;;  %v935_v0 = vcombine.high %v934_v50, %v934_v50 }
 0x23f   : > { %v953_v56 = vrot.slane %v942_v15, %v5186_v28  ;;  %v949_v39 = vrot.slane %v935_v0, %v933_v30  ;;  %v1151_v30 = vld [vmem:[#allocation8 + $0x8] sm:$0xff] }
 0x240   : > { %4299 = vmatpush3.msra.mxu1 %v1151_v30 }
 0x241   : > { %v967_v59 = vrot.slane %v953_v56, %v5070_v7  ;;  %v960_v34 = vcombine.high %v953_v56, %v4729_v19  ;;  %v957_v1 = vrot.slane %v949_v39, %v5186_v28  ;;  %4300 = vmatprep.subr.mxu1 %v1166_v43 }
 0x242   : > { %4301 = vmatpush3.msra.mxu1 %v1150_v61 }
 0x243   : > { %v5192_v60 = vrot.slane %v967_v59, %v5073_v8  ;;  %v975_v22 = vcombine.high %v967_v59, %v4729_v19  ;;  %v974_v63 = vrot.slane %v960_v34, %v5070_v7  ;;  %v1016_v13 = vrot.slane %v957_v1, %v5070_v7 }
 0x244   : > { %v1009_v55 = vcombine.high %v957_v1, %v4729_v19 }
 0x245   : > { %v1005_v36 = vcombine.high %v5192_v60, %v4729_v19  ;;  %v989_v62 = vrot.slane %v975_v22, %v5073_v8  ;;  %v997_v45 = vrot.slane %v974_v63, %v5073_v8  ;;  %v990_v11 = vcombine.high %v974_v63, %v4729_v19 }
 0x246   : > { %v1031_v18 = vrot.slane %v1016_v13, %v5073_v8  ;;  %v1024_v44 = vcombine.high %v1016_v13, %v4729_v19  ;;  %v1023_v49 = vrot.slane %v1009_v55, %v5070_v7 }
 0x247   : > { %1060 = vrot.lane.b32.xlu0 %v1005_v36, %s4728_s18  ;;  %1068 = vrot.lane.b32.xlu1 %v989_v62, %s4726_s22  ;;  %v1006_v10 = vcombine.high %v989_v62, %v4729_v19  ;;  %v1007_v17 = vcombine.high %v997_v45, %v4729_v19  ;;  %v1004_v52 = vrot.slane %v990_v11, %v5073_v8 }
 0x248   : > { %v1054_v27 = vcombine.high %v1031_v18, %v4729_v19  ;;  %v1038_v26 = vrot.slane %v1024_v44, %v5073_v8  ;;  %v1046_v53 = vrot.slane %v1023_v49, %v5073_v8  ;;  %v1039_v50 = vcombine.high %v1023_v49, %v4729_v19 }
 0x249   : > { %v1008_v47 = vcombine.high %v1004_v52, %v4729_v19 }
 0x24a   : > { %v1055_v33 = vcombine.high %v1038_v26, %v4729_v19  ;;  %v1056_v15 = vcombine.high %v1046_v53, %v4729_v19  ;;  %v1053_v0 = vrot.slane %v1039_v50, %v5073_v8 }
 0x24b   : > { %1076 = vrot.lane.b32.xlu0 %v1006_v10, %s4727_s7  ;;  %1084 = vrot.lane.b32.xlu1 %v997_v45, %s4724_s16 }
 0x24c   : > { %v1057_v54 = vcombine.high %v1053_v0, %v4729_v19 }
 0x24f   : > { %1092 = vrot.lane.b32.xlu0 %v1007_v17, %s4722_s28  ;;  %1100 = vrot.lane.b32.xlu1 %v1004_v52, %s4725_s20 }
 0x253   : > { %1062 = vrot.lane.b32.xlu1 %v1054_v27, %s4728_s18  ;;  %1070 = vrot.lane.b32.xlu0 %v1038_v26, %s4726_s22 }
 0x257   : > { %1078 = vrot.lane.b32.xlu1 %v1055_v33, %s4727_s7  ;;  %1086 = vrot.lane.b32.xlu0 %v1046_v53, %s4724_s16 }
 0x25b   : > { %1108 = vrot.lane.b32.xlu0 %v1008_v47, %s4723_s30  ;;  %1094 = vrot.lane.b32.xlu1 %v1056_v15, %s4722_s28 }
 0x25f   : > { %1102 = vrot.lane.b32.xlu0 %v1053_v0, %s4725_s20  ;;  %1110 = vrot.lane.b32.xlu1 %v1057_v54, %s4723_s30 }
 0x2b9   : > { %v1061_v56 = vpop.permute.xlu0 %1060  ;;  %v1069_v16 = vpop.permute.xlu1 %1068 }
 0x2ba   : > { %v1114_v39 = vsel %vm595_vm2, %v5192_v60, %v1061_v56 }
 0x2bb   : > { %v1117_v12 = vsel %vm1116_vm3, %v1114_v39, %v1069_v16 }
 0x2bd   : > { %v1077_v31 = vpop.permute.xlu0 %1076  ;;  %v1085_v57 = vpop.permute.xlu1 %1084 }
 0x2be   : > { %v1120_v46 = vsel %vm1119_vm4, %v1117_v12, %v1077_v31 }
 0x2bf   : > { %v1123_v35 = vsel %vm1122_vm5, %v1120_v46, %v1085_v57 }
 0x2c1   : > { %v1093_v59 = vpop.permute.xlu0 %1092  ;;  %v1101_v34 = vpop.permute.xlu1 %1100 }
 0x2c2   : > { %v1126_v1 = vsel %vm1125_vm6, %v1123_v35, %v1093_v59 }
 0x2c3   : > { %v1129_v40 = vsel %vm6598_vm7, %v1126_v1, %v1101_v34 }
 0x2c5   : > { %v1063_v22 = vpop.permute.xlu1 %1062  ;;  %v1071_v48 = vpop.permute.xlu0 %1070 }
 0x2c6   : > { %v1115_v36 = vsel %vm595_vm2, %v1031_v18, %v1063_v22 }
 0x2c7   : > { %v1118_v60 = vsel %vm1116_vm3, %v1115_v36, %v1071_v48 }
 0x2c9   : > { %v1079_v62 = vpop.permute.xlu1 %1078  ;;  %v1087_v63 = vpop.permute.xlu0 %1086 }
 0x2ca   : > { %v1121_v6 = vsel %vm1119_vm4, %v1118_v60, %v1079_v62  ;;  %vm3362_vm4 = vcmask 1047559  }
 0x2cb   : > { %v1124_v13 = vsel %vm1122_vm5, %v1121_v6, %v1087_v63 }
 0x2cd   : > { %v1109_v9 = vpop.permute.xlu0 %1108  ;;  %v1095_v10 = vpop.permute.xlu1 %1094 }
 0x2ce   : > { %v1132_v45 = vsel %vm1131_vm8, %v1129_v40, %v1109_v9  ;;  %v1127_v14 = vsel %vm1125_vm6, %v1124_v13, %v1095_v10  ;;  %vm3784_vm6 = vcmask 1042432  }
 0x2cf   : > { %v1137_v11 = vrot.slane %v1132_v45, %v5186_v28 }
 0x2d1   : > { %v1103_v41 = vpop.permute.xlu0 %1102  ;;  %v1111_v21 = vpop.permute.xlu1 %1110  ;;  %v1143_v55 = vmul.f32 %v1137_v11, %v4976_v37  ;;  %v1142_v17 = vmul.f32 %v1137_v11, %v4964_v24  ;;  %v1145_v44 = vmul.f32 %v1137_v11, %v4978_v38  ;;  %v1144_v20 = vmul.f32 %v1137_v11, %v4966_v25 }
 0x2d2   : > { %v1130_v52 = vsel %vm6598_vm7, %v1127_v14, %v1103_v41  ;;  %vm3828_vm7 = vcmask 1045504  }
 0x2d3   : > { %v1133_v18 = vsel %vm1131_vm8, %v1130_v52, %v1111_v21  ;;  %1253 = vmatprep.mubr.f32.mxu1 %v1143_v55  ;;  %vm3805_vm8 = vcmask 1046528  }
 0x2d4   : > { %v1141_v42 = vrot.slane %v1133_v18, %v5186_v28  ;;  %1254 = vmatmul.mubr.f32.vlgmr.msra.gmra.mxu1 %v1142_v17  ;;  %v4248_v28 = vld [vmem:[%s6588_s3] ss:$0 sm:$0xff] }
 0x2d5   : > { %1258 = vmatprep.mubr.f32.mxu1 %v1145_v44 }
 0x2d6   : > { %v1147_v23 = vmul.f32 %v1141_v42, %v4950_v4  ;;  %v1146_v37 = vmul.f32 %v1141_v42, %v4946_v2  ;;  %v1149_v24 = vmul.f32 %v1141_v42, %v4952_v5  ;;  %v1148_v27 = vmul.f32 %v1141_v42, %v4948_v3 }
 0x2d8   : > { %1259 = vmatmul.mubr.f32.gmra.mxu1 %v1144_v20 }
 0x2d9   : > { %1263 = vmatprep.mubr.f32.mxu1 %v1147_v23 }
 0x2dc   : > { %1264 = vmatmul.mubr.f32.gmra.mxu1 %v1146_v37 }
 0x2dd   : > { %1268 = vmatprep.mubr.f32.mxu1 %v1149_v24 }
 0x2e0   : > { %1269 = vmatmul.mubr.f32.gmra.mxu1 %v1148_v27 }
 0x394   : > { %v4302_v38 = vpop.f32.mrf.mxu1 }
 0x396   : > { %v4303_v26 = vpop.f32.mrf.mxu1 }
 0x397   : > { %v4304_v25 = vadd.f32 %v4303_v26, %v4302_v38 }
 0x398   : > { %v4305_v49 = vpop.f32.mrf.mxu1 }
 0x399   : > { %v5259_v4 = vadd.f32 %v4304_v25, %v4248_v28 }
 0x39a   : > { %v4306_v29 = vpop.f32.mrf.mxu1 }
 0x39b   : > { %v4307_v32 = vadd.f32 %v4306_v29, %v4305_v49  ;;  %1278 = vrot.lane.b32.xlu0 %v5259_v4, %s4734_s21 }
 0x39c   : > { %v4308_v3 = vpop.f32.mrf.mxu1 }
 0x39d   : > { %v5263_v2 = vadd.f32 %v4307_v32, %v4248_v28 }
 0x39e   : > { %v4309_v5 = vpop.f32.mrf.mxu1 }
 0x39f   : > { %1280 = vrot.lane.b32.xlu1 %v5263_v2, %s4734_s21  ;;  %1290 = vrot.lane.b32.xlu0 %v5259_v4, %s4723_s30  ;;  %v4310_v33 = vadd.f32 %v4309_v5, %v4308_v3 }
 0x3a0   : > { %v4311_v30 = vpop.f32.mrf.mxu1 }
 0x3a1   : > { %v5321_v50 = vadd.f32 %v4310_v33, %v4248_v28 }
 0x3a2   : > { %v4312_v53 = vpop.f32.mrf.mxu1 }
 0x3a3   : > { %1292 = vrot.lane.b32.xlu1 %v5263_v2, %s4723_s30  ;;  %1302 = vrot.lane.b32.xlu0 %v5259_v4, %s4735_s10  ;;  %v4313_v43 = vadd.f32 %v4312_v53, %v4311_v30 }
 0x3a5   : > { %v5327_v61 = vadd.f32 %v4313_v43, %v4248_v28 }
 0x3a7   : > { %1304 = vrot.lane.b32.xlu1 %v5263_v2, %s4735_s10  ;;  %1314 = vrot.lane.b32.xlu0 %v5259_v4, %s4725_s20 }
 0x3ab   : > { %1316 = vrot.lane.b32.xlu1 %v5263_v2, %s4725_s20  ;;  %1326 = vrot.lane.b32.xlu0 %v5259_v4, %s4736_s9 }
 0x3af   : > { %1328 = vrot.lane.b32.xlu1 %v5263_v2, %s4736_s9  ;;  %1338 = vrot.lane.b32.xlu0 %v5259_v4, %s4722_s28 }
 0x3b3   : > { %1340 = vrot.lane.b32.xlu1 %v5263_v2, %s4722_s28  ;;  %1350 = vrot.lane.b32.xlu0 %v5259_v4, %s4737_s13 }
 0x3b7   : > { %1352 = vrot.lane.b32.xlu1 %v5263_v2, %s4737_s13  ;;  %1362 = vrot.lane.b32.xlu0 %v5259_v4, %s4724_s16 }
 0x3bb   : > { %1364 = vrot.lane.b32.xlu1 %v5263_v2, %s4724_s16  ;;  %1374 = vrot.lane.b32.xlu0 %v5259_v4, %s4738_s27 }
 0x3bf   : > { %1376 = vrot.lane.b32.xlu1 %v5263_v2, %s4738_s27  ;;  %1386 = vrot.lane.b32.xlu0 %v5259_v4, %s4727_s7 }
 0x3c3   : > { %1388 = vrot.lane.b32.xlu1 %v5263_v2, %s4727_s7  ;;  %1398 = vrot.lane.b32.xlu0 %v5259_v4, %s4739_s19 }
 0x3c7   : > { %1400 = vrot.lane.b32.xlu1 %v5263_v2, %s4739_s19  ;;  %1410 = vrot.lane.b32.xlu0 %v5259_v4, %s4726_s22 }
 0x3cb   : > { %1412 = vrot.lane.b32.xlu1 %v5263_v2, %s4726_s22  ;;  %1422 = vrot.lane.b32.xlu0 %v5259_v4, %s4740_s14 }
 0x3cf   : > { %1424 = vrot.lane.b32.xlu1 %v5263_v2, %s4740_s14  ;;  %1434 = vrot.lane.b32.xlu0 %v5259_v4, %s4728_s18 }
 0x3d3   : > { %1436 = vrot.lane.b32.xlu1 %v5263_v2, %s4728_s18  ;;  %1446 = vrot.lane.b32.xlu0 %v5259_v4, %s4741_s15 }
 0x3d7   : > { %1448 = vrot.lane.b32.xlu1 %v5263_v2, %s4741_s15  ;;  %1282 = vrot.lane.b32.xlu0 %v5321_v50, %s4734_s21 }
 0x3db   : > { %1284 = vrot.lane.b32.xlu1 %v5327_v61, %s4734_s21  ;;  %1294 = vrot.lane.b32.xlu0 %v5321_v50, %s4723_s30 }
 0x3df   : > { %1296 = vrot.lane.b32.xlu1 %v5327_v61, %s4723_s30  ;;  %1306 = vrot.lane.b32.xlu0 %v5321_v50, %s4735_s10  ;;  %s6623_s30 = sshll.u32 %s4928_s17, 5 }
 0x3e3   : > { %1308 = vrot.lane.b32.xlu1 %v5327_v61, %s4735_s10  ;;  %1318 = vrot.lane.b32.xlu0 %v5321_v50, %s4725_s20  ;;  %s4114_s10 = scalar_lea.sflag [#allocation5], %s4928_s17 }
 0x3e7   : > { %1320 = vrot.lane.b32.xlu1 %v5327_v61, %s4725_s20  ;;  %1330 = vrot.lane.b32.xlu0 %v5321_v50, %s4736_s9 }
 0x3eb   : > { %1332 = vrot.lane.b32.xlu1 %v5327_v61, %s4736_s9  ;;  %1342 = vrot.lane.b32.xlu0 %v5321_v50, %s4722_s28 }
 0x3ef   : > { %1344 = vrot.lane.b32.xlu1 %v5327_v61, %s4722_s28  ;;  %1354 = vrot.lane.b32.xlu0 %v5321_v50, %s4737_s13  ;;  %s3982_s28 = sld [smem:[#allocation2]] }
 0x3f3   : > { %1356 = vrot.lane.b32.xlu1 %v5327_v61, %s4737_s13  ;;  %1366 = vrot.lane.b32.xlu0 %v5321_v50, %s4724_s16 }
 0x3f7   : > { %1368 = vrot.lane.b32.xlu1 %v5327_v61, %s4724_s16  ;;  %1378 = vrot.lane.b32.xlu0 %v5321_v50, %s4738_s27 }
 0x3fb   : > { %1380 = vrot.lane.b32.xlu1 %v5327_v61, %s4738_s27  ;;  %1390 = vrot.lane.b32.xlu0 %v5321_v50, %s4727_s7 }
 0x3ff   : > { %1392 = vrot.lane.b32.xlu1 %v5327_v61, %s4727_s7  ;;  %1402 = vrot.lane.b32.xlu0 %v5321_v50, %s4739_s19 }
 0x403   : > { %1404 = vrot.lane.b32.xlu1 %v5327_v61, %s4739_s19  ;;  %1414 = vrot.lane.b32.xlu0 %v5321_v50, %s4726_s22 }
 0x407   : > { %1416 = vrot.lane.b32.xlu1 %v5327_v61, %s4726_s22  ;;  %1426 = vrot.lane.b32.xlu0 %v5321_v50, %s4740_s14 }
 0x40b   : > { %1428 = vrot.lane.b32.xlu1 %v5327_v61, %s4740_s14  ;;  %1438 = vrot.lane.b32.xlu0 %v5321_v50, %s4728_s18 }
 0x40d   : > { %v5381_v47 = vpop.permute.xlu0 %1278 }
 0x40f   : > { %1440 = vrot.lane.b32.xlu1 %v5327_v61, %s4728_s18  ;;  %1450 = vrot.lane.b32.xlu0 %v5321_v50, %s4741_s15 }
 0x411   : > { %v5387_v15 = vpop.permute.xlu0 %1290  ;;  %v5399_v31 = vpop.permute.xlu1 %1280 }
 0x412   : > { %v1458_v59 = vcombine.low %v5259_v4, %v5387_v15 }
 0x413   : > { %1452 = vrot.lane.b32.xlu1 %v5327_v61, %s4741_s15 }
 0x414   : > { %v1466_v22 = vrot.slane %v1458_v59, %v5070_v7 }
 0x415   : > { %v5391_v0 = vpop.permute.xlu0 %1302  ;;  %v5413_v46 = vpop.permute.xlu1 %1292 }
 0x416   : > { %v1474_v16 = vcombine.low %v5381_v47, %v5391_v0 }
 0x418   : > { %v1482_v34 = vrot.slane %v1474_v16, %v5070_v7 }
 0x419   : > { %v5393_v54 = vpop.permute.xlu0 %1314  ;;  %v5421_v6 = vpop.permute.xlu1 %1304 }
 0x41a   : > { %v1522_v35 = vcombine.low %v1466_v22, %v1482_v34  ;;  %v1523_v32 = vcombine.high %v1466_v22, %v1482_v34 }
 0x41c   : > { %v1530_v60 = vrot.slane %v1522_v35, %v5073_v8  ;;  %v1537_v35 = vrot.slane %v1523_v32, %v5073_v8 }
 0x41d   : > { %v5395_v56 = vpop.permute.xlu0 %1326  ;;  %v5430_v14 = vpop.permute.xlu1 %1316 }
 0x421   : > { %v5401_v57 = vpop.permute.xlu0 %1338  ;;  %v5434_v55 = vpop.permute.xlu1 %1328 }
 0x422   : > { %v1490_v39 = vcombine.low %v5393_v54, %v5401_v57 }
 0x424   : > { %v1498_v36 = vrot.slane %v1490_v39, %v5070_v7 }
 0x425   : > { %v5408_v12 = vpop.permute.xlu0 %1350  ;;  %v5436_v18 = vpop.permute.xlu1 %1340 }
 0x426   : > { %v1506_v48 = vcombine.low %v5395_v56, %v5408_v12 }
 0x428   : > { %v1514_v62 = vrot.slane %v1506_v48, %v5070_v7 }
 0x429   : > { %v5417_v63 = vpop.permute.xlu0 %1362  ;;  %v5442_v24 = vpop.permute.xlu1 %1352 }
 0x42a   : > { %v1554_v1 = vcombine.low %v1498_v36, %v1514_v62  ;;  %v1555_v26 = vcombine.high %v1498_v36, %v1514_v62 }
 0x42c   : > { %v1562_v40 = vrot.slane %v1554_v1, %v5073_v8  ;;  %v1569_v16 = vrot.slane %v1555_v26, %v5073_v8 }
 0x42d   : > { %v5423_v9 = vpop.permute.xlu0 %1374  ;;  %v5447_v30 = vpop.permute.xlu1 %1364 }
 0x42e   : > { %v1586_v10 = vcombine.low %v1530_v60, %v1562_v40  ;;  %v5426_v11 = vcombine.high %v1530_v60, %v1562_v40  ;;  %v1588_v62 = vcombine.low %v1537_v35, %v1569_v16  ;;  %v1507_v40 = vcombine.high %v5395_v56, %v5408_v12 }
 0x430   : > { %v2739_v45 = vsel %vm2546_vm9, %v1586_v10, 0.0  ;;  %v2745_v41 = vsel %vm2546_vm9, %v5426_v11, 0.0  ;;  %v1521_v56 = vrot.slane %v1507_v40, %v5070_v7 }
 0x431   : > { %2740 = vadd.xlane.f32.xlu0 %v2739_v45  ;;  %v5428_v13 = vpop.permute.xlu0 %1386  ;;  %v5457_v1 = vpop.permute.xlu1 %1376 }
 0x432   : > { %v1594_v20 = vcombine.low %v5417_v63, %v5428_v13 }
 0x434   : > { %v1602_v38 = vrot.slane %v1594_v20, %v5070_v7  ;;  %v1491_v20 = vcombine.high %v5393_v54, %v5401_v57  ;;  %v2547_v57 = vsel %vm2546_vm9, %v1586_v10, -inf }
 0x435   : > { %2746 = vadd.xlane.f32.xlu0 %v2745_v41  ;;  %v1399_v21 = vpop.permute.xlu0 %1398  ;;  %v5471_v12 = vpop.permute.xlu1 %1388 }
 0x436   : > { %v1610_v44 = vcombine.low %v5423_v9, %v1399_v21 }
 0x438   : > { %v1618_v23 = vrot.slane %v1610_v44, %v5070_v7  ;;  %v2751_v44 = vsel %vm2546_vm9, %v1588_v62, 0.0 }
 0x439   : > { %v1411_v17 = vpop.permute.xlu0 %1410 }
 0x43a   : > { %v1658_v25 = vcombine.low %v1602_v38, %v1618_v23  ;;  %v1659_v33 = vcombine.high %v1602_v38, %v1618_v23  ;;  %v1475_v23 = vcombine.high %v5381_v47, %v5391_v0  ;;  %v1505_v47 = vrot.slane %v1491_v20, %v5070_v7 }
 0x43c   : > { %v1666_v53 = vrot.slane %v1658_v25, %v5073_v8  ;;  %v1673_v36 = vrot.slane %v1659_v33, %v5073_v8  ;;  %v1489_v0 = vrot.slane %v1475_v23, %v5070_v7 }
 0x43d   : > { %v1423_v52 = vpop.permute.xlu0 %1422 }
 0x441   : > { %v1435_v42 = vpop.permute.xlu0 %1434 }
 0x442   : > { %v1626_v37 = vcombine.low %v1411_v17, %v1435_v42  ;;  %v1627_v38 = vcombine.high %v1411_v17, %v1435_v42  ;;  %v1570_v17 = vcombine.low %v1505_v47, %v1521_v56 }
 0x444   : > { %v1634_v49 = vrot.slane %v1626_v37, %v5070_v7  ;;  %v1611_v37 = vcombine.high %v5423_v9, %v1399_v21  ;;  %v1641_v9 = vrot.slane %v1627_v38, %v5070_v7  ;;  %v1578_v33 = vrot.slane %v1570_v17, %v5073_v8 }
 0x445   : > { %v1447_v27 = vpop.permute.xlu0 %1446 }
 0x446   : > { %v1642_v28 = vcombine.low %v1423_v52, %v1447_v27  ;;  %v1643_v45 = vcombine.high %v1423_v52, %v1447_v27  ;;  %v1595_v52 = vcombine.high %v5417_v63, %v5428_v13  ;;  %v2553_v63 = vsel %vm2546_vm9, %v5426_v11, -inf }
 0x447   : > { %v1589_v13 = vcombine.high %v1537_v35, %v1569_v16 }
 0x448   : > { %v1650_v29 = vrot.slane %v1642_v28, %v5070_v7  ;;  %v1459_v28 = vcombine.high %v5259_v4, %v5387_v15  ;;  %v1657_v54 = vrot.slane %v1643_v45, %v5070_v7  ;;  %v1625_v15 = vrot.slane %v1611_v37, %v5070_v7 }
 0x449   : > { %v1609_v10 = vrot.slane %v1595_v52, %v5070_v7 }
 0x44a   : > { %v1690_v3 = vcombine.low %v1634_v49, %v1650_v29  ;;  %v1691_v5 = vcombine.high %v1634_v49, %v1650_v29  ;;  %v1473_v21 = vrot.slane %v1459_v28, %v5070_v7  ;;  %v1706_v42 = vcombine.low %v1641_v9, %v1657_v54  ;;  %v5487_v49 = vpop.permute.xlu1 %1400 }
 0x44b   : > { %v1674_v32 = vcombine.low %v1609_v10, %v1625_v15  ;;  %v1675_v28 = vcombine.high %v1609_v10, %v1625_v15  ;;  %v1778_v10 = vcombine.low %v5434_v55, %v5442_v24 }
 0x44c   : > { %v1698_v43 = vrot.slane %v1690_v3, %v5073_v8  ;;  %v1705_v59 = vrot.slane %v1691_v5, %v5073_v8  ;;  %v1538_v29 = vcombine.low %v1473_v21, %v1489_v0  ;;  %v2757_v3 = vsel %vm2546_vm9, %v1589_v13, 0.0 }
 0x44d   : > { %v1714_v11 = vrot.slane %v1706_v42, %v5073_v8  ;;  %v1682_v16 = vrot.slane %v1674_v32, %v5073_v8  ;;  %v1539_v38 = vcombine.high %v1473_v21, %v1489_v0 }
 0x44e   : > { %v1723_v39 = vcombine.high %v1666_v53, %v1698_v43  ;;  %v1722_v48 = vcombine.low %v1666_v53, %v1698_v43  ;;  %v1724_v60 = vcombine.low %v1673_v36, %v1705_v59  ;;  %v1725_v25 = vcombine.high %v1673_v36, %v1705_v59  ;;  %v5493_v53 = vpop.permute.xlu0 %1282  ;;  %v5497_v59 = vpop.permute.xlu1 %1412 }
 0x44f   : > { %v1546_v43 = vrot.slane %v1538_v29, %v5073_v8  ;;  %v1726_v36 = vcombine.low %v1682_v16, %v1714_v11  ;;  %v1727_v23 = vcombine.high %v1682_v16, %v1714_v11  ;;  %v1762_v29 = vcombine.low %v5430_v14, %v5436_v18 }
 0x450   : > { %v2748_v34 = vsel %vm2546_vm9, %v1723_v39, 0.0  ;;  %v2742_v22 = vsel %vm2546_vm9, %v1722_v48, 0.0  ;;  %v2754_v41 = vsel %vm2546_vm9, %v1724_v60, 0.0  ;;  %v2550_v27 = vsel %vm2546_vm9, %v1722_v48, -inf }
 0x451   : > { %2749 = vadd.xlane.f32.xlu0 %v2748_v34  ;;  %2743 = vadd.xlane.f32.xlu1 %v2742_v22  ;;  %v2556_v26 = vsel %vm2546_vm9, %v1723_v39, -inf  ;;  %v2760_v5 = vsel %vm2546_vm9, %v1725_v25, 0.0  ;;  %v2559_v39 = vsel %vm2546_vm9, %v1588_v62, -inf  ;;  %v2562_v48 = vsel %vm2546_vm9, %v1724_v60, -inf }
 0x452   : > { %v1590_v35 = vcombine.low %v1546_v43, %v1578_v33  ;;  %v5501_v34 = vpop.permute.xlu0 %1294  ;;  %v2766_v40 = vsel %vm2546_vm9, %v1726_v36, 0.0  ;;  %v5505_v45 = vpop.permute.xlu1 %1424  ;;  %v1707_v62 = vcombine.high %v1641_v9, %v1657_v54  ;;  %v2568_v60 = vsel %vm2546_vm9, %v1725_v25, -inf }
 0x453   : > { %v1591_v20 = vcombine.high %v1546_v43, %v1578_v33  ;;  %v1689_v9 = vrot.slane %v1675_v28, %v5073_v8  ;;  %v2574_v15 = vsel %vm2546_vm9, %v1726_v36, -inf  ;;  %v1730_v11 = vcombine.low %v5263_v2, %v5413_v46 }
 0x454   : > { %v2763_v22 = vsel %vm2546_vm9, %v1590_v35, 0.0  ;;  %v1721_v54 = vrot.slane %v1707_v62, %v5073_v8  ;;  %v2571_v0 = vsel %vm2546_vm9, %v1590_v35, -inf  ;;  %v1786_v43 = vrot.slane %v1778_v10, %v5070_v7 }
 0x455   : > { %2755 = vadd.xlane.f32.xlu0 %v2754_v41  ;;  %2752 = vadd.xlane.f32.xlu1 %v2751_v44  ;;  %v1571_v41 = vcombine.high %v1505_v47, %v1521_v56  ;;  %v2565_v44 = vsel %vm2546_vm9, %v1589_v13, -inf  ;;  %v1553_v47 = vrot.slane %v1539_v38, %v5073_v8  ;;  %v2577_v16 = vsel %vm2546_vm9, %v1591_v20, -inf }
 0x456   : > { %v5509_v37 = vpop.permute.xlu0 %1306  ;;  %v5511_v52 = vpop.permute.xlu1 %1436  ;;  %v2580_v36 = vsel %vm2546_vm9, %v1727_v23, -inf }
 0x457   : > { %v1585_v56 = vrot.slane %v1571_v41, %v5073_v8  ;;  %v1898_v33 = vcombine.low %v5497_v59, %v5511_v52 }
 0x459   : > { %2548 = vmax.xlane.f32.xlu1 %v2547_v57  ;;  %2551 = vmax.xlane.f32.xlu0 %v2550_v27  ;;  %v2769_v57 = vsel %vm2546_vm9, %v1591_v20, 0.0  ;;  %v2772_v27 = vsel %vm2546_vm9, %v1727_v23, 0.0  ;;  %v1592_v21 = vcombine.low %v1553_v47, %v1585_v56  ;;  %v1906_v62 = vrot.slane %v1898_v33, %v5070_v7 }
 0x45a   : > { %v5519_v17 = vpop.permute.xlu0 %1318  ;;  %v5523_v13 = vpop.permute.xlu1 %1448 }
 0x45b   : > { %v1914_v42 = vcombine.low %v5505_v45, %v5523_v13 }
 0x45d   : > { %2554 = vmax.xlane.f32.xlu1 %v2553_v63  ;;  %2557 = vmax.xlane.f32.xlu0 %v2556_v26  ;;  %v1728_v63 = vcombine.low %v1689_v9, %v1721_v54  ;;  %v2775_v26 = vsel %vm2546_vm9, %v1592_v21, 0.0  ;;  %v1922_v35 = vrot.slane %v1914_v42, %v5070_v7 }
 0x45e   : > { %v5533_v32 = vpop.permute.xlu0 %1330 }
 0x45f   : > { %v2778_v25 = vsel %vm2546_vm9, %v1728_v63, 0.0 }
 0x461   : > { %2758 = vadd.xlane.f32.xlu1 %v2757_v3  ;;  %2761 = vadd.xlane.f32.xlu0 %v2760_v5  ;;  %v1746_v3 = vcombine.low %v5399_v31, %v5421_v6  ;;  %v1882_v5 = vcombine.low %v5457_v1, %v5487_v49 }
 0x462   : > { %v5554_v38 = vpop.permute.xlu0 %1342 }
 0x463   : > { %v1754_v41 = vrot.slane %v1746_v3, %v5070_v7 }
 0x465   : > { %2560 = vmax.xlane.f32.xlu1 %v2559_v39  ;;  %2563 = vmax.xlane.f32.xlu0 %v2562_v48  ;;  %v1593_v39 = vcombine.high %v1553_v47, %v1585_v56  ;;  %v1866_v48 = vcombine.low %v5447_v30, %v5471_v12  ;;  %v5559_v47 = vpop.permute.xlu1 %1284 }
 0x466   : > { %v5565_v42 = vpop.permute.xlu0 %1354 }
 0x467   : > { %v1874_v28 = vrot.slane %v1866_v48, %v5070_v7  ;;  %v2781_v23 = vsel %vm2546_vm9, %v1593_v39, 0.0  ;;  %v2589_v3 = vsel %vm2546_vm9, %v1593_v39, -inf }
 0x469   : > { %2764 = vadd.xlane.f32.xlu1 %v2763_v22  ;;  %2767 = vadd.xlane.f32.xlu0 %v2766_v40  ;;  %v1729_v22 = vcombine.high %v1689_v9, %v1721_v54  ;;  %v1770_v40 = vrot.slane %v1762_v29, %v5070_v7  ;;  %v2583_v9 = vsel %vm2546_vm9, %v1592_v21, -inf  ;;  %v5570_v33 = vpop.permute.xlu1 %1296 }
 0x46b   : > { %v1826_v20 = vcombine.low %v1770_v40, %v1786_v43  ;;  %v1827_v29 = vcombine.high %v1770_v40, %v1786_v43  ;;  %v2592_v21 = vsel %vm2546_vm9, %v1729_v22, -inf }
 0x46d   : > { %2566 = vmax.xlane.f32.xlu1 %v2565_v44  ;;  %2569 = vmax.xlane.f32.xlu0 %v2568_v60  ;;  %v1890_v44 = vrot.slane %v1882_v5, %v5070_v7  ;;  %v1738_v60 = vrot.slane %v1730_v11, %v5070_v7  ;;  %v1963_v5 = vcombine.high %v1906_v62, %v1922_v35 }
 0x46f   : > { %v1794_v56 = vcombine.low %v1738_v60, %v1754_v41  ;;  %v1930_v54 = vcombine.low %v1874_v28, %v1890_v44  ;;  %v1931_v48 = vcombine.high %v1874_v28, %v1890_v44  ;;  %v1977_v40 = vrot.slane %v1963_v5, %v5073_v8 }
 0x471   : > { %2770 = vadd.xlane.f32.xlu1 %v2769_v57  ;;  %2773 = vadd.xlane.f32.xlu0 %v2772_v27  ;;  %v1962_v57 = vcombine.low %v1906_v62, %v1922_v35  ;;  %v2784_v27 = vsel %vm2546_vm9, %v1729_v22, 0.0  ;;  %v5579_v22 = vpop.permute.xlu1 %1308 }
 0x473   : > { %v1970_v10 = vrot.slane %v1962_v57, %v5073_v8  ;;  %v1841_v57 = vrot.slane %v1827_v29, %v5073_v8 }
 0x475   : > { %2572 = vmax.xlane.f32.xlu1 %v2571_v0  ;;  %2575 = vmax.xlane.f32.xlu0 %v2574_v15  ;;  %v2586_v0 = vsel %vm2546_vm9, %v1728_v63, -inf  ;;  %v1834_v15 = vrot.slane %v1826_v20, %v5073_v8 }
 0x479   : > { %2776 = vadd.xlane.f32.xlu1 %v2775_v26  ;;  %2779 = vadd.xlane.f32.xlu0 %v2778_v25  ;;  %v1802_v26 = vrot.slane %v1794_v56, %v5073_v8  ;;  %v1938_v25 = vrot.slane %v1930_v54, %v5073_v8  ;;  %v1779_v56 = vcombine.high %v5434_v55, %v5442_v24 }
 0x47a   : > { %v1915_v54 = vcombine.high %v5505_v45, %v5523_v13  ;;  %v1883_v55 = vcombine.high %v5457_v1, %v5487_v49  ;;  %v1899_v24 = vcombine.high %v5497_v59, %v5511_v52  ;;  %v1731_v45 = vcombine.high %v5263_v2, %v5413_v46 }
 0x47b   : > { %v1858_v63 = vcombine.low %v1802_v26, %v1834_v15  ;;  %v1994_v11 = vcombine.low %v1938_v25, %v1970_v10  ;;  %v1859_v20 = vcombine.high %v1802_v26, %v1834_v15  ;;  %v1995_v35 = vcombine.high %v1938_v25, %v1970_v10 }
 0x47c   : > { %v1763_v10 = vcombine.high %v5430_v14, %v5436_v18  ;;  %v1747_v26 = vcombine.high %v5399_v31, %v5421_v6  ;;  %v5606_v13 = vrot.slane %v1779_v56, %v5070_v7  ;;  %v1867_v14 = vcombine.high %v5447_v30, %v5471_v12 }
 0x47d   : > { %2578 = vmax.xlane.f32.xlu1 %v2577_v16  ;;  %2581 = vmax.xlane.f32.xlu0 %v2580_v36  ;;  %v1795_v16 = vcombine.high %v1738_v60, %v1754_v41  ;;  %v5573_v36 = vpop.permute.xlu0 %1366  ;;  %v2787_v43 = vsel %vm2546_vm9, %v1858_v63, 0.0  ;;  %v2790_v39 = vsel %vm2546_vm9, %v1994_v11, 0.0  ;;  %v1945_v41 = vrot.slane %v1931_v48, %v5073_v8 }
 0x47e   : > { %v2793_v44 = vsel %vm2546_vm9, %v1859_v20, 0.0  ;;  %v2796_v60 = vsel %vm2546_vm9, %v1995_v35, 0.0  ;;  %v1929_v25 = vrot.slane %v1915_v54, %v5070_v7  ;;  %v2595_v31 = vsel %vm2546_vm9, %v1858_v63, -inf }
 0x47f   : > { %v1809_v62 = vrot.slane %v1795_v16, %v5073_v8  ;;  %v2598_v6 = vsel %vm2546_vm9, %v1994_v11, -inf  ;;  %v1777_v1 = vrot.slane %v1763_v10, %v5070_v7  ;;  %v1761_v46 = vrot.slane %v1747_v26, %v5070_v7 }
 0x480   : > { %v1897_v49 = vrot.slane %v1883_v55, %v5070_v7  ;;  %v1913_v59 = vrot.slane %v1899_v24, %v5070_v7  ;;  %v1745_v30 = vrot.slane %v1731_v45, %v5070_v7  ;;  %v1881_v29 = vrot.slane %v1867_v14, %v5070_v7 }
 0x481   : > { %2782 = vadd.xlane.f32.xlu1 %v2781_v23  ;;  %2785 = vadd.xlane.f32.xlu0 %v2784_v27  ;;  %v1860_v28 = vcombine.low %v1809_v62, %v1841_v57  ;;  %v1996_v23 = vcombine.low %v1945_v41, %v1977_v40  ;;  %v5585_v27 = vpop.permute.xlu0 %1378  ;;  %v1842_v12 = vcombine.low %v1777_v1, %v5606_v13  ;;  %v2604_v63 = vsel %vm2546_vm9, %v1995_v35, -inf }
 0x482   : > { %v1978_v5 = vcombine.low %v1913_v59, %v1929_v25  ;;  %v1997_v11 = vcombine.high %v1945_v41, %v1977_v40  ;;  %v1810_v48 = vcombine.low %v1745_v30, %v1761_v46  ;;  %v1843_v24 = vcombine.high %v1777_v1, %v5606_v13 }
 0x483   : > { %v2802_v15 = vsel %vm2546_vm9, %v1996_v23, 0.0  ;;  %v2607_v41 = vsel %vm2546_vm9, %v1860_v28, -inf  ;;  %v2610_v56 = vsel %vm2546_vm9, %v1996_v23, -inf  ;;  %v1979_v45 = vcombine.high %v1913_v59, %v1929_v25 }
 0x484   : > { %v2616_v14 = vsel %vm2546_vm9, %v1997_v11, -inf  ;;  %v1857_v13 = vrot.slane %v1843_v24, %v5073_v8 }
 0x485   : > { %2584 = vmax.xlane.f32.xlu1 %v2583_v9  ;;  %2587 = vmax.xlane.f32.xlu0 %v2586_v0  ;;  %v5591_v9 = vpop.permute.xlu1 %1320  ;;  %v2799_v0 = vsel %vm2546_vm9, %v1860_v28, 0.0  ;;  %v5610_v18 = vpop.permute.xlu0 %1390  ;;  %v1993_v25 = vrot.slane %v1979_v45, %v5073_v8 }
 0x489   : > { %2590 = vmax.xlane.f32.xlu1 %v2589_v3  ;;  %2593 = vmax.xlane.f32.xlu0 %v2592_v21  ;;  %v5619_v52 = vpop.permute.xlu1 %1332  ;;  %v1861_v3 = vcombine.high %v1809_v62, %v1841_v57  ;;  %v2601_v21 = vsel %vm2546_vm9, %v1859_v20, -inf  ;;  %v5626_v16 = vpop.permute.xlu0 %1402  ;;  %v1850_v57 = vrot.slane %v1842_v12, %v5073_v8  ;;  %v1986_v62 = vrot.slane %v1978_v5, %v5073_v8 }
 0x48a   : > { %v1818_v20 = vrot.slane %v1810_v48, %v5073_v8  ;;  %v1811_v12 = vcombine.high %v1745_v30, %v1761_v46  ;;  %v1947_v5 = vcombine.high %v1881_v29, %v1897_v49 }
 0x48b   : > { %v2613_v28 = vsel %vm2546_vm9, %v1861_v3, -inf }
 0x48c   : > { %v1862_v54 = vcombine.low %v1818_v20, %v1850_v57  ;;  %v1825_v59 = vrot.slane %v1811_v12, %v5073_v8 }
 0x48d   : > { %2788 = vadd.xlane.f32.xlu1 %v2787_v43  ;;  %2791 = vadd.xlane.f32.xlu0 %v2790_v39  ;;  %v1946_v43 = vcombine.low %v1881_v29, %v1897_v49  ;;  %v5628_v39 = vpop.permute.xlu1 %1344  ;;  %v5636_v40 = vpop.permute.xlu0 %1414 }
 0x48e   : > { %v2811_v10 = vsel %vm2546_vm9, %v1862_v54, 0.0  ;;  %v2619_v46 = vsel %vm2546_vm9, %v1862_v54, -inf  ;;  %v1864_v30 = vcombine.low %v1825_v59, %v1857_v13  ;;  %v2002_v54 = vcombine.low %v5321_v50, %v5501_v34 }
 0x48f   : > { %v1954_v35 = vrot.slane %v1946_v43, %v5073_v8  ;;  %v2050_v43 = vcombine.low %v5533_v32, %v5565_v42 }
 0x491   : > { %2794 = vadd.xlane.f32.xlu1 %v2793_v44  ;;  %2797 = vadd.xlane.f32.xlu0 %v2796_v60  ;;  %v2805_v44 = vsel %vm2546_vm9, %v1861_v3, 0.0  ;;  %v2808_v60 = vsel %vm2546_vm9, %v1997_v11, 0.0  ;;  %v5644_v55 = vpop.permute.xlu0 %1426  ;;  %v1961_v3 = vrot.slane %v1947_v5, %v5073_v8  ;;  %v2058_v24 = vrot.slane %v2050_v43, %v5070_v7 }
 0x493   : > { %v2000_v29 = vcombine.low %v1961_v3, %v1993_v25 }
 0x495   : > { %2800 = vadd.xlane.f32.xlu1 %v2799_v0  ;;  %2803 = vadd.xlane.f32.xlu0 %v2802_v15  ;;  %v1998_v0 = vcombine.low %v1954_v35, %v1986_v62  ;;  %v5640_v15 = vpop.permute.xlu1 %1356 }
 0x497   : > { %v2814_v26 = vsel %vm2546_vm9, %v1998_v0, 0.0  ;;  %v2622_v49 = vsel %vm2546_vm9, %v1998_v0, -inf }
 0x499   : > { %2596 = vmax.xlane.f32.xlu1 %v2595_v31  ;;  %2599 = vmax.xlane.f32.xlu0 %v2598_v6  ;;  %v5648_v23 = vpop.permute.xlu1 %1368  ;;  %v1863_v31 = vcombine.high %v1818_v20, %v1850_v57  ;;  %v1999_v6 = vcombine.high %v1954_v35, %v1986_v62  ;;  %v2823_v57 = vsel %vm2546_vm9, %v1864_v30, 0.0  ;;  %v2826_v62 = vsel %vm2546_vm9, %v2000_v29, 0.0 }
 0x49a   : > { %v2018_v20 = vcombine.low %v5493_v53, %v5509_v37  ;;  %v2034_v35 = vcombine.low %v5519_v17, %v5554_v38 }
 0x49b   : > { %v2820_v48 = vsel %vm2546_vm9, %v1999_v6, 0.0  ;;  %v2625_v0 = vsel %vm2546_vm9, %v1863_v31, -inf }
 0x49c   : > { %v2026_v12 = vrot.slane %v2018_v20, %v5070_v7  ;;  %v2042_v5 = vrot.slane %v2034_v35, %v5070_v7 }
 0x49d   : > { %2602 = vmax.xlane.f32.xlu1 %v2601_v21  ;;  %2605 = vmax.xlane.f32.xlu0 %v2604_v63  ;;  %v5651_v21 = vpop.permute.xlu0 %1438  ;;  %v2817_v63 = vsel %vm2546_vm9, %v1863_v31, 0.0  ;;  %v5657_v1 = vpop.permute.xlu1 %1380 }
 0x4a1   : > { %2806 = vadd.xlane.f32.xlu1 %v2805_v44  ;;  %2809 = vadd.xlane.f32.xlu0 %v2808_v60  ;;  %v5663_v11 = vpop.permute.xlu0 %1450  ;;  %v5667_v44 = vpop.permute.xlu1 %1392 }
 0x4a2   : > { %v2186_v60 = vcombine.low %v5644_v55, %v5663_v11 }
 0x4a4   : > { %v2194_v45 = vrot.slane %v2186_v60, %v5070_v7 }
 0x4a5   : > { %2608 = vmax.xlane.f32.xlu1 %v2607_v41  ;;  %2611 = vmax.xlane.f32.xlu0 %v2610_v56  ;;  %v2154_v41 = vcombine.low %v5585_v27, %v5626_v16  ;;  %v2170_v56 = vcombine.low %v5636_v40, %v5651_v21  ;;  %v5692_v31 = vpop.permute.xlu1 %1404 }
 0x4a9   : > { %2812 = vadd.xlane.f32.xlu1 %v2811_v10  ;;  %2815 = vadd.xlane.f32.xlu0 %v2814_v26  ;;  %v1865_v10 = vcombine.high %v1825_v59, %v1857_v13  ;;  %v2001_v26 = vcombine.high %v1961_v3, %v1993_v25  ;;  %v2010_v13 = vrot.slane %v2002_v54, %v5070_v7  ;;  %v5699_v60 = vpop.permute.xlu1 %1416 }
 0x4aa   : > { %v2098_v59 = vcombine.low %v2042_v5, %v2058_v24  ;;  %v2099_v54 = vcombine.high %v2042_v5, %v2058_v24 }
 0x4ab   : > { %v2829_v25 = vsel %vm2546_vm9, %v1865_v10, 0.0 }
 0x4ac   : > { %v2106_v20 = vrot.slane %v2098_v59, %v5073_v8 }
 0x4ad   : > { %2614 = vmax.xlane.f32.xlu1 %v2613_v28  ;;  %2617 = vmax.xlane.f32.xlu0 %v2616_v14  ;;  %v2138_v28 = vcombine.low %v5573_v36, %v5610_v18  ;;  %v2628_v14 = vsel %vm2546_vm9, %v1999_v6, -inf }
 0x4af   : > { %v2146_v3 = vrot.slane %v2138_v28, %v5070_v7 }
 0x4b1   : > { %2818 = vadd.xlane.f32.xlu1 %v2817_v63  ;;  %2821 = vadd.xlane.f32.xlu0 %v2820_v48  ;;  %v2162_v63 = vrot.slane %v2154_v41, %v5070_v7  ;;  %v2178_v48 = vrot.slane %v2170_v56, %v5070_v7 }
 0x4b3   : > { %v2234_v6 = vcombine.low %v2178_v48, %v2194_v45  ;;  %v2202_v43 = vcombine.low %v2146_v3, %v2162_v63  ;;  %v2235_v28 = vcombine.high %v2178_v48, %v2194_v45  ;;  %v2203_v59 = vcombine.high %v2146_v3, %v2162_v63 }
 0x4b4   : > { %v5720_v63 = vand.u32 127, %v499_v51 }
 0x4b5   : > { %2620 = vmax.xlane.f32.xlu1 %v2619_v46  ;;  %2623 = vmax.xlane.f32.xlu0 %v2622_v49  ;;  %v2832_v46 = vsel %vm2546_vm9, %v2001_v26, 0.0  ;;  %v2066_v49 = vcombine.low %v2010_v13, %v2026_v12  ;;  %v2242_v35 = vrot.slane %v2234_v6, %v5073_v8  ;;  %v2210_v56 = vrot.slane %v2202_v43, %v5073_v8 }
 0x4b6   : > { %v2217_v45 = vrot.slane %v2203_v59, %v5073_v8 }
 0x4b7   : > { %v2074_v41 = vrot.slane %v2066_v49, %v5073_v8  ;;  %v2267_v5 = vcombine.high %v2210_v56, %v2242_v35 }
 0x4b9   : > { %2824 = vadd.xlane.f32.xlu1 %v2823_v57  ;;  %2827 = vadd.xlane.f32.xlu0 %v2826_v62  ;;  %v2631_v57 = vsel %vm2546_vm9, %v1864_v30, -inf  ;;  %v2634_v62 = vsel %vm2546_vm9, %v2000_v29, -inf  ;;  %v2266_v30 = vcombine.low %v2210_v56, %v2242_v35  ;;  %v2067_v29 = vcombine.high %v2010_v13, %v2026_v12 }
 0x4ba   : > { %v2131_v6 = vcombine.high %v2074_v41, %v2106_v20  ;;  %v2019_v12 = vcombine.high %v5493_v53, %v5509_v37  ;;  %v2741_v13 = vpop.xlane.xlu0 %2740  ;;  %v2844_v43 = vsel %vm2546_vm9, %v2267_v5, 0.0  ;;  %v2003_v35 = vcombine.high %v5321_v50, %v5501_v34 }
 0x4bb   : > { %v2838_v24 = vsel %vm2546_vm9, %v2266_v30, 0.0  ;;  %v2051_v53 = vcombine.high %v5533_v32, %v5565_v42  ;;  %v2035_v37 = vcombine.high %v5519_v17, %v5554_v38  ;;  %v2187_v56 = vcombine.high %v5644_v55, %v5663_v11 }
 0x4bc   : > { %v2841_v3 = vsel %vm2546_vm9, %v2131_v6, 0.0  ;;  %v5735_v51 = vrot.slane %v2019_v12, %v5070_v7  ;;  %v5747_v32 = vrot.slane %v2003_v35, %v5070_v7  ;;  %v3458_v17 = vadd.s32 4294967272, %v5720_v63 }
 0x4bd   : > { %2626 = vmax.xlane.f32.xlu1 %v2625_v0  ;;  %2629 = vmax.xlane.f32.xlu0 %v2628_v14  ;;  %v2637_v0 = vsel %vm2546_vm9, %v1865_v10, -inf  ;;  %v2640_v14 = vsel %vm2546_vm9, %v2001_v26, -inf  ;;  %v2249_v10 = vrot.slane %v2235_v28, %v5073_v8  ;;  %v2081_v26 = vrot.slane %v2067_v29, %v5073_v8 }
 0x4be   : > { %v5750_v42 = vrot.slane %v2051_v53, %v5070_v7  ;;  %v2155_v38 = vcombine.high %v5585_v27, %v5626_v16  ;;  %v2171_v55 = vcombine.high %v5636_v40, %v5651_v21  ;;  %v2082_v28 = vcombine.low %v5747_v32, %v5735_v51 }
 0x4bf   : > { %v2139_v29 = vcombine.high %v5573_v36, %v5610_v18  ;;  %v5770_v27 = vrot.slane %v2187_v56, %v5070_v7  ;;  %v2931_v16 = vmul.f32 0.125, %v2741_v13  ;;  %v2646_v21 = vsel %vm2546_vm9, %v2266_v30, -inf }
 0x4c0   : > { %v5777_v12 = vsub.s32 %v3458_v17, %v5067_v58  ;;  %v5780_v36 = vrot.slane %v2155_v38, %v5070_v7  ;;  %v5783_v18 = vrot.slane %v2171_v55, %v5070_v7  ;;  %v3065_v30 = vadd.s32 4294967288, %v5720_v63 }
 0x4c1   : > { %2830 = vadd.xlane.f32.xlu1 %v2829_v25  ;;  %2833 = vadd.xlane.f32.xlu0 %v2832_v46  ;;  %v2130_v25 = vcombine.low %v2074_v41, %v2106_v20  ;;  %v5709_v46 = vpop.permute.xlu1 %1428  ;;  %v5728_v20 = vcombine.low %v2217_v45, %v2249_v10  ;;  %v3453_v41 = vadd.s32 4294967280, %v5720_v63 }
 0x4c3   : > { %v2835_v49 = vsel %vm2546_vm9, %v2130_v25, 0.0  ;;  %v2850_v34 = vsel %vm2546_vm9, %v5728_v20, 0.0  ;;  %v5767_v59 = vsub.s32 %v3453_v41, %v5067_v58  ;;  %v2643_v40 = vsel %vm2546_vm9, %v2130_v25, -inf }
 0x4c4   : > { %v2250_v41 = vcombine.low %v5783_v18, %v5770_v27 }
 0x4c5   : > { %2632 = vmax.xlane.f32.xlu1 %v2631_v57  ;;  %2635 = vmax.xlane.f32.xlu0 %v2634_v62  ;;  %v2113_v57 = vrot.slane %v2099_v54, %v5073_v8  ;;  %v5722_v48 = vpop.permute.xlu1 %1440  ;;  %v3457_v56 = vrot.slane %v2931_v16, %v5767_v59 }
 0x4c7   : > { %v5726_v62 = vcombine.low %v2081_v26, %v2113_v57 }
 0x4c9   : > { %2638 = vmax.xlane.f32.xlu1 %v2637_v0  ;;  %2641 = vmax.xlane.f32.xlu0 %v2640_v14  ;;  %v2847_v54 = vsel %vm2546_vm9, %v5726_v62, 0.0  ;;  %v5757_v11 = vpop.permute.xlu1 %1452  ;;  %v2747_v0 = vpop.xlane.xlu0 %2746  ;;  %v5762_v14 = vrot.slane %v2035_v37, %v5070_v7  ;;  %v2649_v37 = vsel %vm2546_vm9, %v2131_v6, -inf }
 0x4cd   : > { %2836 = vadd.xlane.f32.xlu1 %v2835_v49  ;;  %2839 = vadd.xlane.f32.xlu0 %v2838_v24  ;;  %v2114_v49 = vcombine.low %v5762_v14, %v5750_v42  ;;  %v2933_v24 = vmul.f32 0.125, %v2747_v0 }
 0x4d1   : > { %2842 = vadd.xlane.f32.xlu1 %v2841_v3  ;;  %2845 = vadd.xlane.f32.xlu0 %v2844_v43  ;;  %v5785_v3 = vcombine.high %v2081_v26, %v2113_v57  ;;  %v5789_v43 = vrot.slane %v2139_v29, %v5070_v7  ;;  %v3468_v57 = vrot.slane %v2933_v24, %v5767_v59 }
 0x4d3   : > { %v2218_v38 = vcombine.low %v5789_v43, %v5780_v36  ;;  %v2853_v0 = vsel %vm2546_vm9, %v5785_v3, 0.0 }
 0x4d5   : > { %2848 = vadd.xlane.f32.xlu1 %v2847_v54  ;;  %2851 = vadd.xlane.f32.xlu0 %v2850_v34  ;;  %v2652_v54 = vsel %vm2546_vm9, %v2267_v5, -inf  ;;  %v2269_v34 = vcombine.high %v2217_v45, %v2249_v10  ;;  %v5805_v5 = vsub.s32 %v5720_v63, %v5067_v58  ;;  %v5808_v10 = vsub.s32 %v3065_v30, %v5067_v58 }
 0x4d7   : > { %v2856_v24 = vsel %vm2546_vm9, %v2269_v34, 0.0 }
 0x4d9   : > { %2644 = vmax.xlane.f32.xlu1 %v2643_v40  ;;  %2647 = vmax.xlane.f32.xlu0 %v2646_v21 }
 0x4da   : > { %v2744_v13 = vpop.xlane.xlu1 %2743  ;;  %v2750_v25 = vpop.xlane.xlu0 %2749 }
 0x4db   : > { %v2932_v35 = vmul.f32 0.125, %v2744_v13  ;;  %v2934_v53 = vmul.f32 0.125, %v2750_v25  ;;  %v2122_v13 = vrot.slane %v2114_v49, %v5073_v8  ;;  %v2258_v25 = vrot.slane %v2250_v41, %v5073_v8 }
 0x4dd   : > { %v3462_v26 = vrot.slane %v2932_v35, %v5777_v12  ;;  %v3472_v17 = vrot.slane %v2934_v53, %v5777_v12  ;;  %2650 = vmax.xlane.f32.xlu1 %v2649_v37  ;;  %2653 = vmax.xlane.f32.xlu0 %v2652_v54  ;;  %v2090_v53 = vrot.slane %v2082_v28, %v5073_v8  ;;  %v2655_v54 = vsel %vm2546_vm9, %v5726_v62, -inf }
 0x4de   : > { %v2753_v6 = vpop.xlane.xlu1 %2752  ;;  %v2756_v55 = vpop.xlane.xlu0 %2755  ;;  %v2226_v37 = vrot.slane %v2218_v38, %v5073_v8 }
 0x4df   : > { %v3464_v45 = vsel %vm3463_vm10, %v3462_v26, %v3457_v56  ;;  %v3473_v29 = vsel %vm3463_vm10, %v3472_v17, %v3468_v57  ;;  %v2935_v16 = vmul.f32 0.125, %v2753_v6  ;;  %v2936_v40 = vmul.f32 0.125, %v2756_v55 }
 0x4e0   : > { %v3744_v21 = vsel %vm447_vm0, %v3473_v29, %v3464_v45  ;;  %v2658_v26 = vsel %vm2546_vm9, %v5728_v20, -inf  ;;  %v2134_v17 = vcombine.low %v2090_v53, %v2122_v13  ;;  %v2270_v6 = vcombine.low %v2226_v37, %v2258_v25 }
 0x4e1   : > { %v3477_v63 = vrot.slane %v2935_v16, %v5767_v59  ;;  %v3481_v58 = vrot.slane %v2936_v40, %v5777_v12  ;;  %2854 = vadd.xlane.f32.xlu1 %v2853_v0  ;;  %2857 = vadd.xlane.f32.xlu0 %v2856_v24  ;;  %v2115_v24 = vcombine.high %v5762_v14, %v5750_v42 }
 0x4e2   : > { %v2549_v30 = vpop.xlane.xlu1 %2548  ;;  %v2552_v35 = vpop.xlane.xlu0 %2551  ;;  %v2859_v29 = vsel %vm2546_vm9, %v2134_v17, 0.0  ;;  %v2862_v62 = vsel %vm2546_vm9, %v2270_v6, 0.0  ;;  %v2083_v42 = vcombine.high %v5747_v32, %v5735_v51  ;;  %v2219_v14 = vcombine.high %v5789_v43, %v5780_v36 }
 0x4e3   : > { %v3482_v56 = vsel %vm3463_vm10, %v3481_v58, %v3477_v63  ;;  %v3064_v49 = vrot.slane %v2549_v30, %v5805_v5  ;;  %v3069_v41 = vrot.slane %v2552_v35, %v5808_v10  ;;  %v2661_v30 = vsel %vm2546_vm9, %v5785_v3, -inf }
 0x4e4   : > { %v3745_v57 = vsel %vm3352_vm11, %v3482_v56, %v3744_v21  ;;  %v2251_v35 = vcombine.high %v5783_v18, %v5770_v27  ;;  %v2664_v56 = vsel %vm2546_vm9, %v2269_v34, -inf }
 0x4e5   : > { %v3071_v28 = vsel %vm3070_vm12, %v3069_v41, %v3064_v49  ;;  %2656 = vmax.xlane.f32.xlu1 %v2655_v54  ;;  %2659 = vmax.xlane.f32.xlu0 %v2658_v26  ;;  %v5842_v49 = vcombine.high %v2090_v53, %v2122_v13  ;;  %v5844_v41 = vcombine.high %v2226_v37, %v2258_v25 }
 0x4e6   : > { %v2555_v38 = vpop.xlane.xlu1 %2554  ;;  %v2558_v55 = vpop.xlane.xlu0 %2557  ;;  %v2129_v25 = vrot.slane %v2115_v24, %v5073_v8  ;;  %v2265_v32 = vrot.slane %v2251_v35, %v5073_v8 }
 0x4e7   : > { %v3075_v0 = vrot.slane %v2555_v38, %v5805_v5  ;;  %v3079_v45 = vrot.slane %v2558_v55, %v5808_v10  ;;  %v2865_v37 = vsel %vm2546_vm9, %v5842_v49, 0.0  ;;  %v2868_v51 = vsel %vm2546_vm9, %v5844_v41, 0.0 }
 0x4e8   : > { %v2097_v55 = vrot.slane %v2083_v42, %v5073_v8 }
 0x4e9   : > { %v3080_v16 = vsel %vm3070_vm12, %v3079_v45, %v3075_v0  ;;  %2860 = vadd.xlane.f32.xlu1 %v2859_v29  ;;  %2863 = vadd.xlane.f32.xlu0 %v2862_v62  ;;  %v2667_v29 = vsel %vm2546_vm9, %v2134_v17, -inf  ;;  %v2670_v62 = vsel %vm2546_vm9, %v2270_v6, -inf  ;;  %v2274_v6 = vcombine.low %v5327_v61, %v5570_v33 }
 0x4ea   : > { %v3351_v20 = vsel %vm447_vm0, %v3080_v16, %v3071_v28  ;;  %v2759_v40 = vpop.xlane.xlu1 %2758  ;;  %v2762_v21 = vpop.xlane.xlu0 %2761  ;;  %v5868_v16 = vcombine.low %v2097_v55, %v2129_v25 }
 0x4eb   : > { %v2937_v63 = vmul.f32 0.125, %v2759_v40  ;;  %v2938_v58 = vmul.f32 0.125, %v2762_v21  ;;  %v2306_v21 = vcombine.low %v5591_v9, %v5628_v39 }
 0x4ec   : > { %v2871_v42 = vsel %vm2546_vm9, %v5868_v16, 0.0 }
 0x4ed   : > { %v3486_v54 = vrot.slane %v2937_v63, %v5767_v59  ;;  %v3490_v26 = vrot.slane %v2938_v58, %v5777_v12  ;;  %2662 = vmax.xlane.f32.xlu1 %v2661_v30  ;;  %2665 = vmax.xlane.f32.xlu0 %v2664_v56  ;;  %v2322_v63 = vcombine.low %v5619_v52, %v5640_v15 }
 0x4ee   : > { %v2561_v27 = vpop.xlane.xlu1 %2560  ;;  %v2564_v18 = vpop.xlane.xlu0 %2563 }
 0x4ef   : > { %v3491_v3 = vsel %vm3463_vm10, %v3490_v26, %v3486_v54  ;;  %v3084_v34 = vrot.slane %v2561_v27, %v5805_v5  ;;  %v3088_v13 = vrot.slane %v2564_v18, %v5808_v10  ;;  %v2458_v54 = vcombine.low %v5709_v46, %v5757_v11 }
 0x4f0   : > { %v3746_v53 = vsel %vm3354_vm13, %v3491_v3, %v3745_v57  ;;  %v2233_v57 = vrot.slane %v2219_v14, %v5073_v8  ;;  %v2290_v27 = vcombine.low %v5559_v47, %v5579_v22  ;;  %v5893_v18 = vrot.slane %v2306_v21, %v5070_v7 }
 0x4f1   : > { %v3089_v36 = vsel %vm3070_vm12, %v3088_v13, %v3084_v34  ;;  %2866 = vadd.xlane.f32.xlu1 %v2865_v37  ;;  %2869 = vadd.xlane.f32.xlu0 %v2868_v51  ;;  %v5897_v34 = vrot.slane %v2322_v63, %v5070_v7  ;;  %v2426_v13 = vcombine.low %v5657_v1, %v5692_v31  ;;  %v2676_v21 = vsel %vm2546_vm9, %v5844_v41, -inf }
 0x4f2   : > { %v3353_v43 = vsel %vm3352_vm11, %v3089_v36, %v3351_v20  ;;  %v2765_v28 = vpop.xlane.xlu1 %2764  ;;  %v2768_v38 = vpop.xlane.xlu0 %2767  ;;  %v5870_v40 = vcombine.low %v2233_v57, %v2265_v32 }
 0x4f3   : > { %v2939_v0 = vmul.f32 0.125, %v2765_v28  ;;  %v2940_v45 = vmul.f32 0.125, %v2768_v38  ;;  %v2410_v28 = vcombine.low %v5648_v23, %v5667_v44 }
 0x4f4   : > { %v2874_v14 = vsel %vm2546_vm9, %v5870_v40, 0.0 }
 0x4f5   : > { %v3495_v20 = vrot.slane %v2939_v0, %v5767_v59  ;;  %v3499_v24 = vrot.slane %v2940_v45, %v5777_v12  ;;  %2668 = vmax.xlane.f32.xlu1 %v2667_v29  ;;  %2671 = vmax.xlane.f32.xlu0 %v2670_v62  ;;  %v2137_v45 = vcombine.high %v2097_v55, %v2129_v25  ;;  %v2673_v62 = vsel %vm2546_vm9, %v5842_v49, -inf }
 0x4f6   : > { %v2567_v17 = vpop.xlane.xlu1 %2566  ;;  %v2570_v58 = vpop.xlane.xlu0 %2569  ;;  %v5907_v29 = vrot.slane %v2458_v54, %v5070_v7  ;;  %v5919_v25 = vrot.slane %v2274_v6, %v5070_v7  ;;  %v2370_v49 = vcombine.low %v5893_v18, %v5897_v34  ;;  %v5924_v55 = vrot.slane %v2426_v13, %v5070_v7 }
 0x4f7   : > { %v3500_v30 = vsel %vm3463_vm10, %v3499_v24, %v3495_v20  ;;  %v3093_v35 = vrot.slane %v2567_v17, %v5805_v5  ;;  %v3097_v56 = vrot.slane %v2570_v58, %v5808_v10  ;;  %v2273_v20 = vcombine.high %v2233_v57, %v2265_v32 }
 0x4f8   : > { %v3747_v26 = vsel %vm3356_vm14, %v3500_v30, %v3746_v53  ;;  %v2442_v53 = vcombine.low %v5699_v60, %v5722_v48  ;;  %v5928_v17 = vrot.slane %v2410_v28, %v5070_v7  ;;  %v2877_v54 = vsel %vm2546_vm9, %v2137_v45, 0.0 }
 0x4f9   : > { %v3098_v3 = vsel %vm3070_vm12, %v3097_v56, %v3093_v35  ;;  %2872 = vadd.xlane.f32.xlu1 %v2871_v42  ;;  %2875 = vadd.xlane.f32.xlu0 %v2874_v14  ;;  %v2880_v42 = vsel %vm2546_vm9, %v2273_v20, 0.0  ;;  %v2378_v28 = vrot.slane %v2370_v49, %v5073_v8 }
 0x4fa   : > { %v3355_v37 = vsel %vm3354_vm13, %v3098_v3, %v3353_v43  ;;  %v2771_v51 = vpop.xlane.xlu1 %2770  ;;  %v2774_v36 = vpop.xlane.xlu0 %2773  ;;  %v5914_v43 = vrot.slane %v2290_v27, %v5070_v7  ;;  %v2450_v41 = vrot.slane %v2442_v53, %v5070_v7  ;;  %v2474_v3 = vcombine.low %v5928_v17, %v5924_v55 }
 0x4fb   : > { %v2941_v38 = vmul.f32 0.125, %v2771_v51  ;;  %v2942_v0 = vmul.f32 0.125, %v2774_v36 }
 0x4fc   : > { %v2506_v35 = vcombine.low %v2450_v41, %v5907_v29  ;;  %v2338_v14 = vcombine.low %v5919_v25, %v5914_v43 }
 0x4fd   : > { %v3504_v24 = vrot.slane %v2941_v38, %v5767_v59  ;;  %v3508_v63 = vrot.slane %v2942_v0, %v5777_v12  ;;  %2674 = vmax.xlane.f32.xlu1 %v2673_v62  ;;  %2677 = vmax.xlane.f32.xlu0 %v2676_v21  ;;  %v2679_v38 = vsel %vm2546_vm9, %v5868_v16, -inf  ;;  %v2682_v0 = vsel %vm2546_vm9, %v5870_v40, -inf }
 0x4fe   : > { %v2573_v32 = vpop.xlane.xlu1 %2572  ;;  %v2576_v57 = vpop.xlane.xlu0 %2575  ;;  %v2514_v62 = vrot.slane %v2506_v35, %v5073_v8  ;;  %v2685_v16 = vsel %vm2546_vm9, %v2137_v45, -inf  ;;  %v2482_v40 = vrot.slane %v2474_v3, %v5073_v8  ;;  %v2507_v35 = vcombine.high %v2450_v41, %v5907_v29 }
 0x4ff   : > { %v3509_v58 = vsel %vm3463_vm10, %v3508_v63, %v3504_v24  ;;  %v3102_v30 = vrot.slane %v2573_v32, %v5805_v5  ;;  %v3106_v6 = vrot.slane %v2576_v57, %v5808_v10  ;;  %v2371_v63 = vcombine.high %v5893_v18, %v5897_v34 }
 0x500   : > { %v3748_v56 = vsel %vm3358_vm15, %v3509_v58, %v3747_v26  ;;  %v2688_v18 = vsel %vm2546_vm9, %v2273_v20, -inf  ;;  %v2538_v34 = vcombine.low %v2482_v40, %v2514_v62  ;;  %v2339_v45 = vcombine.high %v5919_v25, %v5914_v43 }
 0x501   : > { %v3107_v27 = vsel %vm3070_vm12, %v3106_v6, %v3102_v30  ;;  %2878 = vadd.xlane.f32.xlu1 %v2877_v54  ;;  %2881 = vadd.xlane.f32.xlu0 %v2880_v42  ;;  %v2521_v43 = vrot.slane %v2507_v35, %v5073_v8 }
 0x502   : > { %v3357_v13 = vsel %vm3356_vm14, %v3107_v27, %v3355_v37  ;;  %v2777_v53 = vpop.xlane.xlu1 %2776  ;;  %v2780_v51 = vpop.xlane.xlu0 %2779  ;;  %v2346_v37 = vrot.slane %v2338_v14, %v5073_v8  ;;  %v2475_v14 = vcombine.high %v5928_v17, %v5924_v55 }
 0x503   : > { %v2943_v36 = vmul.f32 0.125, %v2777_v53  ;;  %v2944_v26 = vmul.f32 0.125, %v2780_v51  ;;  %v2886_v51 = vsel %vm2546_vm9, %v2538_v34, 0.0 }
 0x504   : > { %v5959_v6 = vcombine.low %v2346_v37, %v2378_v28 }
 0x505   : > { %v3513_v21 = vrot.slane %v2943_v36, %v5767_v59  ;;  %v3517_v24 = vrot.slane %v2944_v26, %v5777_v12  ;;  %2680 = vmax.xlane.f32.xlu1 %v2679_v38  ;;  %2683 = vmax.xlane.f32.xlu0 %v2682_v0  ;;  %v2539_v36 = vcombine.high %v2482_v40, %v2514_v62 }
 0x506   : > { %v2579_v49 = vpop.xlane.xlu1 %2578  ;;  %v2582_v32 = vpop.xlane.xlu0 %2581  ;;  %v2883_v20 = vsel %vm2546_vm9, %v5959_v6, 0.0  ;;  %v2385_v26 = vrot.slane %v2371_v63, %v5073_v8  ;;  %v2353_v38 = vrot.slane %v2339_v45, %v5073_v8 }
 0x507   : > { %v3518_v57 = vsel %vm3463_vm10, %v3517_v24, %v3513_v21  ;;  %v3111_v58 = vrot.slane %v2579_v49, %v5805_v5  ;;  %v3115_v30 = vrot.slane %v2582_v32, %v5808_v10  ;;  %v2892_v63 = vsel %vm2546_vm9, %v2539_v36, 0.0 }
 0x508   : > { %v3749_v54 = vsel %vm3360_vm1, %v3518_v57, %v3748_v56  ;;  %v2403_v56 = vcombine.high %v2346_v37, %v2378_v28  ;;  %v2489_v28 = vrot.slane %v2475_v14, %v5073_v8  ;;  %v5985_v49 = vcombine.low %v2353_v38, %v2385_v26 }
 0x509   : > { %v3116_v42 = vsel %vm3070_vm12, %v3115_v30, %v3111_v58  ;;  %2686 = vmax.xlane.f32.xlu1 %v2685_v16  ;;  %2689 = vmax.xlane.f32.xlu0 %v2688_v18  ;;  %v2323_v30 = vcombine.high %v5619_v52, %v5640_v15  ;;  %v2459_v18 = vcombine.high %v5709_v46, %v5757_v11 }
 0x50a   : > { %v3359_v27 = vsel %vm3358_vm15, %v3116_v42, %v3357_v13  ;;  %v2783_v3 = vpop.xlane.xlu1 %2782  ;;  %v2786_v53 = vpop.xlane.xlu0 %2785  ;;  %v2889_v24 = vsel %vm2546_vm9, %v2403_v56, 0.0  ;;  %v5987_v32 = vcombine.low %v2489_v28, %v2521_v43  ;;  %v2895_v42 = vsel %vm2546_vm9, %v5985_v49, 0.0 }
 0x50b   : > { %v2945_v29 = vmul.f32 0.125, %v2783_v3  ;;  %v2946_v41 = vmul.f32 0.125, %v2786_v53  ;;  %v2307_v14 = vcombine.high %v5591_v9, %v5628_v39  ;;  %v2291_v52 = vcombine.high %v5559_v47, %v5579_v22 }
 0x50c   : > { %v2898_v45 = vsel %vm2546_vm9, %v5987_v32, 0.0  ;;  %v2427_v15 = vcombine.high %v5657_v1, %v5692_v31  ;;  %v2443_v46 = vcombine.high %v5699_v60, %v5722_v48  ;;  %v2275_v9 = vcombine.high %v5327_v61, %v5570_v33 }
 0x50d   : > { %v3522_v25 = vrot.slane %v2945_v29, %v5767_v59  ;;  %v3526_v55 = vrot.slane %v2946_v41, %v5777_v12  ;;  %2884 = vadd.xlane.f32.xlu1 %v2883_v20  ;;  %2887 = vadd.xlane.f32.xlu0 %v2886_v51  ;;  %v6018_v39 = vrot.slane %v2323_v30, %v5070_v7  ;;  %v2691_v31 = vsel %vm2546_vm9, %v5959_v6, -inf }
 0x50e   : > { %v2585_v17 = vpop.xlane.xlu1 %2584  ;;  %v2588_v13 = vpop.xlane.xlu0 %2587  ;;  %v2411_v47 = vcombine.high %v5648_v23, %v5667_v44  ;;  %v6026_v1 = vrot.slane %v2459_v18, %v5070_v7  ;;  %v2694_v60 = vsel %vm2546_vm9, %v2538_v34, -inf  ;;  %v6032_v48 = vrot.slane %v2307_v14, %v5070_v7 }
 0x50f   : > { %v3527_v0 = vsel %vm3463_vm10, %v3526_v55, %v3522_v25  ;;  %v3120_v62 = vrot.slane %v2585_v17, %v5805_v5  ;;  %v3124_v21 = vrot.slane %v2588_v13, %v5808_v10  ;;  %v6035_v33 = vrot.slane %v2291_v52, %v5070_v7 }
 0x510   : > { %v3750_v37 = vsel %vm3362_vm4, %v3527_v0, %v3749_v54  ;;  %v6038_v23 = vrot.slane %v2427_v15, %v5070_v7  ;;  %v2457_v44 = vrot.slane %v2443_v46, %v5070_v7  ;;  %v6046_v6 = vrot.slane %v2275_v9, %v5070_v7 }
 0x511   : > { %v3125_v16 = vsel %vm3070_vm12, %v3124_v21, %v3120_v62  ;;  %2890 = vadd.xlane.f32.xlu1 %v2889_v24  ;;  %2893 = vadd.xlane.f32.xlu0 %v2892_v63  ;;  %v2386_v34 = vcombine.low %v6032_v48, %v6018_v39  ;;  %v6051_v20 = vrot.slane %v2411_v47, %v5070_v7  ;;  %v2697_v51 = vsel %vm2546_vm9, %v2403_v56, -inf }
 0x512   : > { %v3361_v40 = vsel %vm3360_vm1, %v3125_v16, %v3359_v27  ;;  %v2591_v57 = vpop.xlane.xlu1 %2590  ;;  %v2594_v58 = vpop.xlane.xlu0 %2593  ;;  %v2522_v25 = vcombine.low %v2457_v44, %v6026_v1  ;;  %v2700_v55 = vsel %vm2546_vm9, %v2539_v36, -inf  ;;  %v2405_v17 = vcombine.high %v2353_v38, %v2385_v26 }
 0x513   : > { %v3129_v35 = vrot.slane %v2591_v57, %v5805_v5  ;;  %v3133_v54 = vrot.slane %v2594_v58, %v5808_v10  ;;  %v2541_v13 = vcombine.high %v2489_v28, %v2521_v43  ;;  %v2354_v0 = vcombine.low %v6046_v6, %v6035_v33 }
 0x514   : > { %v2490_v62 = vcombine.low %v6051_v20, %v6038_v23  ;;  %v2901_v56 = vsel %vm2546_vm9, %v2405_v17, 0.0  ;;  %v2394_v36 = vrot.slane %v2386_v34, %v5073_v8  ;;  %v2530_v26 = vrot.slane %v2522_v25, %v5073_v8 }
 0x515   : > { %v3134_v27 = vsel %vm3070_vm12, %v3133_v54, %v3129_v35  ;;  %2896 = vadd.xlane.f32.xlu1 %v2895_v42  ;;  %2899 = vadd.xlane.f32.xlu0 %v2898_v45  ;;  %v2904_v24 = vsel %vm2546_vm9, %v2541_v13, 0.0  ;;  %v2362_v28 = vrot.slane %v2354_v0, %v5073_v8  ;;  %v2703_v63 = vsel %vm2546_vm9, %v5985_v49, -inf  ;;  %v3969_v42 = vld [vmem:[#allocation9 + $0x78] sm:$0xff] }
 0x516   : > { %v3363_v11 = vsel %vm3362_vm4, %v3134_v27, %v3361_v40  ;;  %v6011_v3 = vpop.xlane.xlu1 %2788  ;;  %v6013_v53 = vpop.xlane.xlu0 %2791  ;;  %v2706_v16 = vsel %vm2546_vm9, %v5987_v32, -inf  ;;  %v2387_v32 = vcombine.high %v6032_v48, %v6018_v39  ;;  %v2709_v45 = vsel %vm2546_vm9, %v2405_v17, -inf  ;;  %3997 = vmatpush1.msra.mxu0 %v3969_v42  ;;  %v3968_v48 = vld [vmem:[#allocation9 + $0x70] sm:$0xff]  ;;  %v3966_v17 = vld [vmem:[#allocation9 + $0x60] sm:$0xff] }
 0x517   : > { %v6023_v22 = vsel %vm595_vm2, %v3363_v11, %v3750_v37  ;;  %v2498_v37 = vrot.slane %v2490_v62, %v5073_v8  ;;  %v2406_v40 = vcombine.low %v2362_v28, %v2394_v36  ;;  %v2523_v14 = vcombine.high %v2457_v44, %v6026_v1  ;;  %3998 = vmatprep.subr.mxu0 %v4729_v19  ;;  %v3967_v44 = vld [vmem:[#allocation9 + $0x68] sm:$0xff] }
 0x518   : > { %v2712_v27 = vsel %vm2546_vm9, %v2541_v13, -inf  ;;  %v2407_v52 = vcombine.high %v2362_v28, %v2394_v36  ;;  %v2355_v46 = vcombine.high %v6046_v6, %v6035_v33  ;;  %v2491_v11 = vcombine.high %v6051_v20, %v6038_v23  ;;  %3999 = vmatpush1.msra.mxu0 %v3968_v48 }
 0x519   : > { %2692 = vmax.xlane.f32.xlu1 %v2691_v31  ;;  %2695 = vmax.xlane.f32.xlu0 %v2694_v60  ;;  %v2542_v57 = vcombine.low %v2498_v37, %v2530_v26  ;;  %v2907_v35 = vsel %vm2546_vm9, %v2406_v40, 0.0  ;;  %v2543_v15 = vcombine.high %v2498_v37, %v2530_v26  ;;  %v2401_v31 = vrot.slane %v2387_v32, %v5073_v8 }
 0x51a   : > { %v6041_v29 = vpop.xlane.xlu1 %2794  ;;  %v6043_v41 = vpop.xlane.xlu0 %2797  ;;  %v2913_v47 = vsel %vm2546_vm9, %v2407_v52, 0.0  ;;  %v2537_v60 = vrot.slane %v2523_v14, %v5073_v8  ;;  %v2369_v23 = vrot.slane %v2355_v46, %v5073_v8  ;;  %v2505_v34 = vrot.slane %v2491_v11, %v5073_v8  ;;  %4000 = vmatprep.subr.mxu0 %v4729_v19  ;;  %v3965_v8 = vld [vmem:[#allocation9 + $0x58] sm:$0xff] }
 0x51b   : > { %v2910_v54 = vsel %vm2546_vm9, %v2542_v57, 0.0  ;;  %v2916_v1 = vsel %vm2546_vm9, %v2543_v15, 0.0  ;;  %v2715_v20 = vsel %vm2546_vm9, %v2406_v40, -inf  ;;  %4001 = vmatpush1.msra.mxu0 %v3967_v44  ;;  %v2949_v28 = vmul.f32 0.125, %v6041_v29 }
 0x51c   : > { %v2408_v25 = vcombine.low %v2369_v23, %v2401_v31  ;;  %4002 = vmatprep.subr.mxu0 %v4729_v19  ;;  %v2950_v37 = vmul.f32 0.125, %v6043_v41  ;;  %v2409_v40 = vcombine.high %v2369_v23, %v2401_v31  ;;  %v2948_v42 = vmul.f32 0.125, %v6013_v53 }
 0x51d   : > { %2698 = vmax.xlane.f32.xlu1 %v2697_v51  ;;  %2701 = vmax.xlane.f32.xlu0 %v2700_v55  ;;  %v2718_v51 = vsel %vm2546_vm9, %v2542_v57, -inf  ;;  %v2544_v55 = vcombine.low %v2505_v34, %v2537_v60  ;;  %v2545_v57 = vcombine.high %v2505_v34, %v2537_v60  ;;  %v3540_v14 = vrot.slane %v2949_v28, %v5767_v59  ;;  %v3960_v34 = vld [vmem:[#allocation9 + $0x30] sm:$0xff]  ;;  %v3959_v28 = vld [vmem:[#allocation9 + $0x28] sm:$0xff] }
 0x51e   : > { %v6060_v21 = vpop.xlane.xlu1 %2800  ;;  %v6062_v7 = vpop.xlane.xlu0 %2803  ;;  %4003 = vmatpush1.msra.mxu0 %v3966_v17  ;;  %v2919_v62 = vsel %vm2546_vm9, %v2408_v25, 0.0  ;;  %v2925_v53 = vsel %vm2546_vm9, %v2409_v40, 0.0  ;;  %v2727_v44 = vsel %vm2546_vm9, %v2408_v25, -inf }
 0x51f   : > { %4004 = vmatprep.subr.mxu0 %v4729_v19  ;;  %v2951_v29 = vmul.f32 0.125, %v6060_v21  ;;  %v2952_v41 = vmul.f32 0.125, %v6062_v7  ;;  %v3535_v7 = vrot.slane %v2948_v42, %v5777_v12  ;;  %v2730_v23 = vsel %vm2546_vm9, %v2544_v55, -inf }
 0x520   : > { %4005 = vmatpush1.msra.mxu0 %v3965_v8 }
 0x521   : > { %2902 = vadd.xlane.f32.xlu1 %v2901_v56  ;;  %2905 = vadd.xlane.f32.xlu0 %v2904_v24  ;;  %v2922_v56 = vsel %vm2546_vm9, %v2544_v55, 0.0  ;;  %v3964_v24 = vld [vmem:[#allocation9 + $0x50] sm:$0xff]  ;;  %v3549_v46 = vrot.slane %v2951_v29, %v5767_v59  ;;  %v3553_v11 = vrot.slane %v2952_v41, %v5777_v12  ;;  %v2733_v55 = vsel %vm2546_vm9, %v2409_v40, -inf }
 0x522   : > { %v6068_v43 = vpop.xlane.xlu1 %2596  ;;  %v6070_v38 = vpop.xlane.xlu0 %2599  ;;  %4006 = vmatprep.subr.mxu0 %v4729_v19 }
 0x523   : > { %4007 = vmatpush1.msra.mxu0 %v3964_v24 }
 0x524   : > { %4008 = vmatprep.subr.mxu0 %v4729_v19 }
 0x525   : > { %2704 = vmax.xlane.f32.xlu1 %v2703_v63  ;;  %2707 = vmax.xlane.f32.xlu0 %v2706_v16  ;;  %v2721_v63 = vsel %vm2546_vm9, %v2407_v52, -inf  ;;  %v2724_v16 = vsel %vm2546_vm9, %v2543_v15, -inf  ;;  %v2928_v52 = vsel %vm2546_vm9, %v2545_v57, 0.0  ;;  %v3961_v15 = vld [vmem:[#allocation9 + $0x38] sm:$0xff] }
 0x526   : > { %v6078_v58 = vpop.xlane.xlu1 %2602  ;;  %v6080_v30 = vpop.xlane.xlu0 %2605 }
 0x527   : > { %v3151_v24 = vrot.slane %v6080_v30, %v5808_v10 }
 0x529   : > { %2908 = vadd.xlane.f32.xlu1 %v2907_v35  ;;  %2911 = vadd.xlane.f32.xlu0 %v2910_v54  ;;  %v3963_v35 = vld [vmem:[#allocation9 + $0x48] sm:$0xff]  ;;  %v2947_v54 = vmul.f32 0.125, %v6011_v3  ;;  %v3962_v3 = vld [vmem:[#allocation9 + $0x40] sm:$0xff] }
 0x52a   : > { %v6084_v18 = vpop.xlane.xlu1 %2806  ;;  %v6086_v49 = vpop.xlane.xlu0 %2809  ;;  %4009 = vmatpush1.msra.mxu0 %v3963_v35 }
 0x52b   : > { %4010 = vmatprep.subr.mxu0 %v4729_v19  ;;  %v3531_v21 = vrot.slane %v2947_v54, %v5767_v59  ;;  %v2953_v60 = vmul.f32 0.125, %v6084_v18  ;;  %v2954_v48 = vmul.f32 0.125, %v6086_v49  ;;  %v6163_v18 = vsel %vm3463_vm10, %v3553_v11, %v3549_v46  ;;  %v3956_v46 = vld [vmem:[#allocation9 + $0x10] sm:$0xff] }
 0x52c   : > { %4011 = vmatpush1.msra.mxu0 %v3962_v3 }
 0x52d   : > { %2710 = vmax.xlane.f32.xlu1 %v2709_v45  ;;  %2713 = vmax.xlane.f32.xlu0 %v2712_v27  ;;  %v3544_v27 = vrot.slane %v2950_v37, %v5777_v12  ;;  %v3558_v37 = vrot.slane %v2953_v60, %v5767_v59 }
 0x52e   : > { %v6098_v9 = vpop.xlane.xlu1 %2608  ;;  %v6100_v39 = vpop.xlane.xlu0 %2611  ;;  %4012 = vmatprep.subr.mxu0 %v4729_v19 }
 0x52f   : > { %v3545_v31 = vsel %vm3463_vm10, %v3544_v27, %v3540_v14  ;;  %4013 = vmatpush1.msra.mxu0 %v3961_v15  ;;  %v3957_v27 = vld [vmem:[#allocation9 + $0x18] sm:$0xff] }
 0x530   : > { %4014 = vmatprep.subr.mxu0 %v4729_v19 }
 0x531   : > { %2914 = vadd.xlane.f32.xlu1 %v2913_v47  ;;  %2917 = vadd.xlane.f32.xlu0 %v2916_v1 }
 0x532   : > { %v6106_v33 = vpop.xlane.xlu1 %2812  ;;  %v6108_v6 = vpop.xlane.xlu0 %2815  ;;  %4015 = vmatpush1.msra.mxu0 %v3960_v34  ;;  %v3955_v34 = vld [vmem:[#allocation9 + $0x8] sm:$0xff] }
 0x533   : > { %v2956_v17 = vmul.f32 0.125, %v6108_v6  ;;  %v3142_v6 = vrot.slane %v6070_v38, %v5808_v10  ;;  %4016 = vmatprep.subr.mxu0 %v4729_v19 }
 0x534   : > { %4017 = vmatpush1.msra.mxu0 %v3959_v28 }
 0x535   : > { %2716 = vmax.xlane.f32.xlu1 %v2715_v20  ;;  %2719 = vmax.xlane.f32.xlu0 %v2718_v51  ;;  %v3536_v20 = vsel %vm3463_vm10, %v3535_v7, %v3531_v21  ;;  %v2955_v51 = vmul.f32 0.125, %v6106_v33  ;;  %v3138_v33 = vrot.slane %v6068_v43, %v5805_v5  ;;  %v3160_v43 = vrot.slane %v6100_v39, %v5808_v10 }
 0x536   : > { %v6115_v13 = vpop.xlane.xlu1 %2614  ;;  %v6117_v0 = vpop.xlane.xlu0 %2617  ;;  %v6160_v8 = vsel %vm447_vm0, %v3545_v31, %v3536_v20  ;;  %4018 = vmatprep.subr.mxu0 %v4729_v19  ;;  %v3785_v20 = vrot.slane %v6023_v22, 5  ;;  %v3954_v22 = vld [vmem:[#allocation9] sm:$0xff] }
 0x537   : > { %v3567_v38 = vrot.slane %v2955_v51, %v5767_v59  ;;  %v3165_v35 = vrot.slane %v6115_v13, %v5805_v5  ;;  %v3143_v41 = vsel %vm3070_vm12, %v3142_v6, %v3138_v33  ;;  %v3752_v51 = vsel %vm3352_vm11, %v6163_v18, %v6160_v8 }
 0x539   : > { %2920 = vadd.xlane.f32.xlu1 %v2919_v62  ;;  %2923 = vadd.xlane.f32.xlu0 %v2922_v56  ;;  %v2736_v62 = vsel %vm2546_vm9, %v2545_v57, -inf  ;;  %v3147_v56 = vrot.slane %v6078_v58, %v5805_v5  ;;  %v3571_v58 = vrot.slane %v2956_v17, %v5777_v12  ;;  %v3958_v57 = vld [vmem:[#allocation9 + $0x20] sm:$0xff]  ;;  %vm6599_vm9 = vcmask 1044480  }
 0x53a   : > { %v6123_v36 = vpop.xlane.xlu1 %2818  ;;  %v6125_v26 = vpop.xlane.xlu0 %2821  ;;  %4019 = vmatpush1.msra.mxu0 %v3958_v57 }
 0x53b   : > { %v2957_v30 = vmul.f32 0.125, %v6123_v36  ;;  %v2958_v40 = vmul.f32 0.125, %v6125_v26  ;;  %v3152_v36 = vsel %vm3070_vm12, %v3151_v24, %v3147_v56  ;;  %4020 = vmatprep.subr.mxu0 %v4729_v19  ;;  %v3572_v11 = vsel %vm3463_vm10, %v3571_v58, %v3567_v38  ;;  %v3981_v38 = vld [vmem:[#allocation9 + $0xd8] sm:$0xff] }
 0x53c   : > { %4021 = vmatpush1.msra.mxu0 %v3957_v27  ;;  %v3364_v17 = vsel %vm447_vm0, %v3152_v36, %v3143_v41  ;;  %v3979_v27 = vld [vmem:[#allocation9 + $0xc8] sm:$0xff] }
 0x53d   : > { %2722 = vmax.xlane.f32.xlu1 %v2721_v63  ;;  %2725 = vmax.xlane.f32.xlu0 %v2724_v16  ;;  %v3562_v63 = vrot.slane %v2954_v48, %v5777_v12  ;;  %v3156_v16 = vrot.slane %v6098_v9, %v5805_v5  ;;  %v3169_v9 = vrot.slane %v6117_v0, %v5808_v10 }
 0x53e   : > { %v6136_v32 = vpop.xlane.xlu1 %2620  ;;  %v6138_v45 = vpop.xlane.xlu0 %2623  ;;  %v3580_v21 = vrot.slane %v2958_v40, %v5777_v12  ;;  %4022 = vmatprep.subr.mxu0 %v4729_v19 }
 0x53f   : > { %v3563_v13 = vsel %vm3463_vm10, %v3562_v63, %v3558_v37  ;;  %v3161_v3 = vsel %vm3070_vm12, %v3160_v43, %v3156_v16  ;;  %v3174_v0 = vrot.slane %v6136_v32, %v5805_v5  ;;  %v3170_v32 = vsel %vm3070_vm12, %v3169_v9, %v3165_v35  ;;  %4023 = vmatpush1.msra.mxu0 %v3956_v46  ;;  %v3980_v9 = vld [vmem:[#allocation9 + $0xd0] sm:$0xff] }
 0x540   : > { %4024 = vmatprep.subr.mxu0 %v4729_v19 }
 0x541   : > { %2926 = vadd.xlane.f32.xlu1 %v2925_v53  ;;  %2929 = vadd.xlane.f32.xlu0 %v2928_v52  ;;  %v3178_v53 = vrot.slane %v6138_v45, %v5808_v10  ;;  %v3576_v52 = vrot.slane %v2957_v30, %v5767_v59 }
 0x542   : > { %v2825_v47 = vpop.xlane.xlu1 %2824  ;;  %v2828_v1 = vpop.xlane.xlu0 %2827  ;;  %4025 = vmatpush1.msra.mxu0 %v3955_v34 }
 0x543   : > { %v2959_v39 = vmul.f32 0.125, %v2825_v47  ;;  %v2960_v54 = vmul.f32 0.125, %v2828_v1  ;;  %4026 = vmatprep.subr.mxu0 %v4729_v19 }
 0x544   : > { %4027 = vmatpush1.msra.mxu0 %v3954_v22 }
 0x545   : > { %2728 = vmax.xlane.f32.xlu1 %v2727_v44  ;;  %2731 = vmax.xlane.f32.xlu0 %v2730_v23  ;;  %v3585_v45 = vrot.slane %v2959_v39, %v5767_v59  ;;  %v3589_v47 = vrot.slane %v2960_v54, %v5777_v12  ;;  %v6247_v39 = vsel %vm3784_vm6, 0.0, %v3785_v20 }
 0x546   : > { %v6165_v49 = vpop.xlane.xlu1 %2626  ;;  %v6167_v25 = vpop.xlane.xlu0 %2629  ;;  %4036 = vmatprep.subr.mxu0 %v4729_v19 }
 0x547   : > { %v3183_v7 = vrot.slane %v6165_v49, %v5805_v5  ;;  %v3187_v15 = vrot.slane %v6167_v25, %v5808_v10  ;;  %v3179_v49 = vsel %vm3070_vm12, %v3178_v53, %v3174_v0  ;;  %v3753_v25 = vsel %vm3354_vm13, %v3563_v13, %v3752_v51  ;;  %4037 = vmatpush2.msra.mxu0 %v3981_v38 }
 0x548   : > { %v3754_v6 = vsel %vm3356_vm14, %v3572_v11, %v3753_v25  ;;  %v3590_v18 = vsel %vm3463_vm10, %v3589_v47, %v3585_v45  ;;  %4038 = vmatprep.subr.mxu0 %v4729_v19  ;;  %v3889_v53 = vrot.slane %v6247_v39, 5  ;;  %v3829_v45 = vrot.slane %v6247_v39, 2 }
 0x549   : > { %2734 = vmax.xlane.f32.xlu1 %v2733_v55  ;;  %2737 = vmax.xlane.f32.xlu0 %v2736_v62  ;;  %v3365_v55 = vsel %vm3352_vm11, %v3161_v3, %v3364_v17  ;;  %v3581_v62 = vsel %vm3463_vm10, %v3580_v21, %v3576_v52  ;;  %v3188_v33 = vsel %vm3070_vm12, %v3187_v15, %v3183_v7  ;;  %v3806_v52 = vrot.slane %v6247_v39, 1  ;;  %v3978_v21 = vld [vmem:[#allocation9 + $0xc0] sm:$0xff] }
 0x54a   : > { %v2831_v42 = vpop.xlane.xlu1 %2830  ;;  %v2834_v29 = vpop.xlane.xlu0 %2833  ;;  %v3366_v8 = vsel %vm3354_vm13, %v3170_v32, %v3365_v55  ;;  %v3755_v58 = vsel %vm3358_vm15, %v3581_v62, %v3754_v6  ;;  %4039 = vmatpush2.msra.mxu0 %v3980_v9  ;;  %v3852_v32 = vrot.slane %v6247_v39, 3  ;;  %v3976_v55 = vld [vmem:[#allocation9 + $0xb0] sm:$0xff] }
 0x54b   : > { %v2961_v26 = vmul.f32 0.125, %v2831_v42  ;;  %v2962_v14 = vmul.f32 0.125, %v2834_v29  ;;  %v3367_v37 = vsel %vm3356_vm14, %v3179_v49, %v3366_v8  ;;  %v3756_v40 = vsel %vm3360_vm1, %v3590_v18, %v3755_v58  ;;  %4040 = vmatprep.subr.mxu0 %v4729_v19 }
 0x54c   : > { %v3368_v30 = vsel %vm3358_vm15, %v3188_v33, %v3367_v37  ;;  %4041 = vmatpush2.msra.mxu0 %v3979_v27 }
 0x54d   : > { %v3594_v60 = vrot.slane %v2961_v26, %v5767_v59  ;;  %v3598_v48 = vrot.slane %v2962_v14, %v5777_v12  ;;  %4042 = vmatprep.subr.mxu0 %v4729_v19 }
 0x54e   : > { %v2633_v1 = vpop.xlane.xlu1 %2632  ;;  %v2636_v31 = vpop.xlane.xlu0 %2635  ;;  %4043 = vmatpush2.msra.mxu0 %v3978_v21  ;;  %v3912_v21 = vrot.slane %v6247_v39, 6 }
 0x54f   : > { %v3192_v44 = vrot.slane %v2633_v1, %v5805_v5  ;;  %v3196_v23 = vrot.slane %v2636_v31, %v5808_v10  ;;  %v3599_v63 = vsel %vm3463_vm10, %v3598_v48, %v3594_v60  ;;  %v3977_v48 = vld [vmem:[#allocation9 + $0xb8] sm:$0xff]  ;;  %4044 = vmatprep.subr.mxu0 %v4729_v19 }
 0x550   : > { %v3757_v54 = vsel %vm3362_vm4, %v3599_v63, %v3756_v40  ;;  %4045 = vmatpush2.msra.mxu0 %v3977_v48  ;;  %v3975_v63 = vld [vmem:[#allocation9 + $0xa8] sm:$0xff] }
 0x551   : > { %v3197_v56 = vsel %vm3070_vm12, %v3196_v23, %v3192_v44  ;;  %4046 = vmatprep.subr.mxu0 %v4729_v19 }
 0x552   : > { %v2639_v24 = vpop.xlane.xlu1 %2638  ;;  %v2642_v28 = vpop.xlane.xlu0 %2641  ;;  %v3369_v57 = vsel %vm3360_vm1, %v3197_v56, %v3368_v30  ;;  %4047 = vmatpush2.msra.mxu0 %v3976_v55 }
 0x553   : > { %v3201_v16 = vrot.slane %v2639_v24, %v5805_v5  ;;  %v3205_v43 = vrot.slane %v2642_v28, %v5808_v10  ;;  %4048 = vmatprep.subr.mxu0 %v4729_v19 }
 0x554   : > { %4049 = vmatpush2.msra.mxu0 %v3975_v63 }
 0x555   : > { %v3206_v35 = vsel %vm3070_vm12, %v3205_v43, %v3201_v16  ;;  %4050 = vmatprep.subr.mxu0 %v4729_v19 }
 0x556   : > { %v3370_v42 = vsel %vm3362_vm4, %v3206_v35, %v3369_v57  ;;  %v2837_v29 = vpop.xlane.xlu1 %2836  ;;  %v2840_v41 = vpop.xlane.xlu0 %2839 }
 0x557   : > { %v3777_v36 = vsel %vm595_vm2, %v3370_v42, %v3757_v54  ;;  %v2963_v26 = vmul.f32 0.125, %v2837_v29  ;;  %v2964_v14 = vmul.f32 0.125, %v2840_v41  ;;  %v3974_v29 = vld [vmem:[#allocation9 + $0xa0] sm:$0xff] }
 0x558   : > { %v3786_v13 = vrot.slane %v3777_v36, 5  ;;  %4051 = vmatpush2.msra.mxu0 %v3974_v29 }
 0x559   : > { %v3603_v3 = vrot.slane %v2963_v26, %v5767_v59  ;;  %v3607_v0 = vrot.slane %v2964_v14, %v5777_v12  ;;  %4052 = vmatprep.subr.mxu0 %v4729_v19 }
 0x55a   : > { %v6259_v7 = vsel %vm3784_vm6, %v3785_v20, %v3786_v13  ;;  %v6262_v15 = vsel %vm3784_vm6, %v3786_v13, 0.0  ;;  %v2843_v46 = vpop.xlane.xlu1 %2842  ;;  %v2846_v11 = vpop.xlane.xlu0 %2845  ;;  %v3973_v13 = vld [vmem:[#allocation9 + $0x98] sm:$0xff] }
 0x55b   : > { %v3608_v47 = vsel %vm3463_vm10, %v3607_v0, %v3603_v3  ;;  %v2965_v1 = vmul.f32 0.125, %v2843_v46  ;;  %v2966_v31 = vmul.f32 0.125, %v2846_v11  ;;  %v3890_v60 = vrot.slane %v6259_v7, 5  ;;  %v3972_v46 = vld [vmem:[#allocation9 + $0x90] sm:$0xff]  ;;  %4053 = vmatpush2.msra.mxu0 %v3973_v13 }
 0x55c   : > { %v3807_v44 = vrot.slane %v6259_v7, 1  ;;  %v3809_v23 = vrot.slane %v6262_v15, 1  ;;  %v3853_v34 = vrot.slane %v6259_v7, 3  ;;  %v3855_v20 = vrot.slane %v6262_v15, 3  ;;  %4054 = vmatprep.subr.mxu0 %v4729_v19 }
 0x55d   : > { %v3612_v51 = vrot.slane %v2965_v1, %v5767_v59  ;;  %v3616_v17 = vrot.slane %v2966_v31, %v5777_v12  ;;  %v3891_v49 = vsel %vm3784_vm6, %v3889_v53, %v3890_v60  ;;  %v3830_v25 = vrot.slane %v6259_v7, 2  ;;  %v3971_v1 = vld [vmem:[#allocation9 + $0x88] sm:$0xff]  ;;  %4055 = vmatpush2.msra.mxu0 %v3972_v46 }
 0x55e   : > { %v2849_v62 = vpop.xlane.xlu1 %2848  ;;  %v2852_v33 = vpop.xlane.xlu0 %2851  ;;  %v3808_v22 = vsel %vm3805_vm8, %v3806_v52, %v3807_v44  ;;  %v3810_v6 = vsel %vm3805_vm8, %v3807_v44, %v3809_v23  ;;  %v3854_v8 = vsel %vm6599_vm9, %v3852_v32, %v3853_v34  ;;  %v3856_v18 = vsel %vm6599_vm9, %v3853_v34, %v3855_v20  ;;  %4056 = vmatprep.subr.mxu0 %v4729_v19  ;;  %v3970_v34 = vld [vmem:[#allocation9 + $0x80] sm:$0xff] }
 0x55f   : > { %v3617_v56 = vsel %vm3463_vm10, %v3616_v17, %v3612_v51  ;;  %v2967_v24 = vmul.f32 0.125, %v2849_v62  ;;  %v2968_v28 = vmul.f32 0.125, %v2852_v33  ;;  %3899 = vrot.lane.b32.xlu0 %v3891_v49, %s4726_s22  ;;  %v4491_v37 = vpack.i.bf16 %v3810_v6, %v3808_v22  ;;  %4057 = vmatpush2.msra.mxu0 %v3971_v1 }
 0x560   : > { %v3758_v16 = vsel %vm447_vm0, %v3617_v56, %v3608_v47  ;;  %v3831_v43 = vsel %vm3828_vm7, %v3829_v45, %v3830_v25  ;;  %v3832_v38 = vrot.slane %v6262_v15, 2  ;;  %v4501_v40 = vpack.i.bf16 %v3856_v18, %v3854_v8  ;;  %4058 = vmatprep.subr.mxu0 %v4729_v19 }
 0x561   : > { %v3621_v58 = vrot.slane %v2967_v24, %v5767_v59  ;;  %v3625_v30 = vrot.slane %v2968_v28, %v5777_v12  ;;  %4492 = vrot.lane.b32.xlu1 %v4491_v37, %s4726_s22  ;;  %vm3911_vm9 = vcmask 1041408   ;;  %v3913_v54 = vrot.slane %v6259_v7, 6  ;;  %4059 = vmatpush2.msra.mxu0 %v3970_v34 }
 0x562   : > { %v2645_v57 = vpop.xlane.xlu1 %2644  ;;  %v2648_v35 = vpop.xlane.xlu0 %2647  ;;  %v3833_v9 = vsel %vm3828_vm7, %v3830_v25, %v3832_v38  ;;  %v3915_v42 = vrot.slane %v6262_v15, 6  ;;  %v3892_v47 = vrot.slane %v6262_v15, 5 }
 0x563   : > { %v3626_v41 = vsel %vm3463_vm10, %v3625_v30, %v3621_v58  ;;  %v3210_v36 = vrot.slane %v2645_v57, %v5805_v5  ;;  %v3214_v26 = vrot.slane %v2648_v35, %v5808_v10  ;;  %4502 = vrot.lane.b32.xlu0 %v4501_v40, %s4725_s20  ;;  %v4496_v14 = vpack.i.bf16 %v3833_v9, %v3831_v43 }
 0x564   : > { %v3759_v27 = vsel %vm3352_vm11, %v3626_v41, %v3758_v16  ;;  %v3916_v52 = vsel %vm3911_vm9, %v3913_v54, %v3915_v42  ;;  %v3914_v45 = vsel %vm3911_vm9, %v3912_v21, %v3913_v54  ;;  %v3893_v17 = vsel %vm3784_vm6, %v3890_v60, %v3892_v47 }
 0x565   : > { %v3215_v3 = vsel %vm3070_vm12, %v3214_v26, %v3210_v36  ;;  %4497 = vrot.lane.b32.xlu1 %v4496_v14, %s4724_s16 }
 0x566   : > { %v2651_v0 = vpop.xlane.xlu1 %2650  ;;  %v2654_v53 = vpop.xlane.xlu0 %2653 }
 0x567   : > { %v3219_v11 = vrot.slane %v2651_v0, %v5805_v5  ;;  %v3223_v32 = vrot.slane %v2654_v53, %v5808_v10  ;;  %3924 = vrot.lane.b32.xlu0 %v3916_v52, %s4724_s16 }
 0x569   : > { %v3224_v31 = vsel %vm3070_vm12, %v3223_v32, %v3219_v11  ;;  %3922 = vrot.lane.b32.xlu1 %v3914_v45, %s4724_s16 }
 0x56a   : > { %v3371_v48 = vsel %vm447_vm0, %v3224_v31, %v3215_v3  ;;  %v2855_v44 = vpop.xlane.xlu1 %2854  ;;  %v2858_v23 = vpop.xlane.xlu0 %2857 }
 0x56b   : > { %v2969_v20 = vmul.f32 0.125, %v2855_v44  ;;  %v2970_v51 = vmul.f32 0.125, %v2858_v23 }
 0x56d   : > { %v3630_v49 = vrot.slane %v2969_v20, %v5767_v59  ;;  %v3634_v25 = vrot.slane %v2970_v51, %v5777_v12  ;;  %3901 = vrot.lane.b32.xlu1 %v3893_v17, %s4726_s22 }
 0x56e   : > { %v2657_v55 = vpop.xlane.xlu1 %2656  ;;  %v2660_v62 = vpop.xlane.xlu0 %2659 }
 0x56f   : > { %v3635_v33 = vsel %vm3463_vm10, %v3634_v25, %v3630_v49  ;;  %v3228_v22 = vrot.slane %v2657_v55, %v5805_v5  ;;  %v3232_v6 = vrot.slane %v2660_v62, %v5808_v10 }
 0x570   : > { %v3760_v8 = vsel %vm3354_vm13, %v3635_v33, %v3759_v27 }
 0x571   : > { %v3233_v60 = vsel %vm3070_vm12, %v3232_v6, %v3228_v22 }
 0x572   : > { %v3372_v19 = vsel %vm3352_vm11, %v3233_v60, %v3371_v48  ;;  %v2861_v18 = vpop.xlane.xlu1 %2860  ;;  %v2864_v56 = vpop.xlane.xlu0 %2863 }
 0x573   : > { %v2971_v24 = vmul.f32 0.125, %v2861_v18  ;;  %v2972_v28 = vmul.f32 0.125, %v2864_v56 }
 0x575   : > { %v3639_v37 = vrot.slane %v2971_v24, %v5767_v59  ;;  %v3643_v63 = vrot.slane %v2972_v28, %v5777_v12 }
 0x576   : > { %v2663_v16 = vpop.xlane.xlu1 %2662  ;;  %v2666_v43 = vpop.xlane.xlu0 %2665 }
 0x577   : > { %v3644_v38 = vsel %vm3463_vm10, %v3643_v63, %v3639_v37  ;;  %v3237_v58 = vrot.slane %v2663_v16, %v5805_v5  ;;  %v3241_v30 = vrot.slane %v2666_v43, %v5808_v10 }
 0x578   : > { %v3761_v40 = vsel %vm3356_vm14, %v3644_v38, %v3760_v8 }
 0x579   : > { %v3242_v57 = vsel %vm3070_vm12, %v3241_v30, %v3237_v58 }
 0x57a   : > { %v3373_v35 = vsel %vm3354_vm13, %v3242_v57, %v3372_v19  ;;  %v2867_v9 = vpop.xlane.xlu1 %2866  ;;  %v2870_v54 = vpop.xlane.xlu0 %2869 }
 0x57b   : > { %v2973_v42 = vmul.f32 0.125, %v2867_v9  ;;  %v2974_v29 = vmul.f32 0.125, %v2870_v54 }
 0x57d   : > { %v3648_v41 = vrot.slane %v2973_v42, %v5767_v59  ;;  %v3652_v36 = vrot.slane %v2974_v29, %v5777_v12 }
 0x57e   : > { %v2669_v26 = vpop.xlane.xlu1 %2668  ;;  %v2672_v14 = vpop.xlane.xlu0 %2671 }
 0x57f   : > { %v3653_v27 = vsel %vm3463_vm10, %v3652_v36, %v3648_v41  ;;  %v3246_v13 = vrot.slane %v2669_v26, %v5805_v5  ;;  %v3250_v3 = vrot.slane %v2672_v14, %v5808_v10 }
 0x580   : > { %v3762_v0 = vsel %vm3358_vm15, %v3653_v27, %v3761_v40 }
 0x581   : > { %v3251_v53 = vsel %vm3070_vm12, %v3250_v3, %v3246_v13 }
 0x582   : > { %v3374_v52 = vsel %vm3356_vm14, %v3251_v53, %v3373_v35  ;;  %v2873_v21 = vpop.xlane.xlu1 %2872  ;;  %v2876_v46 = vpop.xlane.xlu0 %2875 }
 0x583   : > { %v2975_v11 = vmul.f32 0.125, %v2873_v21  ;;  %v2976_v32 = vmul.f32 0.125, %v2876_v46 }
 0x585   : > { %v3657_v45 = vrot.slane %v2975_v11, %v5767_v59  ;;  %v3661_v47 = vrot.slane %v2976_v32, %v5777_v12 }
 0x586   : > { %v2675_v1 = vpop.xlane.xlu1 %2674  ;;  %v2678_v31 = vpop.xlane.xlu0 %2677 }
 0x587   : > { %v3662_v48 = vsel %vm3463_vm10, %v3661_v47, %v3657_v45  ;;  %v3255_v44 = vrot.slane %v2675_v1, %v5805_v5  ;;  %v3259_v23 = vrot.slane %v2678_v31, %v5808_v10 }
 0x588   : > { %v3763_v34 = vsel %vm3360_vm1, %v3662_v48, %v3762_v0 }
 0x589   : > { %v3260_v20 = vsel %vm3070_vm12, %v3259_v23, %v3255_v44 }
 0x58a   : > { %v3375_v51 = vsel %vm3358_vm15, %v3260_v20, %v3374_v52  ;;  %v2879_v17 = vpop.xlane.xlu1 %2878  ;;  %v2882_v49 = vpop.xlane.xlu0 %2881 }
 0x58b   : > { %v2977_v25 = vmul.f32 0.125, %v2879_v17  ;;  %v2978_v55 = vmul.f32 0.125, %v2882_v49 }
 0x58d   : > { %v3666_v62 = vrot.slane %v2977_v25, %v5767_v59  ;;  %v3670_v33 = vrot.slane %v2978_v55, %v5777_v12 }
 0x58e   : > { %v2681_v22 = vpop.xlane.xlu1 %2680  ;;  %v2684_v6 = vpop.xlane.xlu0 %2683 }
 0x58f   : > { %v3671_v8 = vsel %vm3463_vm10, %v3670_v33, %v3666_v62  ;;  %v3264_v60 = vrot.slane %v2681_v22, %v5805_v5  ;;  %v3268_v19 = vrot.slane %v2684_v6, %v5808_v10 }
 0x590   : > { %v3764_v18 = vsel %vm3362_vm4, %v3671_v8, %v3763_v34 }
 0x591   : > { %v3269_v56 = vsel %vm3070_vm12, %v3268_v19, %v3264_v60 }
 0x592   : > { %v3376_v24 = vsel %vm3360_vm1, %v3269_v56, %v3375_v51  ;;  %v2687_v28 = vpop.xlane.xlu1 %2686  ;;  %v2690_v37 = vpop.xlane.xlu0 %2689 }
 0x593   : > { %v3273_v63 = vrot.slane %v2687_v28, %v5805_v5  ;;  %v3277_v16 = vrot.slane %v2690_v37, %v5808_v10 }
 0x595   : > { %v3278_v43 = vsel %vm3070_vm12, %v3277_v16, %v3273_v63 }
 0x596   : > { %v3377_v38 = vsel %vm3362_vm4, %v3278_v43, %v3376_v24  ;;  %v2885_v58 = vpop.xlane.xlu1 %2884  ;;  %v2888_v30 = vpop.xlane.xlu0 %2887 }
 0x597   : > { %v6368_v40 = vsel %vm595_vm2, %v3377_v38, %v3764_v18  ;;  %v2979_v45 = vmul.f32 0.125, %v2885_v58  ;;  %v2980_v47 = vmul.f32 0.125, %v2888_v30 }
 0x599   : > { %v3675_v20 = vrot.slane %v2979_v45, %v5767_v59  ;;  %v3679_v51 = vrot.slane %v2980_v47, %v5777_v12 }
 0x59a   : > { %v2891_v57 = vpop.xlane.xlu1 %2890  ;;  %v2894_v35 = vpop.xlane.xlu0 %2893 }
 0x59b   : > { %v2981_v11 = vmul.f32 0.125, %v2891_v57  ;;  %v2982_v32 = vmul.f32 0.125, %v2894_v35  ;;  %v3680_v6 = vsel %vm3463_vm10, %v3679_v51, %v3675_v20 }
 0x59d   : > { %v3684_v23 = vrot.slane %v2981_v11, %v5767_v59  ;;  %v3688_v34 = vrot.slane %v2982_v32, %v5777_v12 }
 0x59e   : > { %v2897_v9 = vpop.xlane.xlu1 %2896  ;;  %v2900_v54 = vpop.xlane.xlu0 %2899 }
 0x59f   : > { %v2983_v1 = vmul.f32 0.125, %v2897_v9  ;;  %v2984_v31 = vmul.f32 0.125, %v2900_v54  ;;  %v3689_v62 = vsel %vm3463_vm10, %v3688_v34, %v3684_v23 }
 0x5a0   : > { %v3765_v19 = vsel %vm447_vm0, %v3689_v62, %v3680_v6 }
 0x5a1   : > { %v3693_v17 = vrot.slane %v2983_v1, %v5767_v59  ;;  %v3697_v49 = vrot.slane %v2984_v31, %v5777_v12 }
 0x5a2   : > { %v2693_v42 = vpop.xlane.xlu1 %2692  ;;  %v2696_v29 = vpop.xlane.xlu0 %2695 }
 0x5a3   : > { %v3698_v18 = vsel %vm3463_vm10, %v3697_v49, %v3693_v17  ;;  %v3282_v28 = vrot.slane %v2693_v42, %v5805_v5  ;;  %v3286_v37 = vrot.slane %v2696_v29, %v5808_v10 }
 0x5a6   : > { %v2699_v41 = vpop.xlane.xlu1 %2698  ;;  %v2702_v36 = vpop.xlane.xlu0 %2701 }
 0x5a7   : > { %v3291_v63 = vrot.slane %v2699_v41, %v5805_v5  ;;  %v3295_v16 = vrot.slane %v2702_v36, %v5808_v10 }
 0x5aa   : > { %v2903_v26 = vpop.xlane.xlu1 %2902  ;;  %v2906_v14 = vpop.xlane.xlu0 %2905 }
 0x5ab   : > { %v2985_v33 = vmul.f32 0.125, %v2903_v26  ;;  %v2986_v22 = vmul.f32 0.125, %v2906_v14 }
 0x5ad   : > { %v3702_v43 = vrot.slane %v2985_v33, %v5767_v59  ;;  %v3706_v38 = vrot.slane %v2986_v22, %v5777_v12 }
 0x5ae   : > { %v2705_v27 = vpop.xlane.xlu1 %2704  ;;  %v2708_v13 = vpop.xlane.xlu0 %2707 }
 0x5af   : > { %v3300_v58 = vrot.slane %v2705_v27, %v5805_v5  ;;  %v3304_v30 = vrot.slane %v2708_v13, %v5808_v10  ;;  %v3296_v27 = vsel %vm3070_vm12, %v3295_v16, %v3291_v63  ;;  %v3707_v11 = vsel %vm3463_vm10, %v3706_v38, %v3702_v43 }
 0x5b2   : > { %v2909_v3 = vpop.xlane.xlu1 %2908  ;;  %v2912_v0 = vpop.xlane.xlu0 %2911 }
 0x5b3   : > { %v2987_v8 = vmul.f32 0.125, %v2909_v3  ;;  %v2988_v60 = vmul.f32 0.125, %v2912_v0  ;;  %v3287_v3 = vsel %vm3070_vm12, %v3286_v37, %v3282_v28 }
 0x5b4   : > { %v3378_v62 = vsel %vm447_vm0, %v3296_v27, %v3287_v3  ;;  %vm3874_vm0 = vcmask 1043456   ;;  %v3878_v3 = vrot.slane %v6262_v15, 4 }
 0x5b5   : > { %v3711_v57 = vrot.slane %v2987_v8, %v5767_v59  ;;  %v3715_v35 = vrot.slane %v2988_v60, %v5777_v12 }
 0x5b6   : > { %v6370_v53 = vpop.xlane.xlu1 %2710  ;;  %v2714_v52 = vpop.xlane.xlu0 %2713 }
 0x5b7   : > { %v3309_v42 = vrot.slane %v6370_v53, %v5805_v5  ;;  %v3313_v29 = vrot.slane %v2714_v52, %v5808_v10  ;;  %v3716_v1 = vsel %vm3463_vm10, %v3715_v35, %v3711_v57  ;;  %v3876_v57 = vrot.slane %v6259_v7, 4 }
 0x5b9   : > { %v3314_v31 = vsel %vm3070_vm12, %v3313_v29, %v3309_v42 }
 0x5ba   : > { %v2915_v21 = vpop.xlane.xlu1 %2914  ;;  %v2918_v46 = vpop.xlane.xlu0 %2917 }
 0x5bb   : > { %v2989_v9 = vmul.f32 0.125, %v2915_v21  ;;  %v2990_v54 = vmul.f32 0.125, %v2918_v46  ;;  %v3305_v21 = vsel %vm3070_vm12, %v3304_v30, %v3300_v58 }
 0x5bc   : > { %v3379_v6 = vsel %vm3352_vm11, %v3305_v21, %v3378_v62 }
 0x5bd   : > { %v3720_v52 = vrot.slane %v2989_v9, %v5767_v59  ;;  %v3724_v32 = vrot.slane %v2990_v54, %v5777_v12  ;;  %v3380_v60 = vsel %vm3354_vm13, %v3314_v31, %v3379_v6 }
 0x5be   : > { %v6372_v48 = vpop.xlane.xlu1 %2716  ;;  %v6374_v44 = vpop.xlane.xlu0 %2719 }
 0x5bf   : > { %v3318_v46 = vrot.slane %v6372_v48, %v5805_v5  ;;  %v3322_v53 = vrot.slane %v6374_v44, %v5808_v10 }
 0x5c1   : > { %v3323_v33 = vsel %vm3070_vm12, %v3322_v53, %v3318_v46 }
 0x5c2   : > { %v2921_v25 = vpop.xlane.xlu1 %2920  ;;  %v2924_v55 = vpop.xlane.xlu0 %2923 }
 0x5c3   : > { %v2991_v41 = vmul.f32 0.125, %v2921_v25  ;;  %v2992_v36 = vmul.f32 0.125, %v2924_v55  ;;  %v3788_v25 = vrot.slane %v6368_v40, 5  ;;  %v3766_v55 = vsel %vm3352_vm11, %v3698_v18, %v3765_v19 }
 0x5c4   : > { %v3767_v22 = vsel %vm3354_vm13, %v3707_v11, %v3766_v55 }
 0x5c5   : > { %v3729_v23 = vrot.slane %v2991_v41, %v5767_v59  ;;  %v3733_v34 = vrot.slane %v2992_v36, %v5777_v12  ;;  %v3768_v8 = vsel %vm3356_vm14, %v3716_v1, %v3767_v22  ;;  %v6442_v35 = vsel %vm3784_vm6, 0.0, %v3788_v25 }
 0x5c6   : > { %v2723_v56 = vpop.xlane.xlu1 %2722  ;;  %v2726_v24 = vpop.xlane.xlu0 %2725  ;;  %v3875_v41 = vrot.slane %v6247_v39, 4  ;;  %v3811_v21 = vrot.slane %v6442_v35, 1  ;;  %v3834_v46 = vrot.slane %v6442_v35, 2 }
 0x5c7   : > { %v3327_v45 = vrot.slane %v2723_v56, %v5805_v5  ;;  %v3331_v47 = vrot.slane %v2726_v24, %v5808_v10  ;;  %v3734_v40 = vsel %vm3463_vm10, %v3733_v34, %v3729_v23  ;;  %v3381_v24 = vsel %vm3356_vm14, %v3323_v33, %v3380_v60 }
 0x5c8   : > { %v3917_v33 = vrot.slane %v6442_v35, 6 }
 0x5ca   : > { %v2927_v26 = vpop.xlane.xlu1 %2926  ;;  %v2930_v14 = vpop.xlane.xlu0 %2929 }
 0x5cb   : > { %v2993_v13 = vmul.f32 0.125, %v2927_v26  ;;  %v2994_v0 = vmul.f32 0.125, %v2930_v14  ;;  %v3877_v26 = vsel %vm3874_vm0, %v3875_v41, %v3876_v57  ;;  %v3894_v14 = vrot.slane %v6442_v35, 5 }
 0x5cd   : > { %v3738_v44 = vrot.slane %v2993_v13, %v5767_v59  ;;  %v3742_v51 = vrot.slane %v2994_v0, %v5777_v12  ;;  %v3725_v59 = vsel %vm3463_vm10, %v3724_v32, %v3720_v52  ;;  %v3332_v12 = vsel %vm3070_vm12, %v3331_v47, %v3327_v45 }
 0x5ce   : > { %v2729_v48 = vpop.xlane.xlu1 %2728  ;;  %v2732_v20 = vpop.xlane.xlu0 %2731  ;;  %v3769_v16 = vsel %vm3358_vm15, %v3725_v59, %v3768_v8  ;;  %v3382_v43 = vsel %vm3358_vm15, %v3332_v12, %v3381_v24  ;;  %v3879_v8 = vsel %vm3874_vm0, %v3876_v57, %v3878_v3 }
 0x5cf   : > { %v3336_v17 = vrot.slane %v2729_v48, %v5805_v5  ;;  %v3340_v49 = vrot.slane %v2732_v20, %v5808_v10  ;;  %v3743_v28 = vsel %vm3463_vm10, %v3742_v51, %v3738_v44  ;;  %v3770_v38 = vsel %vm3360_vm1, %v3734_v40, %v3769_v16 }
 0x5d0   : > { %v3771_v9 = vsel %vm3362_vm4, %v3743_v28, %v3770_v38 }
 0x5d1   : > { %v3341_v19 = vsel %vm3070_vm12, %v3340_v49, %v3336_v17 }
 0x5d2   : > { %v2735_v18 = vpop.xlane.xlu1 %2734  ;;  %v2738_v56 = vpop.xlane.xlu0 %2737  ;;  %v3383_v58 = vsel %vm3360_vm1, %v3341_v19, %v3382_v43  ;;  %v3857_v43 = vrot.slane %v6442_v35, 3 }
 0x5d3   : > { %v3345_v37 = vrot.slane %v2735_v18, %v5805_v5  ;;  %v3349_v63 = vrot.slane %v2738_v56, %v5808_v10 }
 0x5d5   : > { %v3350_v30 = vsel %vm3070_vm12, %v3349_v63, %v3345_v37  ;;  %vm6617_vm12 = vcmask 1044480  }
 0x5d6   : > { %v3384_v5 = vsel %vm3362_vm4, %v3350_v30, %v3383_v58  ;;  %v4493_v10 = vpop.permute.xlu1 %4492  ;;  %v3900_v54 = vpop.permute.xlu0 %3899  ;;  %vm6618_vm13 = vmmov %vm6617_vm12 }
 0x5d7   : > { %v3779_v42 = vsel %vm595_vm2, %v3384_v5, %v3771_v9  ;;  %v4494_v29 = vunpack.i.l.bf16 %v4493_v10  ;;  %v4495_v53 = vunpack.i.h.bf16 %v4493_v10  ;;  %v3946_v52 = vsel %vm1116_vm3, %v3877_v26, %v3900_v54 }
 0x5d8   : > { %v3789_v36 = vrot.slane %v3779_v42, 5  ;;  %vm6613_vm2 = vcmask 785408   ;;  %v3880_v54 = vrot.slane %v6442_v35, 4 }
 0x5d9   : > { %v3934_v45 = vsel %vm1116_vm3, %v6247_v39, %v4494_v29  ;;  %vm6614_vm10 = vmmov %vm6613_vm2  ;;  %v3935_v12 = vsel %vm1116_vm3, %v6259_v7, %v4495_v53 }
 0x5da   : > { %v6452_v27 = vsel %vm3784_vm6, %v3788_v25, %v3789_v36  ;;  %v6455_v13 = vsel %vm3784_vm6, %v3789_v36, 0.0  ;;  %v4498_v0 = vpop.permute.xlu1 %4497  ;;  %v4503_v11 = vpop.permute.xlu0 %4502  ;;  %vm6616_vm11 = vmmov %vm6613_vm2 }
 0x5db   : > { %v4499_v32 = vunpack.i.l.bf16 %v4498_v0  ;;  %v4504_v15 = vunpack.i.l.bf16 %v4503_v11  ;;  %v3895_v47 = vrot.slane %v6452_v27, 5  ;;  %v3812_v1 = vrot.slane %v6452_v27, 1  ;;  %vm6619_vm14 = vmmov %vm6613_vm2 }
 0x5dc   : > { %v3814_v31 = vrot.slane %v6455_v13, 1  ;;  %v4500_v23 = vunpack.i.h.bf16 %v4498_v0  ;;  %v3835_v48 = vrot.slane %v6452_v27, 2  ;;  %v3837_v20 = vrot.slane %v6455_v13, 2  ;;  %vm6620_vm15 = vmmov %vm6613_vm2 }
 0x5dd   : > { %v3938_v34 = vsel %vm1122_vm5, %v3934_v45, %v4499_v32  ;;  %v3896_v51 = vsel %vm3784_vm6, %v3894_v14, %v3895_v47  ;;  %v3813_v17 = vsel %vm3805_vm8, %v3811_v21, %v3812_v1  ;;  %v3918_v49 = vrot.slane %v6452_v27, 6  ;;  %vm6621_vm1 = vmmov %vm6613_vm2 }
 0x5de   : > { %v3923_v44 = vpop.permute.xlu1 %3922  ;;  %v3815_v39 = vsel %vm3805_vm8, %v3812_v1, %v3814_v31  ;;  %3903 = vrot.lane.b32.xlu0 %v3896_v51, %s4726_s22  ;;  %v3942_v62 = vsel %vm6614_vm10, %v3938_v34, %v4504_v15  ;;  %v3836_v22 = vsel %vm3828_vm7, %v3834_v46, %v3835_v48  ;;  %v3838_v6 = vsel %vm3828_vm7, %v3835_v48, %v3837_v20  ;;  %v3925_v56 = vpop.permute.xlu0 %3924  ;;  %vm6615_vm7 = vmmov %vm6613_vm2 }
 0x5df   : > { %v4506_v25 = vpack.i.bf16 %v3815_v39, %v3813_v17  ;;  %v3950_v55 = vsel %vm1122_vm5, %v3946_v52, %v3923_v44  ;;  %v4505_v59 = vunpack.i.h.bf16 %v4503_v11  ;;  %v3919_v40 = vsel %vm3911_vm9, %v3917_v33, %v3918_v49  ;;  %vm6622_vm4 = vmmov %vm6621_vm1 }
 0x5e0   : > { %4249 = vmatprep.mubr.msk.f32.mxu0 %vm6613_vm2, %v3950_v55  ;;  %v3897_v19 = vrot.slane %v6455_v13, 5  ;;  %v3939_v18 = vsel %vm1122_vm5, %v3935_v12, %v4500_v23  ;;  %v4511_v28 = vpack.i.bf16 %v3838_v6, %v3836_v22  ;;  %v3858_v63 = vrot.slane %v6452_v27, 3 }
 0x5e1   : > { %4507 = vrot.lane.b32.xlu1 %v4506_v25, %s4726_s22  ;;  %4061 = vmatmul.mubr.f32.vlgmr.msra.gmra.mxu0 %v3942_v62  ;;  %v3943_v7 = vsel %vm6616_vm11, %v3939_v18, %v4505_v59  ;;  %v3860_v38 = vrot.slane %v6455_v13, 3  ;;  %v3920_v30 = vrot.slane %v6455_v13, 6  ;;  %v3881_v5 = vrot.slane %v6452_v27, 4 }
 0x5e2   : > { %v3902_v60 = vpop.permute.xlu1 %3901  ;;  %3926 = vrot.lane.b32.xlu0 %v3919_v40, %s4724_s16  ;;  %v3898_v16 = vsel %vm3784_vm6, %v3895_v47, %v3897_v19  ;;  %v3859_v58 = vsel %vm6617_vm12, %v3857_v43, %v3858_v63  ;;  %v3883_v46 = vrot.slane %v6455_v13, 4  ;;  %v3983_v20 = vstv %s3982_s28 }
 0x5e3   : > { %v3947_v24 = vsel %vm1116_vm3, %v3879_v8, %v3902_v60  ;;  %v3861_v57 = vsel %vm6618_vm13, %v3858_v63, %v3860_v38  ;;  %v3921_v9 = vsel %vm3911_vm9, %v3918_v49, %v3920_v30  ;;  %v3882_v29 = vsel %vm3874_vm0, %v3880_v54, %v3881_v5 }
 0x5e4   : > { %v3951_v37 = vsel %vm1122_vm5, %v3947_v24, %v3925_v56  ;;  %v3884_v47 = vsel %vm3874_vm0, %v3881_v5, %v3883_v46 }
 0x5e5   : > { %4512 = vrot.lane.b32.xlu1 %v4511_v28, %s4724_s16  ;;  %4250 = vmatprep.mubr.msk.f32.mxu0 %vm6615_vm7, %v3951_v37 }
 0x5e6   : > { %4066 = vmatmul.mubr.f32.gmra.mxu0 %v3943_v7  ;;  %3905 = vrot.lane.b32.xlu0 %v3898_v16, %s4726_s22 }
 0x5e9   : > { %3866 = vrot.lane.b32.xlu1 %v3859_v58, %s4725_s20 }
 0x5ea   : > { %3868 = vrot.lane.b32.xlu0 %v3861_v57, %s4725_s20  ;;  %s4266_s20 = sshll.u32 %s4803_s5, 9  ;;  %s4742_s5 = smov [#allocation11]  }
 0x5eb   : > { %s6538_s21 = scalar_lea.hbm %s6591_s6, %s4266_s20  ;;  %s4646_s13 = sshll.u32 %s4742_s5, 4  ;;  %s4647_s13 = int_to_ptr.vmem [resolvable:$false] %s4646_s13 }
 0x5ec   : > { %s4648_s27 = scalar_lea.vmem %s4647_s13, 1024 }
 0x5ed   : > { %3928 = vrot.lane.b32.xlu1 %v3921_v9, %s4724_s16  ;;  %s6526_s16 = scalar_lea.vmem [#allocation11], %s6623_s30 }
 0x5ee   : > { %s4128_s22 = sshll.u32 %s6526_s16, 4  ;;  %s6541_s22 = int_to_ptr.vmem [resolvable:$true] %s4128_s22 }
 0x5ef   : > { %s4642_s9 = scalar_lea.vmem %s6541_s22, 512  ;;  %p4649_p12 = scmp.lt.s32.totalorder %s6541_s22, %s4647_s13 }
 0x5f0   : > { %p4643_p7 = scmp.ne.s32.totalorder %s6541_s22, %s4642_s9  ;;  %p4650_p13 = scmp.lt.s32.totalorder %s4648_s27, %s4642_s9 }
 0x5f2   : > { %p4644_p11 = pnand %p4643_p7, %p6624_p1  ;;  %p4651_p2 = por %p4650_p13, %p4649_p12 }
 0x5f4   : > { %p4645_p9 = pneg %p4644_p11 }
 0x5f6   : > { %p4652_p5 = pnand %p4651_p2, %p4645_p9 }
 0x650   : > { %v3904_v10 = vpop.permute.xlu0 %3903 }
 0x651   : > { %v3948_v41 = vsel %vm1116_vm3, %v3882_v29, %v3904_v10 }
 0x653   : > { %v4508_v42 = vpop.permute.xlu1 %4507 }
 0x654   : > { %v4509_v36 = vunpack.i.l.bf16 %v4508_v42  ;;  %v3927_v26 = vpop.permute.xlu0 %3926  ;;  %v4510_v52 = vunpack.i.h.bf16 %v4508_v42 }
 0x655   : > { %v3952_v14 = vsel %vm1122_vm5, %v3948_v41, %v3927_v26 }
 0x656   : > { %4251 = vmatprep.mubr.msk.f32.mxu0 %vm6619_vm14, %v3952_v14  ;;  %v3936_v21 = vsel %vm1116_vm3, %v6442_v35, %v4509_v36  ;;  %v3937_v34 = vsel %vm1116_vm3, %v6452_v27, %v4510_v52 }
 0x657   : > { %v4513_v3 = vpop.permute.xlu1 %4512 }
 0x658   : > { %v4514_v0 = vunpack.i.l.bf16 %v4513_v3  ;;  %v3906_v11 = vpop.permute.xlu0 %3905  ;;  %v4515_v45 = vunpack.i.h.bf16 %v4513_v3 }
 0x659   : > { %v3949_v31 = vsel %vm1116_vm3, %v3884_v47, %v3906_v11 }
 0x65a   : > { %v3940_v53 = vsel %vm1122_vm5, %v3936_v21, %v4514_v0  ;;  %v3941_v13 = vsel %vm1122_vm5, %v3937_v34, %v4515_v45 }
 0x65b   : > { %v3867_v32 = vpop.permute.xlu1 %3866 }
 0x65c   : > { %v3944_v15 = vsel %vm6620_vm15, %v3940_v53, %v3867_v32  ;;  %v3869_v1 = vpop.permute.xlu0 %3868 }
 0x65d   : > { %4071 = vmatmul.mubr.f32.gmra.mxu0 %v3944_v15  ;;  %v3945_v48 = vsel %vm6622_vm4, %v3941_v13, %v3869_v1 }
 0x65f   : > { %v3929_v23 = vpop.permute.xlu1 %3928 }
 0x660   : > { %v3953_v35 = vsel %vm1122_vm5, %v3949_v31, %v3929_v23 }
 0x661   : > { %4252 = vmatprep.mubr.msk.f32.mxu0 %vm6621_vm1, %v3953_v35 }
 0x662   : > { %4076 = vmatmul.mubr.f32.gmra.mxu0 %v3945_v48 }
 0x6a1   : > { %v4062_v44 = vpop.f32.mrf.mxu0 }
 0x6a2   : > { %v4063_v51 = vadd.f32 %v4062_v44, %v3983_v20 }
 0x6a3   : > { %v4064_v17 = vpop.f32.mrf.mxu0 }
 0x6a4   : > { %v4253_v39 = vmul.f32 -1.442695, %v4063_v51 }
 0x6a6   : > { %4520 = vpow2.f32 %v4253_v39  ;;  %v4067_v49 = vpop.f32.mrf.mxu0 }
 0x6a7   : > { %v4068_v25 = vadd.f32 %v4067_v49, %v3983_v20 }
 0x6a8   : > { %v4069_v27 = vpop.f32.mrf.mxu0 }
 0x6a9   : > { %v4254_v55 = vmul.f32 -1.442695, %v4068_v25 }
 0x6ab   : > { %4522 = vpow2.f32 %v4254_v55 }
 0x6b3   : > { %v4521_v62 = vpop.eup %4520 }
 0x6b4   : > { %v4093_v33 = vadd.f32 1.0, %v4521_v62 }
 0x6b6   : > { %4524 = vrcp.f32 %v4093_v33 }
 0x6b8   : > { %v4523_v22 = vpop.eup %4522 }
 0x6b9   : > { %v4094_v6 = vadd.f32 1.0, %v4523_v22 }
 0x6bb   : > { %4526 = vrcp.f32 %v4094_v6 }
 0x6c3   : > { %v4525_v59 = vpop.eup %4524 }
 0x6c4   : > { %v4105_v12 = vmul.f32 %v4525_v59, %v5259_v4 }
 0x6c6   : > { %4109 = vst [vmem:[%s6526_s16] sm:$0xff] %v4105_v12 }
 0x6c8   : > { %v4527_v8 = vpop.eup %4526 }
 0x6c9   : > { %v4106_v60 = vmul.f32 %v4527_v8, %v5263_v2 }
 0x6cb   : > { %4110 = vst [vmem:[%s6526_s16 + $0x8] sm:$0xff] %v4106_v60 }
 0x71d   : > { %v4072_v40 = vpop.f32.mrf.mxu0 }
 0x71e   : > { %v4073_v19 = vadd.f32 %v4072_v40, %v3983_v20 }
 0x71f   : > { %v4074_v18 = vpop.f32.mrf.mxu0 }
 0x720   : > { %v4255_v56 = vmul.f32 -1.442695, %v4073_v19 }
 0x722   : > { %4528 = vpow2.f32 %v4255_v56  ;;  %v4077_v24 = vpop.f32.mrf.mxu0 }
 0x723   : > { %v4078_v4 = vadd.f32 %v4077_v24, %v3983_v20 }
 0x724   : > { %v4079_v28 = vpop.f32.mrf.mxu0 }
 0x725   : > { %v4256_v37 = vmul.f32 -1.442695, %v4078_v4 }
 0x727   : > { %4530 = vpow2.f32 %v4256_v37 }
 0x72f   : > { %v4529_v63 = vpop.eup %4528 }
 0x730   : > { %v4095_v7 = vadd.f32 1.0, %v4529_v63 }
 0x732   : > { %4532 = vrcp.f32 %v4095_v7 }
 0x734   : > { %v4531_v2 = vpop.eup %4530 }
 0x735   : > { %v4096_v16 = vadd.f32 1.0, %v4531_v2 }
 0x737   : > { %4534 = vrcp.f32 %v4096_v16 }
 0x73f   : > { %v4533_v43 = vpop.eup %4532 }
 0x740   : > { %v4107_v38 = vmul.f32 %v4533_v43, %v5321_v50 }
 0x742   : > { %4111 = vst [vmem:[%s6526_s16 + $0x10] sm:$0xff] %v4107_v38 }
 0x744   : > { %v4535_v58 = vpop.eup %4534 }
 0x745   : > { %v4108_v30 = vmul.f32 %v4535_v58, %v5327_v61 }
 0x747   : > { %4112 = vst [vmem:[%s6526_s16 + $0x18] sm:$0xff] %v4108_v30 }
 0x748   : > { %4655 = shalt.err (!%p4652_p5)
}
 0x749   : > { %s4656_s19 = scalar_lea.hbm %s6538_s21, 512  ;;  %s4660_s30 = scalar_lea.hbm %s6591_s6, 2048 }
 0x74a   : > { %p4657_p6 = scmp.ne.s32.totalorder %s6538_s21, %s4656_s19  ;;  %p4661_p0 = scmp.lt.s32.totalorder %s6538_s21, %s6591_s6 }
 0x74b   : > { %p4662_p10 = scmp.lt.s32.totalorder %s4660_s30, %s4656_s19 }
 0x74c   : > { %p4658_p4 = pnand %p4657_p6, %p6624_p1 }
 0x74d   : > { %p4663_p3 = por %p4662_p10, %p4661_p0 }
 0x74e   : > { %p4659_p8 = pneg %p4658_p4 }
 0x750   : > { %p4664_p7 = pnand %p4663_p3, %p4659_p8 }
 0x752   : > { %4667 = shalt.err (!%p4664_p7)
}
 0x753   : > { %s4743_s7 = smov 128  }
 0x754   : > { %4335 = dma.vmem_to_hbm [thread:$0]  (%p6624_p1), %s6541_s22, 512, %s6538_s21, %s4114_s10, %s4743_s7, %s4743_s7, %s4741_s15  }
 0x755 PF: > { %p4362_p11 = scmp.ge.s32.totalorder %s4714_s26, 2  ;;  %s4143_s18 = sand.u32 1, %s4702_s23  }
 0x756   : > { %p6625_p9 = scmp.ne.s32.totalorder %s6601_s29, 0  ;;  %s4144_s9 = scalar_lea.sflag [#allocation5], %s4143_s18 }
 0x758   : > { %p4352_p12 = pnand %p4362_p11, %p6625_p9 }
 0x75a   : > { %p4353_p13 = pneg %p4352_p12 }
 0x75c   : > { %4697 = dma.done.wait (%p4353_p13), %s4144_s9, 512  }
 0x75d   : > { %4699 = vsyncadd (%p4353_p13), %s4144_s9, 4294966784  ;;  %p22_p2 = scmp.ge.s32.totalorder %s4870_s8, 6   ;;  %s6626_s23 = smov %s4706_s24 }
 0x75e   : > { %s6627_s24 = smov %s4710_s25  ;;  %s6628_s25 = smov %s4880_s11 }
 0x75f   : > { %s6629_s26 = smov %s4870_s8  ;;  %24 = sbr.rel (!%p22_p2) target bundleno = 9 (0x9), region = 101 }
 0x764   :  { %4149 = vsyncpa [#allocation4], 1 }
 0x765   :  { %4151 = vsyncpa [#allocation4 + $0x1], 1 }
 0x766   :  { %4152 = vsyncpa [#allocation7], 1 }
 0x767   :  { %4153 = vsyncpa [#allocation10], 1 }
 0x768   :  { %4154 = vsyncpa [#allocation5], 1 }
 0x769   :  { %4156 = vsyncpa [#allocation5 + $0x1], 1 }

</bundles_post_ra>
